<compile_context>
chip_gen: v6e
topology: v6e:2x2x1
jax: 0.10.0
libtpu: 0.0.40
codegen_flags: <defaults>
</compile_context>

<pallas_src>
from functools import partial

import numpy as np
import jax
import jax.numpy as jnp
from jax import lax
from jax.experimental import pallas as pl
from jax.experimental.pallas import tpu as pltpu


_LANE = 128  # hidden (expanded) channels are padded to a multiple of this


def _round_up(x, m):
    return ((x + m - 1) // m) * m


# ----------------------------------------------------------------------------
# Pallas kernel: one (batch element, hidden-channel tile) per grid step.
# ----------------------------------------------------------------------------
def _inverted_residual_kernel(
    x_ref,      # (1, H, W, CinK)        f32
    w1_ref,     # (Cin, T)               bf16  expand 1x1, BN scale folded (dummy if no expand)
    b1_ref,     # (1, T)                 f32   expand BN bias              (dummy if no expand)
    wdw_ref,    # (3, 3, T)              f32   depthwise 3x3, BN scale folded
    b2_ref,     # (1, T)                 f32   depthwise BN bias
    w2_ref,     # (T, OupP)              bf16  project 1x1, BN scale folded (cols zero-padded)
    b3_ref,     # (1, Oup)               f32   project BN bias
    o_ref,      # (1, Hout, Wout, Oup)   f32   written once at the last hid tile
    pad_ref,    # VMEM (H+2, Wp, T)      f32   row + column halo scratch
    yacc_ref,   # VMEM (Hout*Wout, OupP) f32   lane-dense project accumulator
    *rest,      # (dws_ref,) only when stride == 2: VMEM (Hout, W, T) f32
    H, W, stride, has_expand, use_res,
):
    k = pl.program_id(1)
    n_hid = pl.num_programs(1)
    tile = wdw_ref.shape[-1]
    oup = b3_ref.shape[-1]
    Hout = (H - 1) // stride + 1
    Wout = (W - 1) // stride + 1
    Wp = pad_ref.shape[1]                 # == 8 + round_up(W + 1, 8)
    dws_ref = rest[0] if stride == 2 else None

    # Zero only the halo regions (never overwritten by the interior store) at
    # the start of every batch element.  The interior columns that the right
    # halo group may overlap (when W % 8 != 0) are rewritten by the interior
    # store below before any tap reads them, so this stays correct.
    @pl.when(k == 0)
    def _():
        zrow = jnp.zeros((1, Wp, tile), jnp.float32)
        pad_ref[0:1, :, :] = zrow                      # top halo row
        pad_ref[H + 1:H + 2, :, :] = zrow              # bottom halo row
        zcol = jnp.zeros((H + 2, 8, tile), jnp.float32)
        pad_ref[:, 0:8, :] = zcol                      # left halo group (col 7)
        pad_ref[:, Wp - 8:Wp, :] = zcol                # right halo group (col W+8)

    x = x_ref[0]                          # (H, W, CinK) f32
    cin = x.shape[-1]

    # ---------------- 1x1 expand + bias + ReLU6 (this hid tile) -------------
    if has_expand:
        x2d = x.reshape(H * W, cin)
        if cin <= 8:
            # K far too small to fill the MXU: Cin broadcast-FMAs on the VPU.
            w1 = w1_ref[...].astype(jnp.float32)       # (Cin, T)
            h2d = x2d[:, 0:1] * w1[0:1, :]
            for c in range(1, cin):
                h2d = h2d + x2d[:, c:c + 1] * w1[c:c + 1, :]
        else:
            h2d = jnp.dot(x2d.astype(jnp.bfloat16), w1_ref[...],
                          preferred_element_type=jnp.float32)
        h = jnp.clip(h2d + b1_ref[...], 0.0, 6.0).reshape(H, W, tile)
    else:
        h = x                              # tile == CinK in this case

    # ---------------- 3x3 depthwise (pad=1) + bias + ReLU6 ------------------
    # Interior store is sublane-group aligned (column offset 8); row and
    # column halos come from the pre-zeroed scratch.
    pad_ref[1:H + 1, 8:8 + W, :] = h

    wdw = wdw_ref[...]                     # (3, 3, T) f32

    # Single accumulator over the 9 taps; each shifted window is consumed
    # immediately (2 live slabs: one row window + the accumulator).
    acc = None
    for di in range(3):
        r = pad_ref[di:di + H, :, :]                       # (H, Wp, T)
        if stride == 2:
            # Even-row subsample via a leading-dim reshape (no strided slice
            # along tiled dims).
            r = r.reshape(Hout, 2, Wp, tile)[:, 0]         # (Hout, Wp, T)
        for dj in range(3):
            t = r[:, 7 + dj:7 + dj + W, :] * wdw[di, dj]   # (Hr, W, T)
            acc = t if acc is None else acc + t

    if stride == 2:
        # Even-column subsample: one store + one sublane-strided read.
        dws_ref[...] = acc
        acc = dws_ref[:, pl.ds(0, Wout, stride=2), :]      # (Hout, Wout, T)

    d = jnp.clip(acc + b2_ref[0], 0.0, 6.0)

    # ---------------- 1x1 project (accumulated over hid tiles) --------------
    d2d = d.reshape(Hout * Wout, tile).astype(jnp.bfloat16)
    y = jnp.dot(d2d, w2_ref[...], preferred_element_type=jnp.float32)

    @pl.when(k == 0)
    def _():
        yacc_ref[...] = y

    @pl.when(k > 0)
    def _():
        yacc_ref[...] = yacc_ref[...] + y

    @pl.when(k == n_hid - 1)
    def _():
        out = (yacc_ref[...][:, :oup] + b3_ref[...]).reshape(Hout, Wout, oup)
        if use_res:
            out = out + x[:, :, :oup]
        o_ref[0] = out.astype(o_ref.dtype)


# ----------------------------------------------------------------------------
# Host-side parameter preparation: fold BN scales into weights, pad hidden and
# output channel dims to lane multiples, cast 1x1 weights to bf16.
# ----------------------------------------------------------------------------
def prepare_params(params, *, expand_ratio, lane=_LANE):
    has_expand = expand_ratio != 1
    wdw = params["wdw"] * params["s2"]            # (3,3,hid) * (1,hid)
    w2 = params["w2"] * params["s3"]              # (hid,oup) * (1,oup)
    b2 = params["b2"]
    b3 = params["b3"]
    hid = wdw.shape[-1]
    oup = w2.shape[-1]
    oup_p = _round_up(oup, lane)

    hid_p = _round_up(hid, lane)
    ph = hid_p - hid
    if ph:
        wdw = jnp.pad(wdw, ((0, 0), (0, 0), (0, ph)))
        b2 = jnp.pad(b2, ((0, 0), (0, ph)))
        w2 = jnp.pad(w2, ((0, ph), (0, 0)))

    if has_expand:
        w1 = params["w1"] * params["s1"]          # (inp,hid) * (1,hid)
        b1 = params["b1"]
        if ph:
            w1 = jnp.pad(w1, ((0, 0), (0, ph)))
            b1 = jnp.pad(b1, ((0, 0), (0, ph)))
        w1 = w1.astype(jnp.bfloat16)
        tile = lane
        cin_pad_to = None
    else:
        # No expansion: hidden == input channels.  Pad them to a full lane so
        # the depthwise / project run lane dense; the wrapper zero-pads x.
        w1 = jnp.zeros((1, 1), jnp.bfloat16)
        b1 = jnp.zeros((1, 1), jnp.float32)
        tile = hid_p
        cin_pad_to = hid_p

    po = oup_p - oup
    if po:
        w2 = jnp.pad(w2, ((0, 0), (0, po)))       # lane-dense project output

    return dict(
        w1=w1,
        b1=b1.astype(jnp.float32),
        wdw=wdw.astype(jnp.float32),
        b2=b2.astype(jnp.float32),
        w2=w2.astype(jnp.bfloat16),
        b3=b3.astype(jnp.float32),
        hid_padded=hid_p,
        tile=tile,
        oup=oup,
        oup_padded=oup_p,
        has_expand=has_expand,
        cin_pad_to=cin_pad_to,
    )


def _vmem_limit_bytes(*, H, W, Hout, Wout, cin_k, tile, oup, oup_p, stride):
    f32 = 4
    Wp = 8 + _round_up(W + 1, 8)
    scratch = (H + 2) * Wp * tile * f32 + Hout * Wout * oup_p * f32
    if stride == 2:
        scratch += Hout * W * tile * f32
    blocks = 2 * H * W * cin_k * f32 + 2 * Hout * Wout * oup * f32
    weights = 2 * (cin_k * tile * 2 + 9 * tile * f32 + 2 * tile * f32
                   + tile * oup_p * 2 + oup * f32)
    live = 3 * H * W * tile * f32      # h + row window + tap accumulator
    est = scratch + blocks + weights + live + (4 << 20)
    try:
        phys = pltpu.get_tpu_info().vmem_capacity_bytes
    except Exception:
        phys = 128 * 1024 * 1024
    return int(min(max(est, 32 << 20), phys - (8 << 20)))


# ----------------------------------------------------------------------------
# NHWC core (what a full network should call) + NCHW boundary shim.
# ----------------------------------------------------------------------------
def inverted_residual_nhwc(x_nhwc, prep, *, stride):
    N, H, W, cin = x_nhwc.shape
    oup = prep["oup"]
    oup_p = prep["oup_padded"]
    has_expand = prep["has_expand"]
    tile = prep["tile"]
    hid_p = prep["hid_padded"]
    n_hid = hid_p // tile
    use_res = (stride == 1) and (cin == oup)

    if stride not in (1, 2):
        raise ValueError("stride must be 1 or 2")
    if stride == 2 and (H % 2 or W % 2):
        # TODO(synk): odd spatial dims with stride=2 need one extra pad row/col.
        raise ValueError("stride=2 path requires even H and W")

    Hout = (H - 1) // stride + 1
    Wout = (W - 1) // stride + 1
    Wp = 8 + _round_up(W + 1, 8)

    x = x_nhwc.astype(jnp.float32)
    if prep["cin_pad_to"] is not None and prep["cin_pad_to"] != cin:
        x = jnp.pad(x, ((0, 0), (0, 0), (0, 0), (0, prep["cin_pad_to"] - cin)))
    cin_k = x.shape[-1]

    kernel = partial(_inverted_residual_kernel, H=H, W=W, stride=stride,
                     has_expand=has_expand, use_res=use_res)

    if has_expand:
        w1_spec = pl.BlockSpec((cin_k, tile), lambda n, k: (0, k))
        b1_spec = pl.BlockSpec((1, tile), lambda n, k: (0, k))
    else:
        w1_spec = pl.BlockSpec((1, 1), lambda n, k: (0, 0))
        b1_spec = pl.BlockSpec((1, 1), lambda n, k: (0, 0))

    scratch = [
        pltpu.VMEM((H + 2, Wp, tile), jnp.float32),        # halo'd depthwise input
        pltpu.VMEM((Hout * Wout, oup_p), jnp.float32),     # lane-dense project acc
    ]
    if stride == 2:
        scratch.append(pltpu.VMEM((Hout, W, tile), jnp.float32))

    out = pl.pallas_call(
        kernel,
        out_shape=jax.ShapeDtypeStruct((N, Hout, Wout, oup), jnp.float32),
        grid_spec=pltpu.PrefetchScalarGridSpec(
            num_scalar_prefetch=0,
            grid=(N, n_hid),
            in_specs=[
                pl.BlockSpec((1, H, W, cin_k), lambda n, k: (n, 0, 0, 0)),
                w1_spec,
                b1_spec,
                pl.BlockSpec((3, 3, tile), lambda n, k: (0, 0, k)),
                pl.BlockSpec((1, tile), lambda n, k: (0, k)),
                pl.BlockSpec((tile, oup_p), lambda n, k: (k, 0)),
                pl.BlockSpec((1, oup), lambda n, k: (0, 0)),
            ],
            out_specs=pl.BlockSpec((1, Hout, Wout, oup),
                                   lambda n, k: (n, 0, 0, 0)),
            scratch_shapes=scratch,
        ),
        compiler_params=pltpu.CompilerParams(
            dimension_semantics=("parallel", "arbitrary"),
            vmem_limit_bytes=_vmem_limit_bytes(
                H=H, W=W, Hout=Hout, Wout=Wout, cin_k=cin_k, tile=tile,
                oup=oup, oup_p=oup_p, stride=stride),
        ),
    )(x, prep["w1"], prep["b1"], prep["wdw"], prep["b2"], prep["w2"],
      prep["b3"])
    return out


def inverted_residual(x_nchw, params, *, stride, expand_ratio):
    """NCHW boundary shim matching the PyTorch module.  In a real network the
    NHWC core should be called directly (avoids per-block transposes)."""
    prep = prepare_params(params, expand_ratio=expand_ratio)
    x = jnp.transpose(x_nchw, (0, 2, 3, 1))
    y = inverted_residual_nhwc(x, prep, stride=stride)
    return jnp.transpose(y, (0, 3, 1, 2))


# ----------------------------------------------------------------------------
# Deterministic synthetic parameters (inference-mode BN scale/bias).
# ----------------------------------------------------------------------------
def make_params(key, inp, oup, expand_ratio, eps=1e-5):
    hid = int(round(inp * expand_ratio))
    ks = jax.random.split(key, 12)

    def fold_bn(kg, kb, km, kv, c):
        gamma = jax.random.uniform(kg, (c,), jnp.float32, 0.5, 1.5)
        beta = jax.random.uniform(kb, (c,), jnp.float32, -0.2, 0.2)
        mean = jax.random.uniform(km, (c,), jnp.float32, -0.2, 0.2)
        var = jax.random.uniform(kv, (c,), jnp.float32, 0.5, 1.5)
        scale = gamma / jnp.sqrt(var + eps)
        bias = beta - mean * scale
        return scale.reshape(1, c), bias.reshape(1, c)

    w1 = jax.random.normal(ks[0], (inp, hid), jnp.float32) * 0.2
    s1, b1 = fold_bn(ks[1], ks[2], ks[3], ks[4], hid)
    wdw = jax.random.normal(ks[5], (3, 3, hid), jnp.float32) * 0.2
    s2, b2 = fold_bn(ks[6], ks[7], ks[8], ks[9], hid)
    w2 = jax.random.normal(ks[10], (hid, oup), jnp.float32) * 0.2
    s3, b3 = fold_bn(ks[11], ks[0], ks[1], ks[2], oup)

    return dict(w1=w1, s1=s1, b1=b1, wdw=wdw, s2=s2, b2=b2,
                w2=w2, s3=s3, b3=b3)


# ----------------------------------------------------------------------------
# Pure-JAX f32 reference (NHWC, unfused) for correctness checks.
# ----------------------------------------------------------------------------
def ref_forward(x_nchw, p, *, stride, expand_ratio):
    x = jnp.transpose(x_nchw, (0, 2, 3, 1)).astype(jnp.float32)
    cin = x.shape[-1]
    hid = p["wdw"].shape[-1]
    oup = p["w2"].shape[-1]
    h = x
    if expand_ratio != 1:
        h = jnp.einsum("nhwc,cd->nhwd", x, p["w1"]) * p["s1"][0] + p["b1"][0]
        h = jnp.clip(h, 0.0, 6.0)
    dw = lax.conv_general_dilated(
        h, p["wdw"].reshape(3, 3, 1, hid),
        window_strides=(stride, stride), padding=((1, 1), (1, 1)),
        dimension_numbers=("NHWC", "HWIO", "NHWC"),
        feature_group_count=hid,
    )
    dw = jnp.clip(dw * p["s2"][0] + p["b2"][0], 0.0, 6.0)
    y = jnp.einsum("nhwc,cd->nhwd", dw, p["w2"]) * p["s3"][0] + p["b3"][0]
    if stride == 1 and cin == oup:
        y = y + x
    return jnp.transpose(y, (0, 3, 1, 2))


if __name__ == "__main__":
    key = jax.random.PRNGKey(0)
    # (inp, oup, stride, expand_ratio, N, H, W)
    configs = [
        (4, 4, 1, 6, 2, 16, 16),   # expand + residual        (stride 1)
        (4, 8, 2, 6, 2, 16, 16),   # expand, no residual      (stride 2)
        (8, 8, 1, 1, 2, 16, 16),   # no expand, residual      (stride 1)
    ]
    for inp, oup, stride, er, N, H, W in configs:
        key, kx, kp = jax.random.split(key, 3)
        x = jax.random.normal(kx, (N, inp, H, W), jnp.float32)
        params = make_params(kp, inp, oup, er)

        out = jax.block_until_ready(
            inverted_residual(x, params, stride=stride, expand_ratio=er))
        ref = jax.block_until_ready(
            ref_forward(x, params, stride=stride, expand_ratio=er))

        np.testing.assert_allclose(np.asarray(out), np.asarray(ref),
                                   rtol=5e-2, atol=5e-2)

    print("KERNEL_OK")
</pallas_src>

<mosaic_0001>
module attributes {stable_mosaic.version = 11 : i64} {
  func.func @_inverted_residual_kernel(%arg0: i32, %arg1: i32, %arg2: memref<1x16x16x4xf32, #tpu.memory_space<vmem>>, %arg3: memref<4x128xbf16, #tpu.memory_space<vmem>>, %arg4: memref<1x128xf32, #tpu.memory_space<vmem>>, %arg5: memref<3x3x128xf32, #tpu.memory_space<vmem>>, %arg6: memref<1x128xf32, #tpu.memory_space<vmem>>, %arg7: memref<128x128xbf16, #tpu.memory_space<vmem>>, %arg8: memref<1x4xf32, #tpu.memory_space<vmem>>, %arg9: memref<1x16x16x4xf32, #tpu.memory_space<vmem>>, %arg10: memref<18x32x128xf32, #tpu.memory_space<vmem>>, %arg11: memref<256x128xf32, #tpu.memory_space<vmem>>) attributes {dimension_semantics = [#tpu.dimension_semantics<parallel>, #tpu.dimension_semantics<arbitrary>], iteration_bounds = array<i64: 2, 1>, scalar_prefetch = 0 : i64, scratch_operands = 2 : i64, tpu.core_type = #tpu.core_type<tc>, window_params = [{transform_indices = @transform_0, window_bounds = array<i64: 1, 16, 16, 4>}, {transform_indices = @transform_1, window_bounds = array<i64: 4, 128>}, {transform_indices = @transform_2, window_bounds = array<i64: 1, 128>}, {transform_indices = @transform_3, window_bounds = array<i64: 3, 3, 128>}, {transform_indices = @transform_4, window_bounds = array<i64: 1, 128>}, {transform_indices = @transform_5, window_bounds = array<i64: 128, 128>}, {pipeline_mode = #tpu.pipeline_mode<synchronous>, transform_indices = @transform_6, window_bounds = array<i64: 1, 4>}, {transform_indices = @transform_7, window_bounds = array<i64: 1, 16, 16, 4>}]} {
    %c0_i32 = arith.constant 0 : i32
    %0 = arith.cmpi eq, %arg1, %c0_i32 : i32
    %1 = arith.extui %0 : i1 to i32
    %c0_i32_0 = arith.constant 0 : i32
    %2 = arith.cmpi ne, %1, %c0_i32_0 : i32
    scf.if %2 {
      %cst_34 = arith.constant 0.000000e+00 : f32
      %128 = vector.broadcast %cst_34 : f32 to vector<1x32x128xf32>
      %c0_35 = arith.constant 0 : index
      %c0_36 = arith.constant 0 : index
      %c0_37 = arith.constant 0 : index
      %129 = vector.load %arg10[%c0_35, %c0_36, %c0_37] : memref<18x32x128xf32, #tpu.memory_space<vmem>>, vector<1x32x128xf32>
      tpu.vector_store %arg10[%c0_35, %c0_36, %c0_37], %128 {strides = array<i32>} : memref<18x32x128xf32, #tpu.memory_space<vmem>>, vector<1x32x128xf32>,
      %c17 = arith.constant 17 : index
      %c0_38 = arith.constant 0 : index
      %c0_39 = arith.constant 0 : index
      %130 = vector.load %arg10[%c17, %c0_38, %c0_39] : memref<18x32x128xf32, #tpu.memory_space<vmem>>, vector<1x32x128xf32>
      tpu.vector_store %arg10[%c17, %c0_38, %c0_39], %128 {strides = array<i32>} : memref<18x32x128xf32, #tpu.memory_space<vmem>>, vector<1x32x128xf32>,
      %cst_40 = arith.constant 0.000000e+00 : f32
      %131 = vector.broadcast %cst_40 : f32 to vector<18x8x128xf32>
      %c0_41 = arith.constant 0 : index
      %c0_42 = arith.constant 0 : index
      %c0_43 = arith.constant 0 : index
      %132 = vector.load %arg10[%c0_41, %c0_42, %c0_43] : memref<18x32x128xf32, #tpu.memory_space<vmem>>, vector<18x8x128xf32>
      tpu.vector_store %arg10[%c0_41, %c0_42, %c0_43], %131 {strides = array<i32>} : memref<18x32x128xf32, #tpu.memory_space<vmem>>, vector<18x8x128xf32>,
      %c0_44 = arith.constant 0 : index
      %c24 = arith.constant 24 : index
      %c0_45 = arith.constant 0 : index
      %133 = vector.load %arg10[%c0_44, %c24, %c0_45] : memref<18x32x128xf32, #tpu.memory_space<vmem>>, vector<18x8x128xf32>
      tpu.vector_store %arg10[%c0_44, %c24, %c0_45], %131 {strides = array<i32>} : memref<18x32x128xf32, #tpu.memory_space<vmem>>, vector<18x8x128xf32>,
    } else {
    }
    %c0 = arith.constant 0 : index
    %c0_1 = arith.constant 0 : index
    %c0_2 = arith.constant 0 : index
    %c0_3 = arith.constant 0 : index
    %3 = vector.load %arg2[%c0, %c0_1, %c0_2, %c0_3] : memref<1x16x16x4xf32, #tpu.memory_space<vmem>>, vector<1x16x16x4xf32>
    %4 = vector.shape_cast %3 : vector<1x16x16x4xf32> to vector<16x16x4xf32>
    %5 = vector.shape_cast %4 : vector<16x16x4xf32> to vector<256x4xf32>
    %c0_4 = arith.constant 0 : index
    %c0_5 = arith.constant 0 : index
    %6 = vector.load %arg3[%c0_4, %c0_5] : memref<4x128xbf16, #tpu.memory_space<vmem>>, vector<4x128xbf16>
    %7 = arith.extf %6 : vector<4x128xbf16> to vector<4x128xf32>
    %8 = vector.extract_strided_slice %5 {offsets = [0, 0], sizes = [256, 1], strides = [1, 1]} : vector<256x4xf32> to vector<256x1xf32>
    %9 = vector.extract_strided_slice %7 {offsets = [0, 0], sizes = [1, 128], strides = [1, 1]} : vector<4x128xf32> to vector<1x128xf32>
    %10 = vector.broadcast %8 : vector<256x1xf32> to vector<256x128xf32>
    %11 = vector.broadcast %9 : vector<1x128xf32> to vector<256x128xf32>
    %12 = arith.mulf %10, %11 : vector<256x128xf32>
    %13 = vector.extract_strided_slice %5 {offsets = [0, 1], sizes = [256, 1], strides = [1, 1]} : vector<256x4xf32> to vector<256x1xf32>
    %14 = vector.extract_strided_slice %7 {offsets = [1, 0], sizes = [1, 128], strides = [1, 1]} : vector<4x128xf32> to vector<1x128xf32>
    %15 = vector.broadcast %13 : vector<256x1xf32> to vector<256x128xf32>
    %16 = vector.broadcast %14 : vector<1x128xf32> to vector<256x128xf32>
    %17 = arith.mulf %15, %16 : vector<256x128xf32>
    %18 = arith.addf %12, %17 : vector<256x128xf32>
    %19 = vector.extract_strided_slice %5 {offsets = [0, 2], sizes = [256, 1], strides = [1, 1]} : vector<256x4xf32> to vector<256x1xf32>
    %20 = vector.extract_strided_slice %7 {offsets = [2, 0], sizes = [1, 128], strides = [1, 1]} : vector<4x128xf32> to vector<1x128xf32>
    %21 = vector.broadcast %19 : vector<256x1xf32> to vector<256x128xf32>
    %22 = vector.broadcast %20 : vector<1x128xf32> to vector<256x128xf32>
    %23 = arith.mulf %21, %22 : vector<256x128xf32>
    %24 = arith.addf %18, %23 : vector<256x128xf32>
    %25 = vector.extract_strided_slice %5 {offsets = [0, 3], sizes = [256, 1], strides = [1, 1]} : vector<256x4xf32> to vector<256x1xf32>
    %26 = vector.extract_strided_slice %7 {offsets = [3, 0], sizes = [1, 128], strides = [1, 1]} : vector<4x128xf32> to vector<1x128xf32>
    %27 = vector.broadcast %25 : vector<256x1xf32> to vector<256x128xf32>
    %28 = vector.broadcast %26 : vector<1x128xf32> to vector<256x128xf32>
    %29 = arith.mulf %27, %28 : vector<256x128xf32>
    %30 = arith.addf %24, %29 : vector<256x128xf32>
    %c0_6 = arith.constant 0 : index
    %c0_7 = arith.constant 0 : index
    %31 = vector.load %arg4[%c0_6, %c0_7] : memref<1x128xf32, #tpu.memory_space<vmem>>, vector<1x128xf32>
    %32 = vector.broadcast %31 : vector<1x128xf32> to vector<256x128xf32>
    %33 = arith.addf %30, %32 : vector<256x128xf32>
    %cst = arith.constant 0.000000e+00 : f32
    %cst_8 = arith.constant 6.000000e+00 : f32
    %34 = vector.broadcast %cst : f32 to vector<256x128xf32>
    %35 = arith.maximumf %34, %33 : vector<256x128xf32>
    %36 = vector.broadcast %cst_8 : f32 to vector<256x128xf32>
    %37 = arith.minimumf %36, %35 : vector<256x128xf32>
    %38 = vector.shape_cast %37 : vector<256x128xf32> to vector<16x16x128xf32>
    %c1 = arith.constant 1 : index
    %c8 = arith.constant 8 : index
    %c0_9 = arith.constant 0 : index
    %39 = vector.load %arg10[%c1, %c8, %c0_9] : memref<18x32x128xf32, #tpu.memory_space<vmem>>, vector<16x16x128xf32>
    tpu.vector_store %arg10[%c1, %c8, %c0_9], %38 {strides = array<i32>} : memref<18x32x128xf32, #tpu.memory_space<vmem>>, vector<16x16x128xf32>,
    %c0_10 = arith.constant 0 : index
    %c0_11 = arith.constant 0 : index
    %c0_12 = arith.constant 0 : index
    %40 = vector.load %arg5[%c0_10, %c0_11, %c0_12] : memref<3x3x128xf32, #tpu.memory_space<vmem>>, vector<3x3x128xf32>
    %c0_13 = arith.constant 0 : index
    %c0_14 = arith.constant 0 : index
    %c0_15 = arith.constant 0 : index
    %41 = vector.load %arg10[%c0_13, %c0_14, %c0_15] : memref<18x32x128xf32, #tpu.memory_space<vmem>>, vector<16x32x128xf32>
    %42 = vector.extract_strided_slice %41 {offsets = [0, 7, 0], sizes = [16, 16, 128], strides = [1, 1, 1]} : vector<16x32x128xf32> to vector<16x16x128xf32>
    %43 = vector.extract_strided_slice %40 {offsets = [0, 0, 0], sizes = [1, 1, 128], strides = [1, 1, 1]} : vector<3x3x128xf32> to vector<1x1x128xf32>
    %44 = vector.shape_cast %43 : vector<1x1x128xf32> to vector<128xf32>
    %45 = vector.shape_cast %44 : vector<128xf32> to vector<1x1x128xf32>
    %46 = vector.broadcast %45 : vector<1x1x128xf32> to vector<16x16x128xf32>
    %47 = arith.mulf %42, %46 : vector<16x16x128xf32>
    %48 = vector.extract_strided_slice %41 {offsets = [0, 8, 0], sizes = [16, 16, 128], strides = [1, 1, 1]} : vector<16x32x128xf32> to vector<16x16x128xf32>
    %49 = vector.extract_strided_slice %40 {offsets = [0, 1, 0], sizes = [1, 1, 128], strides = [1, 1, 1]} : vector<3x3x128xf32> to vector<1x1x128xf32>
    %50 = vector.shape_cast %49 : vector<1x1x128xf32> to vector<128xf32>
    %51 = vector.shape_cast %50 : vector<128xf32> to vector<1x1x128xf32>
    %52 = vector.broadcast %51 : vector<1x1x128xf32> to vector<16x16x128xf32>
    %53 = arith.mulf %48, %52 : vector<16x16x128xf32>
    %54 = arith.addf %47, %53 : vector<16x16x128xf32>
    %55 = vector.extract_strided_slice %41 {offsets = [0, 9, 0], sizes = [16, 16, 128], strides = [1, 1, 1]} : vector<16x32x128xf32> to vector<16x16x128xf32>
    %56 = vector.extract_strided_slice %40 {offsets = [0, 2, 0], sizes = [1, 1, 128], strides = [1, 1, 1]} : vector<3x3x128xf32> to vector<1x1x128xf32>
    %57 = vector.shape_cast %56 : vector<1x1x128xf32> to vector<128xf32>
    %58 = vector.shape_cast %57 : vector<128xf32> to vector<1x1x128xf32>
    %59 = vector.broadcast %58 : vector<1x1x128xf32> to vector<16x16x128xf32>
    %60 = arith.mulf %55, %59 : vector<16x16x128xf32>
    %61 = arith.addf %54, %60 : vector<16x16x128xf32>
    %c1_16 = arith.constant 1 : index
    %c0_17 = arith.constant 0 : index
    %c0_18 = arith.constant 0 : index
    %62 = vector.load %arg10[%c1_16, %c0_17, %c0_18] : memref<18x32x128xf32, #tpu.memory_space<vmem>>, vector<16x32x128xf32>
    %63 = vector.extract_strided_slice %62 {offsets = [0, 7, 0], sizes = [16, 16, 128], strides = [1, 1, 1]} : vector<16x32x128xf32> to vector<16x16x128xf32>
    %64 = vector.extract_strided_slice %40 {offsets = [1, 0, 0], sizes = [1, 1, 128], strides = [1, 1, 1]} : vector<3x3x128xf32> to vector<1x1x128xf32>
    %65 = vector.shape_cast %64 : vector<1x1x128xf32> to vector<128xf32>
    %66 = vector.shape_cast %65 : vector<128xf32> to vector<1x1x128xf32>
    %67 = vector.broadcast %66 : vector<1x1x128xf32> to vector<16x16x128xf32>
    %68 = arith.mulf %63, %67 : vector<16x16x128xf32>
    %69 = arith.addf %61, %68 : vector<16x16x128xf32>
    %70 = vector.extract_strided_slice %62 {offsets = [0, 8, 0], sizes = [16, 16, 128], strides = [1, 1, 1]} : vector<16x32x128xf32> to vector<16x16x128xf32>
    %71 = vector.extract_strided_slice %40 {offsets = [1, 1, 0], sizes = [1, 1, 128], strides = [1, 1, 1]} : vector<3x3x128xf32> to vector<1x1x128xf32>
    %72 = vector.shape_cast %71 : vector<1x1x128xf32> to vector<128xf32>
    %73 = vector.shape_cast %72 : vector<128xf32> to vector<1x1x128xf32>
    %74 = vector.broadcast %73 : vector<1x1x128xf32> to vector<16x16x128xf32>
    %75 = arith.mulf %70, %74 : vector<16x16x128xf32>
    %76 = arith.addf %69, %75 : vector<16x16x128xf32>
    %77 = vector.extract_strided_slice %62 {offsets = [0, 9, 0], sizes = [16, 16, 128], strides = [1, 1, 1]} : vector<16x32x128xf32> to vector<16x16x128xf32>
    %78 = vector.extract_strided_slice %40 {offsets = [1, 2, 0], sizes = [1, 1, 128], strides = [1, 1, 1]} : vector<3x3x128xf32> to vector<1x1x128xf32>
    %79 = vector.shape_cast %78 : vector<1x1x128xf32> to vector<128xf32>
    %80 = vector.shape_cast %79 : vector<128xf32> to vector<1x1x128xf32>
    %81 = vector.broadcast %80 : vector<1x1x128xf32> to vector<16x16x128xf32>
    %82 = arith.mulf %77, %81 : vector<16x16x128xf32>
    %83 = arith.addf %76, %82 : vector<16x16x128xf32>
    %c2 = arith.constant 2 : index
    %c0_19 = arith.constant 0 : index
    %c0_20 = arith.constant 0 : index
    %84 = vector.load %arg10[%c2, %c0_19, %c0_20] : memref<18x32x128xf32, #tpu.memory_space<vmem>>, vector<16x32x128xf32>
    %85 = vector.extract_strided_slice %84 {offsets = [0, 7, 0], sizes = [16, 16, 128], strides = [1, 1, 1]} : vector<16x32x128xf32> to vector<16x16x128xf32>
    %86 = vector.extract_strided_slice %40 {offsets = [2, 0, 0], sizes = [1, 1, 128], strides = [1, 1, 1]} : vector<3x3x128xf32> to vector<1x1x128xf32>
    %87 = vector.shape_cast %86 : vector<1x1x128xf32> to vector<128xf32>
    %88 = vector.shape_cast %87 : vector<128xf32> to vector<1x1x128xf32>
    %89 = vector.broadcast %88 : vector<1x1x128xf32> to vector<16x16x128xf32>
    %90 = arith.mulf %85, %89 : vector<16x16x128xf32>
    %91 = arith.addf %83, %90 : vector<16x16x128xf32>
    %92 = vector.extract_strided_slice %84 {offsets = [0, 8, 0], sizes = [16, 16, 128], strides = [1, 1, 1]} : vector<16x32x128xf32> to vector<16x16x128xf32>
    %93 = vector.extract_strided_slice %40 {offsets = [2, 1, 0], sizes = [1, 1, 128], strides = [1, 1, 1]} : vector<3x3x128xf32> to vector<1x1x128xf32>
    %94 = vector.shape_cast %93 : vector<1x1x128xf32> to vector<128xf32>
    %95 = vector.shape_cast %94 : vector<128xf32> to vector<1x1x128xf32>
    %96 = vector.broadcast %95 : vector<1x1x128xf32> to vector<16x16x128xf32>
    %97 = arith.mulf %92, %96 : vector<16x16x128xf32>
    %98 = arith.addf %91, %97 : vector<16x16x128xf32>
    %99 = vector.extract_strided_slice %84 {offsets = [0, 9, 0], sizes = [16, 16, 128], strides = [1, 1, 1]} : vector<16x32x128xf32> to vector<16x16x128xf32>
    %100 = vector.extract_strided_slice %40 {offsets = [2, 2, 0], sizes = [1, 1, 128], strides = [1, 1, 1]} : vector<3x3x128xf32> to vector<1x1x128xf32>
    %101 = vector.shape_cast %100 : vector<1x1x128xf32> to vector<128xf32>
    %102 = vector.shape_cast %101 : vector<128xf32> to vector<1x1x128xf32>
    %103 = vector.broadcast %102 : vector<1x1x128xf32> to vector<16x16x128xf32>
    %104 = arith.mulf %99, %103 : vector<16x16x128xf32>
    %105 = arith.addf %98, %104 : vector<16x16x128xf32>
    %c0_21 = arith.constant 0 : index
    %c0_22 = arith.constant 0 : index
    %106 = vector.load %arg6[%c0_21, %c0_22] : memref<1x128xf32, #tpu.memory_space<vmem>>, vector<1x128xf32>
    %107 = vector.shape_cast %106 : vector<1x128xf32> to vector<128xf32>
    %108 = vector.shape_cast %107 : vector<128xf32> to vector<1x1x128xf32>
    %109 = vector.broadcast %108 : vector<1x1x128xf32> to vector<16x16x128xf32>
    %110 = arith.addf %105, %109 : vector<16x16x128xf32>
    %cst_23 = arith.constant 0.000000e+00 : f32
    %cst_24 = arith.constant 6.000000e+00 : f32
    %111 = vector.broadcast %cst_23 : f32 to vector<16x16x128xf32>
    %112 = arith.maximumf %111, %110 : vector<16x16x128xf32>
    %113 = vector.broadcast %cst_24 : f32 to vector<16x16x128xf32>
    %114 = arith.minimumf %113, %112 : vector<16x16x128xf32>
    %115 = vector.shape_cast %114 : vector<16x16x128xf32> to vector<256x128xf32>
    %116 = arith.truncf %115 : vector<256x128xf32> to vector<256x128xbf16>
    %c0_25 = arith.constant 0 : index
    %c0_26 = arith.constant 0 : index
    %117 = vector.load %arg7[%c0_25, %c0_26] : memref<128x128xbf16, #tpu.memory_space<vmem>>, vector<128x128xbf16>
    %cst_27 = arith.constant dense<0.000000e+00> : vector<256x128xf32>
    %118 = tpu.matmul %116, %117, %cst_27 {dimension_numbers = #tpu.dot_dimension_numbers<[1], [0], [0], [1], [0, 0, 1, 1], [], []>} : vector<256x128xbf16>, vector<128x128xbf16>, vector<256x128xf32> -> vector<256x128xf32>
    %c0_i32_28 = arith.constant 0 : i32
    %119 = arith.cmpi eq, %arg1, %c0_i32_28 : i32
    %120 = arith.extui %119 : i1 to i32
    %c0_i32_29 = arith.constant 0 : i32
    %121 = arith.cmpi ne, %120, %c0_i32_29 : i32
    scf.if %121 {
      %c0_34 = arith.constant 0 : index
      %c0_35 = arith.constant 0 : index
      %128 = vector.load %arg11[%c0_34, %c0_35] : memref<256x128xf32, #tpu.memory_space<vmem>>, vector<256x128xf32>
      tpu.vector_store %arg11[%c0_34, %c0_35], %118 {strides = array<i32>} : memref<256x128xf32, #tpu.memory_space<vmem>>, vector<256x128xf32>,
    } else {
    }
    %c0_i32_30 = arith.constant 0 : i32
    %122 = arith.cmpi sgt, %arg1, %c0_i32_30 : i32
    %123 = arith.extui %122 : i1 to i32
    %c0_i32_31 = arith.constant 0 : i32
    %124 = arith.cmpi ne, %123, %c0_i32_31 : i32
    scf.if %124 {
      %c0_34 = arith.constant 0 : index
      %c0_35 = arith.constant 0 : index
      %128 = vector.load %arg11[%c0_34, %c0_35] : memref<256x128xf32, #tpu.memory_space<vmem>>, vector<256x128xf32>
      %129 = arith.addf %128, %118 : vector<256x128xf32>
      %c0_36 = arith.constant 0 : index
      %c0_37 = arith.constant 0 : index
      %130 = vector.load %arg11[%c0_36, %c0_37] : memref<256x128xf32, #tpu.memory_space<vmem>>, vector<256x128xf32>
      tpu.vector_store %arg11[%c0_36, %c0_37], %129 {strides = array<i32>} : memref<256x128xf32, #tpu.memory_space<vmem>>, vector<256x128xf32>,
    } else {
    }
    %c0_i32_32 = arith.constant 0 : i32
    %125 = arith.cmpi eq, %arg1, %c0_i32_32 : i32
    %126 = arith.extui %125 : i1 to i32
    %c0_i32_33 = arith.constant 0 : i32
    %127 = arith.cmpi ne, %126, %c0_i32_33 : i32
    scf.if %127 {
      %c0_34 = arith.constant 0 : index
      %c0_35 = arith.constant 0 : index
      %128 = vector.load %arg11[%c0_34, %c0_35] : memref<256x128xf32, #tpu.memory_space<vmem>>, vector<256x128xf32>
      %129 = vector.extract_strided_slice %128 {offsets = [0, 0], sizes = [256, 4], strides = [1, 1]} : vector<256x128xf32> to vector<256x4xf32>
      %c0_36 = arith.constant 0 : index
      %c0_37 = arith.constant 0 : index
      %130 = vector.load %arg8[%c0_36, %c0_37] : memref<1x4xf32, #tpu.memory_space<vmem>>, vector<1x4xf32>
      %131 = vector.broadcast %130 : vector<1x4xf32> to vector<256x4xf32>
      %132 = arith.addf %129, %131 : vector<256x4xf32>
      %133 = vector.shape_cast %132 : vector<256x4xf32> to vector<16x16x4xf32>
      %134 = arith.addf %133, %4 : vector<16x16x4xf32>
      %c0_38 = arith.constant 0 : index
      %c0_39 = arith.constant 0 : index
      %c0_40 = arith.constant 0 : index
      %c0_41 = arith.constant 0 : index
      %135 = vector.load %arg9[%c0_38, %c0_39, %c0_40, %c0_41] : memref<1x16x16x4xf32, #tpu.memory_space<vmem>>, vector<1x16x16x4xf32>
      %136 = vector.shape_cast %135 : vector<1x16x16x4xf32> to vector<16x16x4xf32>
      %137 = vector.shape_cast %134 : vector<16x16x4xf32> to vector<1x16x16x4xf32>
      tpu.vector_store %arg9[%c0_38, %c0_39, %c0_40, %c0_41], %137 {strides = array<i32>} : memref<1x16x16x4xf32, #tpu.memory_space<vmem>>, vector<1x16x16x4xf32>,
    } else {
    }
    return
  }
  func.func @transform_0(%arg0: i32, %arg1: i32) -> (i32, i32, i32, i32) {
    %c0_i32 = arith.constant 0 : i32
    %c0_i32_0 = arith.constant 0 : i32
    %c0_i32_1 = arith.constant 0 : i32
    %c0_i32_2 = arith.constant 0 : i32
    return %arg0, %c0_i32, %c0_i32_0, %c0_i32_1 : i32, i32, i32, i32
  }
  func.func @transform_1(%arg0: i32, %arg1: i32) -> (i32, i32) {
    %c0_i32 = arith.constant 0 : i32
    %c0_i32_0 = arith.constant 0 : i32
    return %c0_i32, %arg1 : i32, i32
  }
  func.func @transform_2(%arg0: i32, %arg1: i32) -> (i32, i32) {
    %c0_i32 = arith.constant 0 : i32
    %c0_i32_0 = arith.constant 0 : i32
    return %c0_i32, %arg1 : i32, i32
  }
  func.func @transform_3(%arg0: i32, %arg1: i32) -> (i32, i32, i32) {
    %c0_i32 = arith.constant 0 : i32
    %c0_i32_0 = arith.constant 0 : i32
    %c0_i32_1 = arith.constant 0 : i32
    return %c0_i32, %c0_i32_0, %arg1 : i32, i32, i32
  }
  func.func @transform_4(%arg0: i32, %arg1: i32) -> (i32, i32) {
    %c0_i32 = arith.constant 0 : i32
    %c0_i32_0 = arith.constant 0 : i32
    return %c0_i32, %arg1 : i32, i32
  }
  func.func @transform_5(%arg0: i32, %arg1: i32) -> (i32, i32) {
    %c0_i32 = arith.constant 0 : i32
    %c0_i32_0 = arith.constant 0 : i32
    return %arg1, %c0_i32 : i32, i32
  }
  func.func @transform_6(%arg0: i32, %arg1: i32) -> (i32, i32) {
    %c0_i32 = arith.constant 0 : i32
    %c0_i32_0 = arith.constant 0 : i32
    %c0_i32_1 = arith.constant 0 : i32
    return %c0_i32, %c0_i32_0 : i32, i32
  }
  func.func @transform_7(%arg0: i32, %arg1: i32) -> (i32, i32, i32, i32) {
    %c0_i32 = arith.constant 0 : i32
    %c0_i32_0 = arith.constant 0 : i32
    %c0_i32_1 = arith.constant 0 : i32
    %c0_i32_2 = arith.constant 0 : i32
    return %arg0, %c0_i32, %c0_i32_0, %c0_i32_1 : i32, i32, i32, i32
  }
}

</mosaic_0001>

<bundles_post_ra>
// kernel: tpu_custom_call.1
= control target key start
LH: loop header
LB: loop body
LE: loop exit
PB: predicated region body
PF: predicated region fallthrough
CT: control target
= control target key end

     0   :  { %s4531_s24 = smov 0   ;;  %s4533_s25 = smov 0   ;;  %s6824_s0 = inlined_call_operand.vmem [shape: f32[2,16,16,4], index: 0, kind: input, shape index: {}]   ;;  %s6825_s1 = inlined_call_operand.vmem [shape: bf16[4,128], index: 1, kind: input, shape index: {}]   ;;  %s6826_s2 = inlined_call_operand.vmem [shape: f32[1,128], index: 2, kind: input, shape index: {}]   ;;  %s6827_s3 = inlined_call_operand.vmem [shape: f32[3,3,128], index: 3, kind: input, shape index: {}]   ;;  %s6828_s4 = inlined_call_operand.vmem [shape: f32[1,128], index: 4, kind: input, shape index: {}]   ;;  %s6829_s5 = inlined_call_operand.vmem [shape: bf16[128,128], index: 5, kind: input, shape index: {}]   ;;  %s6830_s6 = inlined_call_operand.vmem [shape: f32[1,4], index: 6, kind: input, shape index: {}]   ;;  %s6831_s7 = inlined_call_operand.vmem [shape: f32[2,16,16,4], index: 7, kind: output, shape index: {}]  }
   0x1   :  { %s4535_s26 = smov 0  }
   0x2 LB: > { %s29_s27 = sadd.s32 1, %s4481_s25  ;;  %p4262_p0 = scmp.ge.s32.totalorder %s4485_s26, 1  ;;  %s4485_s26 = sphi %s4535_s26, %s17_s26   ;;  %s4481_s25 = sphi %s4533_s25, %s7149_s25   ;;  %s4477_s24 = sphi %s4531_s24, %s7148_s24  }
   0x3   : > { %p31_p1 = scmp.ge.s32.totalorder %s29_s27, 2  ;;  %p294_p2 = scmp.lt.s32.totalorder %s4485_s26, 3 }
   0x5   : > { %s7151_s27 = smov (%p31_p1, %s29_s27), 0  ;;  %p295_p3 = pnand %p4262_p0, %p294_p2 }
   0x7   : > { %298 = sbr.rel (%p295_p3) target bundleno = 873 (0x369), region = 48 }
   0xc   : > { %p345_p4 = scmp.lt.s32.totalorder %s4477_s24, 1  ;;  %v4487_v0 = vmov 0   ;;  %v6832_v33 = vmov 1   ;;  %v6834_v34 = vmov 2   ;;  %v6836_v35 = vmov 3  }
   0xd   : > { %4399 = vset.pattern.permute.xlu1 %v4487_v0  ;;  %4398 = vset.pattern.permute.xlu0 %v4487_v0  ;;  %v619_v48 = vlaneseq  ;;  %v457_v52 = vld [vmem:[%s6825_s1] sm:$0x3]  ;;  %vm1811_vm0 = vcmask 1045504   ;;  %vm1566_vm1 = vcmask 1046528   ;;  %vm3492_vm2 = vcmask 1040384  }
   0xe   : > { %s7153_s24 = smov (!%p345_p4, %s4477_s24), 1  ;;  %v4775_v55 = vunpack.c.l.bf16 %v457_v52  ;;  %vm4087_vm3 = vcmask 31744  }
   0xf   : > { %s4280_s28 = sshll.u32 %s7153_s24, 8  ;;  %v4764_v51 = vshrl.u32 %v619_v48, 7 }
  0x10   : > { %s4557_s8 = scalar_lea.vmem %s6824_s0, %s4280_s28  ;;  %s6675_s13 = scalar_lea.vmem %s6831_s7, %s4280_s28 }
  0x11   : > { %v4560_v1 = vld [vmem:[%s4557_s8 + $0x10] sm:$0xff]  ;;  %v4563_v2 = vld [vmem:[%s4557_s8] sm:$0xff]  ;;  %v4568_v3 = vld [vmem:[%s4557_s8 + $0x18] sm:$0xff]  ;;  %v4778_v56 = vsub.s32 0, %v4764_v51 }
  0x12   : > { %471 = vperm.xlu1 %4399, %v4560_v1   ;;  %461 = vperm.xlu0 %4398, %v4563_v2   ;;  %v4571_v4 = vld [vmem:[%s4557_s8 + $0x8] sm:$0xff]  ;;  %v4579_v6 = vld [vmem:[%s4557_s8 + $0x20] sm:$0xff]  ;;  %v4584_v7 = vld [vmem:[%s4557_s8 + $0x38] sm:$0xff] }
  0x13   : > { %v4576_v5 = vld [vmem:[%s4557_s8 + $0x28] sm:$0xff]  ;;  %v4587_v8 = vld [vmem:[%s4557_s8 + $0x30] sm:$0xff]  ;;  %v4595_v10 = vld [vmem:[%s4557_s8 + $0x40] sm:$0xff]  ;;  %v4788_v59 = vrot.slane %v4775_v55, %v4778_v56 }
  0x14   : > { %v4592_v9 = vld [vmem:[%s4557_s8 + $0x48] sm:$0xff]  ;;  %v4600_v11 = vld [vmem:[%s4557_s8 + $0x58] sm:$0xff]  ;;  %v4603_v12 = vld [vmem:[%s4557_s8 + $0x50] sm:$0xff] }
  0x15   : > { %v4608_v13 = vld [vmem:[%s4557_s8 + $0x68] sm:$0xff]  ;;  %v4611_v14 = vld [vmem:[%s4557_s8 + $0x60] sm:$0xff]  ;;  %v4616_v15 = vld [vmem:[%s4557_s8 + $0x78] sm:$0xff] }
  0x16   : > { %476 = vperm.xlu1 %4399, %v4568_v3   ;;  %466 = vperm.xlu0 %4398, %v4571_v4   ;;  %v4619_v16 = vld [vmem:[%s4557_s8 + $0x70] sm:$0xff]  ;;  %v4624_v17 = vld [vmem:[%s4557_s8 + $0x88] sm:$0xff]  ;;  %v4627_v18 = vld [vmem:[%s4557_s8 + $0x80] sm:$0xff] }
  0x17   : > { %v4632_v19 = vld [vmem:[%s4557_s8 + $0x98] sm:$0xff]  ;;  %v4635_v20 = vld [vmem:[%s4557_s8 + $0x90] sm:$0xff]  ;;  %v4640_v21 = vld [vmem:[%s4557_s8 + $0xa8] sm:$0xff] }
  0x18   : > { %v4643_v22 = vld [vmem:[%s4557_s8 + $0xa0] sm:$0xff]  ;;  %v4648_v23 = vld [vmem:[%s4557_s8 + $0xb8] sm:$0xff]  ;;  %v4651_v24 = vld [vmem:[%s4557_s8 + $0xb0] sm:$0xff] }
  0x19   : > { %v4656_v25 = vld [vmem:[%s4557_s8 + $0xc8] sm:$0xff]  ;;  %v4659_v26 = vld [vmem:[%s4557_s8 + $0xc0] sm:$0xff]  ;;  %v4664_v27 = vld [vmem:[%s4557_s8 + $0xd8] sm:$0xff] }
  0x1a   : > { %486 = vperm.xlu1 %4399, %v4576_v5   ;;  %481 = vperm.xlu0 %4398, %v4579_v6   ;;  %6896 = vst [vmem:[#allocation4_spill] sm:$0xff] %v4664_v27  ;;  %v4667_v28 = vld [vmem:[%s4557_s8 + $0xd0] sm:$0xff]  ;;  %v4672_v29 = vld [vmem:[%s4557_s8 + $0xe8] sm:$0xff]  ;;  %v4675_v30 = vld [vmem:[%s4557_s8 + $0xe0] sm:$0xff] }
  0x1b   : > { %6897 = vst [vmem:[#allocation5_spill] sm:$0xff] %v4672_v29  ;;  %v4680_v31 = vld [vmem:[%s4557_s8 + $0xf8] sm:$0xff]  ;;  %v4683_v32 = vld [vmem:[%s4557_s8 + $0xf0] sm:$0xff] }
  0x1c   : > { %6898 = vst [vmem:[#allocation6_spill] sm:$0xff] %v4680_v31  ;;  %6899 = vst [vmem:[#allocation7_spill] sm:$0xff] %v4683_v32 }
  0x1e   : > { %496 = vperm.xlu1 %4399, %v4584_v7   ;;  %491 = vperm.xlu0 %4398, %v4587_v8  }
  0x22   : > { %506 = vperm.xlu1 %4399, %v4592_v9   ;;  %501 = vperm.xlu0 %4398, %v4595_v10  }
  0x26   : > { %516 = vperm.xlu1 %4399, %v4600_v11   ;;  %511 = vperm.xlu0 %4398, %v4603_v12  }
  0x2a   : > { %526 = vperm.xlu1 %4399, %v4608_v13   ;;  %521 = vperm.xlu0 %4398, %v4611_v14  }
  0x2e   : > { %536 = vperm.xlu1 %4399, %v4616_v15   ;;  %531 = vperm.xlu0 %4398, %v4619_v16  }
  0x32   : > { %546 = vperm.xlu1 %4399, %v4624_v17   ;;  %541 = vperm.xlu0 %4398, %v4627_v18  }
  0x36   : > { %556 = vperm.xlu1 %4399, %v4632_v19   ;;  %551 = vperm.xlu0 %4398, %v4635_v20  }
  0x3a   : > { %566 = vperm.xlu1 %4399, %v4640_v21   ;;  %561 = vperm.xlu0 %4398, %v4643_v22  }
  0x3e   : > { %576 = vperm.xlu1 %4399, %v4648_v23   ;;  %571 = vperm.xlu0 %4398, %v4651_v24  }
  0x42   : > { %586 = vperm.xlu1 %4399, %v4656_v25   ;;  %581 = vperm.xlu0 %4398, %v4659_v26  }
  0x46   : > { %596 = vperm.xlu1 %4399, %v4664_v27   ;;  %591 = vperm.xlu0 %4398, %v4667_v28  }
  0x4a   : > { %606 = vperm.xlu1 %4399, %v4672_v29   ;;  %601 = vperm.xlu0 %4398, %v4675_v30  }
  0x4e   : > { %616 = vperm.xlu1 %4399, %v4680_v31   ;;  %611 = vperm.xlu0 %4398, %v4683_v32  }
  0x52   : > { %4400 = vset.pattern.permute.xlu1 %v6832_v33  ;;  %4402 = vset.pattern.permute.xlu0 %v6834_v34 }
  0x53   : > { %660 = vperm.xlu1 %4400, %v4571_v4   ;;  %912 = vperm.xlu0 %4402, %v4616_v15  }
  0x57   : > { %664 = vperm.xlu1 %4400, %v4560_v1   ;;  %916 = vperm.xlu0 %4402, %v4627_v18  }
  0x5b   : > { %672 = vperm.xlu1 %4400, %v4579_v6   ;;  %860 = vperm.xlu0 %4402, %v4560_v1  }
  0x5f   : > { %680 = vperm.xlu1 %4400, %v4587_v8   ;;  %928 = vperm.xlu0 %4402, %v4632_v19  }
  0x63   : > { %688 = vperm.xlu1 %4400, %v4595_v10   ;;  %872 = vperm.xlu0 %4402, %v4576_v5  }
  0x67   : > { %696 = vperm.xlu1 %4400, %v4603_v12   ;;  %936 = vperm.xlu0 %4402, %v4640_v21  }
  0x6b   : > { %712 = vperm.xlu1 %4400, %v4619_v16   ;;  %880 = vperm.xlu0 %4402, %v4584_v7  }
  0x6f   : > { %720 = vperm.xlu1 %4400, %v4627_v18   ;;  %884 = vperm.xlu0 %4402, %v4595_v10  }
  0x73   : > { %4401 = vset.pattern.permute.xlu1 %v6834_v34  ;;  %948 = vperm.xlu0 %4402, %v4659_v26  }
  0x74   : > { %908 = vperm.xlu1 %4401, %v4619_v16  }
  0x77   : > { %892 = vperm.xlu0 %4402, %v4603_v12  }
  0x78   : > { %852 = vperm.xlu1 %4401, %v4563_v2  }
  0x7b   : > { %960 = vperm.xlu0 %4402, %v4664_v27  }
  0x7c   : > { %856 = vperm.xlu1 %4401, %v4571_v4  }
  0x7f   : > { %904 = vperm.xlu0 %4402, %v4608_v13  }
  0x80   : > { %920 = vperm.xlu1 %4401, %v4624_v17  }
  0x83   : > { %968 = vperm.xlu0 %4402, %v4672_v29  }
  0x84   : > { %4403 = vset.pattern.permute.xlu1 %v6836_v35 }
  0x85   : > { %1108 = vperm.xlu1 %4403, %v4616_v15  }
  0x87   : > { %4412 = vset.pattern.permute.xlu0 %v6836_v35 }
  0x88   : > { %1104 = vperm.xlu0 %4412, %v4619_v16  }
  0x89   : > { %1048 = vperm.xlu1 %4403, %v4563_v2  }
  0x8c   : > { %1052 = vperm.xlu0 %4412, %v4571_v4  }
  0x8d   : > { %v4721_v36 = vpop.permute.xlu1 %471  ;;  %1112 = vperm.xlu1 %4403, %v4627_v18   ;;  %v4724_v37 = vpop.permute.xlu0 %461 }
  0x90   : > { %1116 = vperm.xlu0 %4412, %v4624_v17  }
  0x91   : > { %v4727_v38 = vpop.permute.xlu1 %476  ;;  %4404 = vset.pattern.permute.xlu1 %v6832_v33  ;;  %v4730_v39 = vpop.permute.xlu0 %466 }
  0x92   : > { %728 = vperm.xlu1 %4404, %v4635_v20  }
  0x94   : > { %1060 = vperm.xlu0 %4412, %v4568_v3  }
  0x95   : > { %v4734_v40 = vpop.permute.xlu1 %486  ;;  %v4736_v41 = vpop.permute.xlu0 %481 }
  0x96   : > { %736 = vperm.xlu1 %4404, %v4643_v22  }
  0x98   : > { %1064 = vperm.xlu0 %4412, %v4579_v6  }
  0x99   : > { %v4740_v42 = vpop.permute.xlu1 %496  ;;  %v4742_v43 = vpop.permute.xlu0 %491 }
  0x9a   : > { %740 = vperm.xlu1 %4404, %v4640_v21  }
  0x9c   : > { %1128 = vperm.xlu0 %4412, %v4643_v22  }
  0x9d   : > { %v4746_v44 = vpop.permute.xlu1 %506  ;;  %v4748_v45 = vpop.permute.xlu0 %501 }
  0x9e   : > { %4405 = vset.pattern.permute.xlu1 %v6834_v34 }
  0x9f   : > { %864 = vperm.xlu1 %4405, %v4568_v3  }
  0xa0   : > { %1072 = vperm.xlu0 %4412, %v4587_v8  }
  0xa1   : > { %v4753_v46 = vpop.permute.xlu1 %516  ;;  %v4755_v47 = vpop.permute.xlu0 %511 }
  0xa3   : > { %924 = vperm.xlu1 %4405, %v4635_v20  }
  0xa4   : > { %1140 = vperm.xlu0 %4412, %v4648_v23  }
  0xa5   : > { %v4759_v49 = vpop.permute.xlu1 %526  ;;  %v4761_v50 = vpop.permute.xlu0 %521 }
  0xa7   : > { %868 = vperm.xlu1 %4405, %v4579_v6  }
  0xa8   : > { %1084 = vperm.xlu0 %4412, %v4592_v9  }
  0xa9   : > { %v4770_v53 = vpop.permute.xlu1 %536  ;;  %v4772_v54 = vpop.permute.xlu0 %531 }
  0xab   : > { %932 = vperm.xlu1 %4405, %v4643_v22  }
  0xac   : > { %1148 = vperm.xlu0 %4412, %v4656_v25  }
  0xad   : > { %v4781_v57 = vpop.permute.xlu1 %546  ;;  %v4783_v58 = vpop.permute.xlu0 %541 }
  0xaf   : > { %4406 = vset.pattern.permute.xlu1 %v6836_v35 }
  0xb0   : > { %1056 = vperm.xlu1 %4406, %v4560_v1   ;;  %1092 = vperm.xlu0 %4412, %v4600_v11  }
  0xb1   : > { %v4792_v60 = vpop.permute.xlu1 %556  ;;  %v552_v61 = vpop.permute.xlu0 %551 }
  0xb2   : > { %v4795_v62 = vmul.f32 %v4788_v59, %v552_v61 }
  0xb4   : > { %1120 = vperm.xlu1 %4406, %v4635_v20   ;;  %1096 = vperm.xlu0 %4412, %v4611_v14  }
  0xb5   : > { %v4799_v63 = vpop.permute.xlu1 %566  ;;  %v562_v0 = vpop.permute.xlu0 %561 }
  0xb6   : > { %v4802_v4 = vmul.f32 %v4788_v59, %v562_v0 }
  0xb8   : > { %1124 = vperm.xlu1 %4406, %v4632_v19   ;;  %1160 = vperm.xlu0 %4412, %v4675_v30  }
  0xb9   : > { %v4806_v1 = vpop.permute.xlu1 %576  ;;  %v572_v6 = vpop.permute.xlu0 %571 }
  0xba   : > { %v4809_v16 = vmul.f32 %v4788_v59, %v572_v6 }
  0xbc   : > { %6900 = vst [vmem:[#allocation8_spill] sm:$0xff] %v4809_v16  ;;  %1068 = vperm.xlu1 %4406, %v4576_v5   ;;  %4414 = vset.pattern.permute.xlu0 %v6832_v33 }
  0xbd   : > { %v4813_v18 = vpop.permute.xlu1 %586  ;;  %656 = vperm.xlu0 %4414, %v4563_v2   ;;  %v582_v20 = vpop.permute.xlu0 %581 }
  0xbe   : > { %v4817_v22 = vmul.f32 %v4788_v59, %v582_v20 }
  0xc0   : > { %6901 = vst [vmem:[#allocation9_spill] sm:$0xff] %v4817_v22  ;;  %1132 = vperm.xlu1 %4406, %v4640_v21  }
  0xc1   : > { %v4820_v48 = vpop.permute.xlu1 %596  ;;  %668 = vperm.xlu0 %4414, %v4568_v3   ;;  %v592_v52 = vpop.permute.xlu0 %591  ;;  %v4420_v3 = vld [vmem:[%s6829_s5 + $0x38] sm:$0xff]  }
  0xc2   : > { %6902 = vst [vmem:[#allocation10_spill] sm:$0xff] %v4820_v48  ;;  %v4824_v61 = vmul.f32 %v4788_v59, %v592_v52  ;;  %4306 = vmatprep.subr.bf16.mxu0 %v4420_v3  ;;  %4354 = vmatprep.subr.bf16.mxu1 %v4420_v3 }
  0xc3   : > { %4307 = vmatpush3.bf16.msra.mxu0 %v4420_v3  ;;  %4362 = vmatpush3.bf16.msra.mxu1 %v4420_v3 }
  0xc4   : > { %6903 = vst [vmem:[#allocation11_spill] sm:$0xff] %v4824_v61  ;;  %4407 = vset.pattern.permute.xlu1 %v6832_v33  ;;  %v4424_v61 = vld [vmem:[%s6829_s5 + $0x18] sm:$0xff]  }
  0xc5   : > { %v4827_v0 = vpop.permute.xlu1 %606  ;;  %748 = vperm.xlu1 %4407, %v4648_v23   ;;  %676 = vperm.xlu0 %4414, %v4576_v5   ;;  %v602_v2 = vpop.permute.xlu0 %601  ;;  %v4421_v5 = vld [vmem:[%s6829_s5 + $0x30] sm:$0xff]  }
  0xc6   : > { %6904 = vst [vmem:[#allocation12_spill] sm:$0xff] %v4827_v0  ;;  %v4832_v6 = vmul.f32 %v4788_v59, %v602_v2  ;;  %4308 = vmatprep.subr.bf16.mxu0 %v4421_v5  ;;  %4355 = vmatprep.subr.bf16.mxu1 %v4421_v5 }
  0xc7   : > { %4309 = vmatpush3.bf16.msra.mxu0 %v4421_v5  ;;  %4363 = vmatpush3.bf16.msra.mxu1 %v4421_v5 }
  0xc8   : > { %6905 = vst [vmem:[#allocation13_spill] sm:$0xff] %v4832_v6 }
  0xc9   : > { %v4837_v21 = vpop.permute.xlu1 %616  ;;  %752 = vperm.xlu1 %4407, %v4659_v26   ;;  %684 = vperm.xlu0 %4414, %v4584_v7   ;;  %v612_v20 = vpop.permute.xlu0 %611 }
  0xca   : > { %6906 = vst [vmem:[#allocation14_spill] sm:$0xff] %v4837_v21  ;;  %v4842_v52 = vmul.f32 %v4788_v59, %v612_v20  ;;  %v4422_v20 = vld [vmem:[%s6829_s5 + $0x28] sm:$0xff]  }
  0xcb   : > { %4310 = vmatprep.subr.bf16.mxu0 %v4422_v20  ;;  %4356 = vmatprep.subr.bf16.mxu1 %v4422_v20 }
  0xcc   : > { %6907 = vst [vmem:[#allocation15_spill] sm:$0xff] %v4842_v52  ;;  %4311 = vmatpush3.bf16.msra.mxu0 %v4422_v20  ;;  %4364 = vmatpush3.bf16.msra.mxu1 %v4422_v20  ;;  %v4890_v52 = vsub.s32 1, %v4764_v51 }
  0xcd   : > { %4408 = vset.pattern.permute.xlu1 %v6834_v34  ;;  %692 = vperm.xlu0 %4414, %v4592_v9  }
  0xce   : > { %v4849_v2 = vpop.permute.xlu1 %660  ;;  %876 = vperm.xlu1 %4408, %v4587_v8   ;;  %v4852_v33 = vpop.permute.xlu0 %912  ;;  %v4423_v8 = vld [vmem:[%s6829_s5 + $0x20] sm:$0xff]   ;;  %v4899_v16 = vrot.slane %v4775_v55, %v4890_v52 }
  0xcf   : > { %6908 = vst [vmem:[#allocation16_spill] sm:$0xff] %v4852_v33  ;;  %4312 = vmatprep.subr.bf16.mxu0 %v4423_v8  ;;  %4357 = vmatprep.subr.bf16.mxu1 %v4423_v8 }
  0xd0   : > { %4313 = vmatpush3.bf16.msra.mxu0 %v4423_v8  ;;  %4365 = vmatpush3.bf16.msra.mxu1 %v4423_v8  ;;  %6913 = vst [vmem:[#allocation20_spill] sm:$0xff] %v4899_v16 }
  0xd1   : > { %700 = vperm.xlu0 %4414, %v4600_v11   ;;  %4314 = vmatprep.subr.bf16.mxu0 %v4424_v61 }
  0xd2   : > { %v4858_v3 = vpop.permute.xlu1 %664  ;;  %940 = vperm.xlu1 %4408, %v4651_v24   ;;  %v917_v34 = vpop.permute.xlu0 %916  ;;  %4358 = vmatprep.subr.bf16.mxu1 %v4424_v61 }
  0xd4   : > { %4315 = vmatpush3.bf16.msra.mxu0 %v4424_v61  ;;  %4366 = vmatpush3.bf16.msra.mxu1 %v4424_v61 }
  0xd5   : > { %716 = vperm.xlu0 %4414, %v4616_v15  }
  0xd6   : > { %v4865_v5 = vpop.permute.xlu1 %672  ;;  %944 = vperm.xlu1 %4408, %v4648_v23   ;;  %v4868_v35 = vpop.permute.xlu0 %860  ;;  %v4425_v23 = vld [vmem:[%s6829_s5 + $0x10] sm:$0xff]  }
  0xd7   : > { %4316 = vmatprep.subr.bf16.mxu0 %v4425_v23  ;;  %4359 = vmatprep.subr.bf16.mxu1 %v4425_v23 }
  0xd8   : > { %4317 = vmatpush3.bf16.msra.mxu0 %v4425_v23  ;;  %4367 = vmatpush3.bf16.msra.mxu1 %v4425_v23  ;;  %v4902_v23 = vsub.s32 2, %v4764_v51 }
  0xd9   : > { %724 = vperm.xlu0 %4414, %v4624_v17  }
  0xda   : > { %v4874_v20 = vpop.permute.xlu1 %680  ;;  %888 = vperm.xlu1 %4408, %v4592_v9   ;;  %v4877_v15 = vpop.permute.xlu0 %928  ;;  %v4426_v9 = vld [vmem:[%s6829_s5 + $0x8] sm:$0xff]  }
  0xdb   : > { %6909 = vst [vmem:[#allocation17_spill] sm:$0xff] %v4874_v20  ;;  %6910 = vst [vmem:[#allocation18_spill] sm:$0xff] %v4877_v15  ;;  %4318 = vmatprep.subr.bf16.mxu0 %v4426_v9  ;;  %4360 = vmatprep.subr.bf16.mxu1 %v4426_v9  ;;  %v4427_v15 = vld [vmem:[%s6829_s5] sm:$0xff]  }
  0xdc   : > { %4319 = vmatpush3.bf16.msra.mxu0 %v4426_v9  ;;  %4368 = vmatpush3.bf16.msra.mxu1 %v4426_v9  ;;  %v4916_v9 = vrot.slane %v4775_v55, %v4902_v23 }
  0xdd   : > { %732 = vperm.xlu0 %4414, %v4632_v19   ;;  %v6912_v19 = vmov 3   ;;  %4320 = vmatprep.subr.bf16.mxu0 %v4427_v15 }
  0xde   : > { %v689_v8 = vpop.permute.xlu1 %688  ;;  %952 = vperm.xlu1 %4408, %v4656_v25   ;;  %v4884_v17 = vpop.permute.xlu0 %872  ;;  %4361 = vmatprep.subr.bf16.mxu1 %v4427_v15 }
  0xdf   : > { %6911 = vst [vmem:[#allocation19_spill] sm:$0xff] %v4884_v17  ;;  %v795_v33 = vmul.f32 %v4899_v16, %v689_v8 }
  0xe0   : > { %4321 = vmatpush3.bf16.msra.mxu0 %v4427_v15  ;;  %4369 = vmatpush3.bf16.msra.mxu1 %v4427_v15 }
  0xe1   : > { %744 = vperm.xlu0 %4414, %v4651_v24  }
  0xe2   : > { %v697_v61 = vpop.permute.xlu1 %696  ;;  %4409 = vset.pattern.permute.xlu1 %v6912_v19  ;;  %v4894_v6 = vpop.permute.xlu0 %936 }
  0xe3   : > { %1076 = vperm.xlu1 %4409, %v4584_v7   ;;  %v631_v7 = vmul.f32 %v4788_v59, %v4748_v45 }
  0xe5   : > { %756 = vperm.xlu0 %4414, %v4656_v25   ;;  %v639_v25 = vmul.f32 %v4788_v59, %v4783_v58  ;;  %v827_v8 = vadd.f32 %v795_v33, %v631_v7  ;;  %v637_v58 = vmul.f32 %v4788_v59, %v4772_v54  ;;  %v797_v33 = vmul.f32 %v4899_v16, %v697_v61 }
  0xe6   : > { %v713_v22 = vpop.permute.xlu1 %712  ;;  %v4905_v17 = vpop.permute.xlu0 %880 }
  0xe7   : > { %6914 = vst [vmem:[#allocation21_spill] sm:$0xff] %v4905_v17  ;;  %1136 = vperm.xlu1 %4409, %v4651_v24   ;;  %v999_v24 = vmul.f32 %v4916_v9, %v917_v34  ;;  %v801_v0 = vmul.f32 %v4899_v16, %v713_v22  ;;  %v633_v22 = vmul.f32 %v4788_v59, %v4755_v47 }
  0xe9   : > { %764 = vperm.xlu0 %4414, %v4664_v27  }
  0xea   : > { %v721_v17 = vpop.permute.xlu1 %720  ;;  %v885_v20 = vpop.permute.xlu0 %884 }
  0xeb   : > { %v803_v21 = vmul.f32 %v4899_v16, %v721_v17  ;;  %v991_v45 = vmul.f32 %v4916_v9, %v885_v20  ;;  %1080 = vperm.xlu1 %4409, %v4595_v10   ;;  %v833_v17 = vadd.f32 %v801_v0, %v637_v58  ;;  %v1379_v58 = vld [vmem:[%s6827_s3] sm:$0x7] }
  0xed   : > { %v835_v48 = vadd.f32 %v803_v21, %v639_v25  ;;  %v4926_v27 = vadd.f32 %v991_v45, %v827_v8  ;;  %768 = vperm.xlu0 %4414, %v4675_v30   ;;  %v829_v25 = vadd.f32 %v797_v33, %v633_v22  ;;  %v6916_v8 = vmov 1  }
  0xee   : > { %v4931_v15 = vpop.permute.xlu0 %948 }
  0xef   : > { %6915 = vst [vmem:[#allocation22_spill] sm:$0xff] %v4926_v27  ;;  %v909_v34 = vpop.permute.xlu1 %908  ;;  %1144 = vperm.xlu1 %4409, %v4659_v26   ;;  %v1031_v20 = vadd.f32 %v999_v24, %v835_v48  ;;  %v6918_v48 = vmov 2   ;;  %v788_v27 = vmul.f32 %v4899_v16, %v4849_v2 }
  0xf0   : > { %v997_v10 = vmul.f32 %v4916_v9, %v909_v34  ;;  %v1177_v34 = vsub.s32 3, %v4764_v51 }
  0xf1   : > { %776 = vperm.xlu0 %4414, %v4683_v32   ;;  %v624_v32 = vmul.f32 %v4788_v59, %v4730_v39 }
  0xf2   : > { %v1029_v21 = vadd.f32 %v997_v10, %v833_v17  ;;  %v893_v7 = vpop.permute.xlu0 %892  ;;  %v4967_v10 = vrot.slane %v1379_v58, %v4890_v52  ;;  %v4970_v22 = vrot.slane %v4775_v55, %v1177_v34  ;;  %v4985_v55 = vld [vmem:[%s6826_s2] ss:$0 sm:$0xff]  ;;  %v4989_v34 = vrot.slane %v1379_v58, %v4902_v23 }
  0xf3   : > { %v993_v54 = vmul.f32 %v4916_v9, %v893_v7  ;;  %4410 = vset.pattern.permute.xlu1 %v6916_v8  ;;  %v4941_v61 = vpop.permute.xlu1 %852 }
  0xf4   : > { %760 = vperm.xlu1 %4410, %v4667_v28   ;;  %v1502_v51 = vmul.f32 0.0, %v4967_v10  ;;  %v1715_v39 = vmul.f32 0.0, %v4989_v34 }
  0xf5   : > { %v4944_v26 = vadd.f32 %v993_v54, %v829_v25  ;;  %4417 = vset.pattern.permute.xlu0 %v6918_v48 }
  0xf6   : > { %v4947_v0 = vpop.permute.xlu0 %960  ;;  %976 = vperm.xlu0 %4417, %v4680_v31  }
  0xf7   : > { %6917 = vst [vmem:[#allocation23_spill] sm:$0xff] %v4944_v26  ;;  %v857_v47 = vpop.permute.xlu1 %856  ;;  %v4977_v26 = vrot.slane %v1379_v58, %v4778_v56 }
  0xf8   : > { %704 = vperm.xlu1 %4410, %v4611_v14  }
  0xfa   : > { %v4951_v24 = vpop.permute.xlu0 %904  ;;  %4419 = vset.pattern.permute.xlu0 %v6912_v19 }
  0xfb   : > { %v4954_v45 = vpop.permute.xlu1 %920 }
  0xfc   : > { %6919 = vst [vmem:[#allocation24_spill] sm:$0xff] %v4954_v45  ;;  %708 = vperm.xlu1 %4410, %v4608_v13  }
  0xfe   : > { %v4960_v33 = vpop.permute.xlu0 %968 }
  0xff   : > { %6920 = vst [vmem:[#allocation25_spill] sm:$0xff] %v4960_v33 }
 0x100   : > { %772 = vperm.xlu1 %4410, %v4672_v29   ;;  %v4964_v17 = vpop.permute.xlu1 %1108  ;;  %v820_v29 = vadd.f32 %v788_v27, %v624_v32 }
 0x101   : > { %6921 = vst [vmem:[#allocation26_spill] sm:$0xff] %v4964_v17  ;;  %v1567_v17 = vrot.slane %v1502_v51, 1 }
 0x103   : > { %v1105_v7 = vpop.permute.xlu0 %1104 }
 0x104   : > { %v1193_v25 = vmul.f32 %v4970_v22, %v1105_v7  ;;  %4411 = vset.pattern.permute.xlu1 %v6918_v48  ;;  %v4974_v54 = vpop.permute.xlu1 %1048  ;;  %v984_v48 = vmul.f32 %v4916_v9, %v857_v47 }
 0x105   : > { %6922 = vst [vmem:[#allocation27_spill] sm:$0xff] %v4974_v54  ;;  %896 = vperm.xlu1 %4411, %v4600_v11   ;;  %v4996_v54 = vmul.f32 0.0, %v4977_v26  ;;  %v1380_v11 = vld [vmem:[%s6827_s3 + $0x4] sm:$0x7] }
 0x106   : > { %v1225_v7 = vadd.f32 %v1193_v25, %v1029_v21  ;;  %v1016_v25 = vadd.f32 %v984_v48, %v820_v29  ;;  %v5010_v27 = vrot.slane %v1380_v11, %v4902_v23  ;;  %v5020_v29 = vrot.slane %v1380_v11, %v4778_v56 }
 0x107   : > { %v1053_v31 = vpop.permute.xlu0 %1052 }
 0x108   : > { %v1264_v8 = vadd.f32 %v4985_v55, %v1225_v7  ;;  %v1113_v2 = vpop.permute.xlu1 %1112  ;;  %v1180_v21 = vmul.f32 %v4970_v22, %v1053_v31  ;;  %v1381_v31 = vld [vmem:[%s6827_s3 + $0x8] sm:$0x7] }
 0x109   : > { %v1195_v58 = vmul.f32 %v4970_v22, %v1113_v2  ;;  %956 = vperm.xlu1 %4411, %v4667_v28   ;;  %v1663_v2 = vadd.f32 %v1567_v17, %v4996_v54 }
 0x10a   : > { %v1296_v47 = vmax.f32 %v1264_v8, 0.0  ;;  %v1212_v32 = vadd.f32 %v1180_v21, %v1016_v25  ;;  %v5017_v8 = vrot.slane %v1715_v39, 2  ;;  %v625_v21 = vmul.f32 %v4788_v59, %v4721_v36 }
 0x10b   : > { %v1227_v7 = vadd.f32 %v1195_v58, %v1031_v20  ;;  %v5005_v33 = vpop.permute.xlu0 %1116  ;;  %v5023_v20 = vrot.slane %v1380_v11, %v4890_v52  ;;  %v2370_v58 = vmul.f32 0.0, %v5010_v27  ;;  %v5036_v39 = vrot.slane %v1381_v31, %v4778_v56 }
 0x10c   : > { %v5007_v45 = vmin.f32 %v1296_v47, 6.0  ;;  %6924 = vst [vmem:[#allocation29_spill] sm:$0xff] %v5017_v8  ;;  %v5039_v47 = vrot.slane %v1381_v31, %v4890_v52  ;;  %v1251_v56 = vadd.f32 %v4985_v55, %v1212_v32  ;;  %v629_v32 = vmul.f32 %v4788_v59, %v4742_v43 }
 0x10d   : > { %900 = vperm.xlu1 %4411, %v4611_v14   ;;  %v729_v51 = vpop.permute.xlu1 %728  ;;  %v5031_v14 = vmul.f32 %v4788_v59, %v4724_v37  ;;  %v1266_v11 = vadd.f32 %v4985_v55, %v1227_v7  ;;  %v5054_v37 = vmul.f32 %v4788_v59, %v4727_v38  ;;  %v5059_v7 = vadd.f32 %v5017_v8, %v1663_v2 }
 0x10e   : > { %6923 = vst [vmem:[#allocation28_spill] sm:$0xff] %v5007_v45  ;;  %v805_v48 = vmul.f32 %v4899_v16, %v729_v51  ;;  %v5046_v51 = vrot.slane %v1381_v31, %v4902_v23  ;;  %v5050_v36 = vmul.f32 %v4967_v10, %v5007_v45  ;;  %v5066_v23 = vmul.f32 %v4788_v59, %v4734_v40 }
 0x10f   : > { %v5033_v17 = vpop.permute.xlu0 %1060  ;;  %6926 = vst [vmem:[#allocation31_spill] sm:$0xff] %v5059_v7  ;;  %v627_v31 = vmul.f32 %v4788_v59, %v4736_v41  ;;  %v5081_v2 = vmul.f32 %v4788_v59, %v4746_v44  ;;  %v5090_v41 = vmul.f32 %v4788_v59, %v4753_v46  ;;  %v5098_v43 = vmul.f32 %v4788_v59, %v4759_v49 }
 0x110   : > { %v5043_v25 = vadd.f32 %v805_v48, %v4795_v62  ;;  %6925 = vst [vmem:[#allocation30_spill] sm:$0xff] %v5050_v36  ;;  %v5062_v62 = vmul.f32 0.0, %v5020_v29  ;;  %6927 = vst [vmem:[#allocation32_spill] sm:$0xff] %v5066_v23  ;;  %v5071_v48 = vrot.slane %v2370_v58, 2  ;;  %v5086_v23 = vmul.f32 0.0, %v5036_v39 }
 0x111   : > { %964 = vperm.xlu1 %4411, %v4675_v30   ;;  %v737_v52 = vpop.permute.xlu1 %736  ;;  %v5075_v30 = vmul.f32 %v4788_v59, %v4740_v42  ;;  %6929 = vst [vmem:[#allocation34_spill] sm:$0xff] %v5081_v2  ;;  %6930 = vst [vmem:[#allocation35_spill] sm:$0xff] %v5090_v41  ;;  %v1298_v58 = vmax.f32 %v1266_v11, 0.0  ;;  %v5102_v44 = vmul.f32 %v4788_v59, %v4761_v50  ;;  %v1283_v46 = vmax.f32 %v1251_v56, 0.0  ;;  %v6972_v41 = vld [vmem:[#allocation5_spill] sm:$0xff] }
 0x112   : > { %v807_v38 = vmul.f32 %v4899_v16, %v737_v52  ;;  %6928 = vst [vmem:[#allocation33_spill] sm:$0xff] %v5071_v48  ;;  %6931 = vst [vmem:[#allocation36_spill] sm:$0xff] %v5098_v43  ;;  %v5106_v2 = vmul.f32 %v4788_v59, %v4770_v53  ;;  %v644_v49 = vmul.f32 %v4788_v59, %v4799_v63 }
 0x113   : > { %v5083_v40 = vpop.permute.xlu0 %1064  ;;  %6932 = vst [vmem:[#allocation37_spill] sm:$0xff] %v5102_v44  ;;  %v5119_v50 = vmul.f32 %v4989_v34, %v5007_v45  ;;  %v5123_v53 = vmul.f32 %v4788_v59, %v4792_v60  ;;  %v5127_v56 = vmul.f32 %v4788_v59, %v4806_v1  ;;  %v5136_v52 = vmin.f32 %v1298_v58, 6.0  ;;  %v6942_v58 = vld [vmem:[#allocation12_spill] sm:$0xff] }
 0x114   : > { %v5093_v42 = vadd.f32 %v807_v38, %v4802_v4  ;;  %6933 = vst [vmem:[#allocation38_spill] sm:$0xff] %v5106_v2  ;;  %v5111_v4 = vmul.f32 %v4788_v59, %v4781_v57  ;;  %v789_v57 = vmul.f32 %v4899_v16, %v4858_v3  ;;  %v6938_v60 = vrot.slane %v5050_v36, 1  ;;  %v6940_v2 = vld [vmem:[#allocation10_spill] sm:$0xff]  ;;  %v6946_v36 = vld [vmem:[#allocation17_spill] sm:$0xff] }
 0x115   : > { %4413 = vset.pattern.permute.xlu1 %v6912_v19  ;;  %v741_v11 = vpop.permute.xlu1 %740  ;;  %6935 = vst [vmem:[#allocation40_spill] sm:$0xff] %v5119_v50  ;;  %6936 = vst [vmem:[#allocation41_spill] sm:$0xff] %v5123_v53  ;;  %v5143_v1 = vmul.f32 %v4788_v59, %v4813_v18  ;;  %v791_v3 = vmul.f32 %v4899_v16, %v4865_v5  ;;  %v985_v53 = vmul.f32 %v4916_v9, %v4868_v35 }
 0x116   : > { %6934 = vst [vmem:[#allocation39_spill] sm:$0xff] %v5111_v4  ;;  %v808_v38 = vmul.f32 %v4899_v16, %v741_v11  ;;  %1088 = vperm.xlu1 %4413, %v4603_v12   ;;  %v3023_v11 = vmul.f32 0.0, %v5046_v51  ;;  %v1004_v12 = vmul.f32 %v4916_v9, %v4894_v6  ;;  %6937 = vst [vmem:[#allocation42_spill] sm:$0xff] %v5136_v52  ;;  %v1315_v4 = vmin.f32 %v1283_v46, 6.0 }
 0x117   : > { %v5131_v63 = vpop.permute.xlu0 %1128  ;;  %v1687_v44 = vadd.f32 %v6938_v60, %v4996_v54  ;;  %6939 = vst [vmem:[#allocation43_spill] sm:$0xff] %v5143_v1  ;;  %v5151_v6 = vmul.f32 %v4788_v59, %v6940_v2  ;;  %v6846_v5 = vrot.slane %v5119_v50, 2  ;;  %v6944_v60 = vld [vmem:[#allocation14_spill] sm:$0xff]  ;;  %v821_v46 = vadd.f32 %v789_v57, %v625_v21  ;;  %v6959_v1 = vld [vmem:[#allocation21_spill] sm:$0xff] }
 0x118   : > { %v840_v43 = vadd.f32 %v808_v38, %v644_v49  ;;  %v5155_v49 = vmul.f32 %v4788_v59, %v6942_v58  ;;  %v5165_v35 = vmul.f32 %v4788_v59, %v6944_v60  ;;  %v793_v2 = vmul.f32 %v4899_v16, %v6946_v36  ;;  %v6948_v58 = vld [vmem:[#allocation16_spill] sm:$0xff] }
 0x119   : > { %6941 = vst [vmem:[#allocation10_spill] sm:$0xff] %v5151_v6  ;;  %v1964_v59 = vadd.f32 %v6846_v5, %v1687_v44  ;;  %v5185_v21 = vmul.f32 %v5023_v20, %v5136_v52  ;;  %v823_v36 = vadd.f32 %v791_v3, %v627_v31  ;;  %v5187_v57 = vadd.f32 %v985_v53, %v821_v46  ;;  %v6956_v5 = vld [vmem:[#allocation4_spill] sm:$0xff]  ;;  %v6958_v46 = vld [vmem:[#allocation19_spill] sm:$0xff] }
 0x11a   : > { %6943 = vst [vmem:[#allocation12_spill] sm:$0xff] %v5155_v49  ;;  %1152 = vperm.xlu1 %4413, %v4667_v28   ;;  %v5158_v38 = vpop.permute.xlu1 %864  ;;  %v5160_v18 = vadd.f32 %v1004_v12, %v840_v43  ;;  %6945 = vst [vmem:[#allocation14_spill] sm:$0xff] %v5165_v35  ;;  %v5173_v28 = vadd.f32 %v5062_v62, %v5059_v7  ;;  %v5177_v43 = vmul.f32 %v4916_v9, %v6948_v58  ;;  %v6953_v58 = vld [vmem:[#allocation18_spill] sm:$0xff] }
 0x11b   : > { %v5169_v6 = vpop.permute.xlu0 %1072  ;;  %v5179_v12 = vrot.slane %v3023_v11, 2  ;;  %6951 = vst [vmem:[#allocation45_spill] sm:$0xff] %v5185_v21  ;;  %v5190_v60 = vmul.f32 %v4967_v10, %v1315_v4  ;;  %v5194_v35 = vmul.f32 %v4967_v10, %v5136_v52  ;;  %v5198_v11 = vmul.f32 %v4916_v9, %v6953_v58 }
 0x11c   : > { %6947 = vst [vmem:[#allocation17_spill] sm:$0xff] %v5173_v28  ;;  %6949 = vst [vmem:[#allocation16_spill] sm:$0xff] %v5177_v43  ;;  %v5201_v44 = vmul.f32 %v4989_v34, %v1315_v4  ;;  %v2058_v31 = vmul.f32 %v5020_v29, %v1315_v4  ;;  %v5206_v53 = vmul.f32 %v5023_v20, %v1315_v4  ;;  %v6967_v28 = vld [vmem:[#allocation24_spill] sm:$0xff] }
 0x11d   : > { %6950 = vst [vmem:[#allocation44_spill] sm:$0xff] %v5179_v12  ;;  %6952 = vst [vmem:[#allocation46_spill] sm:$0xff] %v5194_v35  ;;  %v5208_v3 = vadd.f32 %v793_v2, %v629_v32  ;;  %v5212_v49 = vmul.f32 %v4916_v9, %v6958_v46  ;;  %v5216_v58 = vmul.f32 %v4916_v9, %v6959_v1 }
 0x11e   : > { %6954 = vst [vmem:[#allocation18_spill] sm:$0xff] %v5198_v11  ;;  %6955 = vst [vmem:[#allocation47_spill] sm:$0xff] %v5201_v44  ;;  %1156 = vperm.xlu1 %4413, %v6956_v5   ;;  %v925_v50 = vpop.permute.xlu1 %924  ;;  %v5223_v5 = vmul.f32 %v4916_v9, %v4931_v15  ;;  %v5226_v12 = vmul.f32 %v5010_v27, %v1315_v4  ;;  %v2128_v32 = vadd.f32 %v5062_v62, %v1964_v59 }
 0x11f   : > { %6957 = vst [vmem:[#allocation4_spill] sm:$0xff] %v5208_v3  ;;  %6960 = vst [vmem:[#allocation19_spill] sm:$0xff] %v5216_v58  ;;  %v1001_v11 = vmul.f32 %v4916_v9, %v925_v50  ;;  %v5219_v43 = vpop.permute.xlu0 %1140  ;;  %v5232_v46 = vmul.f32 %v4916_v9, %v4941_v61  ;;  %v2106_v59 = vadd.f32 %v2058_v31, %v5059_v7 }
 0x120   : > { %6961 = vst [vmem:[#allocation21_spill] sm:$0xff] %v5223_v5  ;;  %v5245_v61 = vmul.f32 %v5010_v27, %v5136_v52  ;;  %v5249_v1 = vmul.f32 %v4916_v9, %v4947_v0  ;;  %v5260_v31 = vmul.f32 %v4916_v9, %v4951_v24  ;;  %v1455_v2 = vmul.f32 %v4977_v26, %v1315_v4 }
 0x121   : > { %v5236_v50 = vadd.f32 %v1001_v11, %v5043_v25  ;;  %v1183_v25 = vmul.f32 %v4970_v22, %v5083_v40  ;;  %v6966_v0 = vrot.slane %v5185_v21, 1  ;;  %v5268_v40 = vmul.f32 %v4916_v9, %v6967_v28 }
 0x122   : > { %1100 = vperm.xlu1 %4413, %v4608_v13   ;;  %v869_v5 = vpop.permute.xlu1 %868  ;;  %6962 = vst [vmem:[#allocation48_spill] sm:$0xff] %v5245_v61  ;;  %6963 = vst [vmem:[#allocation49_spill] sm:$0xff] %v5249_v1  ;;  %v5256_v13 = vmul.f32 %v4989_v34, %v5136_v52  ;;  %v6970_v24 = vrot.slane %v5194_v35, 1  ;;  %v6971_v4 = vrot.slane %v5190_v60, 1  ;;  %v6974_v28 = vrot.slane %v5201_v44, 2 }
 0x123   : > { %v987_v11 = vmul.f32 %v4916_v9, %v869_v5  ;;  %v1085_v15 = vpop.permute.xlu0 %1084  ;;  %6965 = vst [vmem:[#allocation51_spill] sm:$0xff] %v5260_v31  ;;  %v2340_v1 = vadd.f32 %v6966_v0, %v2128_v32  ;;  %v6968_v5 = vld [vmem:[#allocation25_spill] sm:$0xff]  ;;  %v6973_v32 = vrot.slane %v5206_v53, 1  ;;  %v6979_v44 = vmov 1  }
 0x124   : > { %6964 = vst [vmem:[#allocation50_spill] sm:$0xff] %v5256_v13  ;;  %v5272_v3 = vmul.f32 %v4916_v9, %v6968_v5  ;;  %v1690_v31 = vadd.f32 %v6970_v24, %v4996_v54  ;;  %v1668_v58 = vadd.f32 %v6971_v4, %v1455_v2  ;;  %v1821_v5 = vsel %vm1811_vm0, %v6974_v28, %v5017_v8  ;;  %v6975_v4 = vld [vmem:[#allocation26_spill] sm:$0xff] }
 0x125   : > { %v1019_v7 = vadd.f32 %v987_v11, %v823_v36  ;;  %v2318_v0 = vadd.f32 %v6973_v32, %v2106_v59  ;;  %v1199_v11 = vmul.f32 %v4970_v22, %v5131_v63  ;;  %v5293_v35 = vmul.f32 %v4970_v22, %v6975_v4  ;;  %v6976_v59 = vld [vmem:[#allocation27_spill] sm:$0xff] }
 0x126   : > { %6969 = vst [vmem:[#allocation24_spill] sm:$0xff] %v5272_v3  ;;  %1164 = vperm.xlu1 %4413, %v6972_v41   ;;  %v933_v21 = vpop.permute.xlu1 %932  ;;  %v6855_v41 = vrot.slane %v5256_v13, 2  ;;  %v5297_v32 = vmul.f32 %v4970_v22, %v6976_v59  ;;  %v6977_v28 = vrot.slane %v5226_v12, 2  ;;  %v5315_v8 = vmul.f32 %v4970_v22, %v5033_v17 }
 0x127   : > { %v1215_v24 = vadd.f32 %v1183_v25, %v1019_v7  ;;  %v1003_v3 = vmul.f32 %v4916_v9, %v933_v21  ;;  %v1149_v2 = vpop.permute.xlu0 %1148  ;;  %v6978_v7 = vrot.slane %v5245_v61, 2  ;;  %v5307_v21 = vmul.f32 %v4970_v22, %v5005_v33 }
 0x128   : > { %v2468_v36 = vsel %vm1811_vm0, %v6977_v28, %v5071_v48  ;;  %v1967_v59 = vadd.f32 %v6855_v41, %v1690_v31  ;;  %v5318_v28 = vadd.f32 %v1821_v5, %v1668_v58  ;;  %v5326_v33 = vmul.f32 %v5020_v29, %v5136_v52 }
 0x129   : > { %v2616_v63 = vadd.f32 %v6978_v7, %v2340_v1  ;;  %v1254_v25 = vadd.f32 %v4985_v55, %v1215_v24  ;;  %v1035_v4 = vadd.f32 %v1003_v3, %v5093_v42  ;;  %v5322_v1 = vmul.f32 %v4977_v26, %v5007_v45  ;;  %v6983_v24 = vld [vmem:[#allocation6_spill] sm:$0xff] }
 0x12a   : > { %4415 = vset.pattern.permute.xlu1 %v6979_v44  ;;  %6980 = vst [vmem:[#allocation25_spill] sm:$0xff] %v5318_v28  ;;  %6982 = vst [vmem:[#allocation26_spill] sm:$0xff] %v5326_v33  ;;  %v5329_v17 = vadd.f32 %v2468_v36, %v2318_v0  ;;  %v5333_v44 = vmul.f32 %v4977_v26, %v5136_v52  ;;  %v5337_v58 = vmul.f32 %v4916_v9, %v5158_v38  ;;  %v6988_v52 = vmov 2  }
 0x12b   : > { %6981 = vst [vmem:[#allocation5_spill] sm:$0xff] %v5322_v1  ;;  %v1286_v42 = vmax.f32 %v1254_v25, 0.0  ;;  %v1231_v3 = vadd.f32 %v1199_v11, %v1035_v4  ;;  %780 = vperm.xlu1 %4415, %v6983_v24   ;;  %v1057_v31 = vpop.permute.xlu1 %1056  ;;  %v1093_v7 = vpop.permute.xlu0 %1092  ;;  %v5341_v5 = vmul.f32 %v4970_v22, %v5169_v6  ;;  %v5345_v25 = vadd.f32 %v5086_v23, %v2616_v63 }
 0x12c   : > { %6984 = vst [vmem:[#allocation27_spill] sm:$0xff] %v5333_v44  ;;  %v1181_v11 = vmul.f32 %v4970_v22, %v1057_v31  ;;  %v5349_v0 = vmul.f32 %v4970_v22, %v5219_v43  ;;  %v5355_v38 = vadd.f32 %v5062_v62, %v1967_v59  ;;  %v5358_v41 = vmul.f32 %v4970_v22, %v1085_v15 }
 0x12d   : > { %v5351_v36 = vmin.f32 %v1286_v42, 6.0  ;;  %v1270_v4 = vadd.f32 %v4985_v55, %v1231_v3  ;;  %v5361_v6 = vmul.f32 %v4970_v22, %v1149_v2  ;;  %v5365_v31 = vmul.f32 %v4970_v22, %v1093_v7  ;;  %v6992_v7 = vld [vmem:[#allocation7_spill] sm:$0xff] }
 0x12e   : > { %v1213_v63 = vadd.f32 %v1181_v11, %v5187_v57 }
 0x12f   : > { %6985 = vst [vmem:[#allocation6_spill] sm:$0xff] %v5351_v36  ;;  %6986 = vst [vmem:[#allocation52_spill] sm:$0xff] %v5361_v6  ;;  %v1302_v43 = vmax.f32 %v1270_v4, 0.0  ;;  %4416 = vset.pattern.permute.xlu1 %v6988_v52  ;;  %v1121_v42 = vpop.permute.xlu1 %1120  ;;  %v1097_v45 = vpop.permute.xlu0 %1096  ;;  %v5370_v59 = vmul.f32 %v5036_v39, %v5351_v36  ;;  %v5374_v15 = vmul.f32 %v5039_v47, %v5351_v36 }
 0x130   : > { %6987 = vst [vmem:[#allocation53_spill] sm:$0xff] %v5365_v31  ;;  %v5378_v2 = vmul.f32 %v5046_v51, %v5351_v36  ;;  %v1252_v57 = vadd.f32 %v4985_v55, %v1213_v63  ;;  %v1197_v3 = vmul.f32 %v4970_v22, %v1121_v42  ;;  %972 = vperm.xlu1 %4416, %v6992_v7  }
 0x131   : > { %6989 = vst [vmem:[#allocation54_spill] sm:$0xff] %v5370_v59  ;;  %6990 = vst [vmem:[#allocation55_spill] sm:$0xff] %v5374_v15  ;;  %v5384_v52 = vmul.f32 %v4970_v22, %v1097_v45  ;;  %v5388_v11 = vmul.f32 %v5020_v29, %v5351_v36  ;;  %v5390_v4 = vmin.f32 %v1302_v43, 6.0  ;;  %v5396_v63 = vmul.f32 %v5023_v20, %v5351_v36 }
 0x132   : > { %6991 = vst [vmem:[#allocation56_spill] sm:$0xff] %v5378_v2  ;;  %v1284_v42 = vmax.f32 %v1252_v57, 0.0  ;;  %v1229_v31 = vadd.f32 %v1197_v3, %v5236_v50  ;;  %v5401_v45 = vmul.f32 %v5010_v27, %v5351_v36 }
 0x133   : > { %6993 = vst [vmem:[#allocation7_spill] sm:$0xff] %v5384_v52  ;;  %6994 = vst [vmem:[#allocation57_spill] sm:$0xff] %v5388_v11  ;;  %v5405_v52 = vmul.f32 %v4977_v26, %v5351_v36  ;;  %v1125_v43 = vpop.permute.xlu1 %1124  ;;  %v1161_v61 = vpop.permute.xlu0 %1160  ;;  %v5410_v44 = vmul.f32 %v5036_v39, %v5390_v4  ;;  %v5414_v57 = vmul.f32 %v5039_v47, %v5390_v4 }
 0x134   : > { %6995 = vst [vmem:[#allocation58_spill] sm:$0xff] %v5390_v4  ;;  %v5418_v50 = vmul.f32 %v5046_v51, %v5390_v4  ;;  %v1316_v3 = vmin.f32 %v1284_v42, 6.0  ;;  %v1268_v33 = vadd.f32 %v4985_v55, %v1229_v31  ;;  %4418 = vset.pattern.permute.xlu1 %v6912_v19  ;;  %v5426_v13 = vmul.f32 %v4970_v22, %v1161_v61 }
 0x135   : > { %6996 = vst [vmem:[#allocation59_spill] sm:$0xff] %v5405_v52  ;;  %6997 = vst [vmem:[#allocation60_spill] sm:$0xff] %v5410_v44  ;;  %v5422_v52 = vmul.f32 %v4970_v22, %v1125_v43  ;;  %1168 = vperm.xlu1 %4418, %v6992_v7   ;;  %v5434_v42 = vmul.f32 %v4967_v10, %v5351_v36 }
 0x136   : > { %6998 = vst [vmem:[#allocation61_spill] sm:$0xff] %v5414_v57  ;;  %6999 = vst [vmem:[#allocation62_spill] sm:$0xff] %v5418_v50  ;;  %v1300_v31 = vmax.f32 %v1268_v33, 0.0  ;;  %v5437_v43 = vmul.f32 %v5036_v39, %v1316_v3  ;;  %v5440_v19 = vmul.f32 %v5039_v47, %v1316_v3  ;;  %v5443_v61 = vmul.f32 %v5046_v51, %v1316_v3 }
 0x137   : > { %7000 = vst [vmem:[#allocation63_spill] sm:$0xff] %v5426_v13  ;;  %7001 = vst [vmem:[#allocation64_spill] sm:$0xff] %v5434_v42  ;;  %v1069_v7 = vpop.permute.xlu1 %1068  ;;  %v5446_v44 = vmul.f32 %v5020_v29, %v1316_v3  ;;  %v5449_v4 = vmul.f32 %v5023_v20, %v1316_v3  ;;  %v5452_v1 = vmul.f32 %v5010_v27, %v1316_v3 }
 0x138   : > { %v5455_v33 = vmul.f32 %v4977_v26, %v1316_v3  ;;  %v5457_v13 = vmin.f32 %v1300_v31, 6.0  ;;  %v5460_v36 = vmul.f32 %v4970_v22, %v1069_v7  ;;  %v657_v50 = vpop.permute.xlu0 %656  ;;  %v5472_v31 = vmul.f32 %v4989_v34, %v1316_v3 }
 0x139   : > { %7002 = vst [vmem:[#allocation65_spill] sm:$0xff] %v5446_v44  ;;  %7003 = vst [vmem:[#allocation66_spill] sm:$0xff] %v5449_v4  ;;  %v787_v59 = vmul.f32 %v4899_v16, %v657_v50  ;;  %1172 = vperm.xlu1 %4418, %v6983_v24  }
 0x13a   : > { %7004 = vst [vmem:[#allocation67_spill] sm:$0xff] %v5452_v1  ;;  %7005 = vst [vmem:[#allocation68_spill] sm:$0xff] %v5455_v33  ;;  %v5469_v33 = vmul.f32 %v4967_v10, %v1316_v3  ;;  %v5476_v7 = vmul.f32 %v5036_v39, %v5457_v13  ;;  %v5480_v11 = vmul.f32 %v5039_v47, %v5457_v13 }
 0x13b   : > { %7006 = vst [vmem:[#allocation69_spill] sm:$0xff] %v5457_v13  ;;  %v5484_v24 = vmul.f32 %v5046_v51, %v5457_v13  ;;  %v819_v50 = vadd.f32 %v787_v59, %v5031_v14  ;;  %v1133_v15 = vpop.permute.xlu1 %1132  ;;  %v5490_v3 = vmul.f32 %v5020_v29, %v5457_v13  ;;  %v5494_v57 = vmul.f32 %v5023_v20, %v5457_v13 }
 0x13c   : > { %7007 = vst [vmem:[#allocation70_spill] sm:$0xff] %v5476_v7  ;;  %7008 = vst [vmem:[#allocation71_spill] sm:$0xff] %v5480_v11  ;;  %v1200_v7 = vmul.f32 %v4970_v22, %v1133_v15  ;;  %v669_v48 = vpop.permute.xlu0 %668  ;;  %v6879_v4 = vrot.slane %v5480_v11, 1  ;;  %v5512_v1 = vmul.f32 %v5010_v27, %v5457_v13 }
 0x13d   : > { %7009 = vst [vmem:[#allocation72_spill] sm:$0xff] %v5484_v24  ;;  %7010 = vst [vmem:[#allocation73_spill] sm:$0xff] %v5490_v3  ;;  %v1015_v59 = vadd.f32 %v5232_v46, %v819_v50  ;;  %v790_v2 = vmul.f32 %v4899_v16, %v669_v48  ;;  %v7012_v3 = vrot.slane %v5469_v33, 1  ;;  %v6882_v28 = vrot.slane %v5494_v57, 1 }
 0x13e   : > { %7011 = vst [vmem:[#allocation74_spill] sm:$0xff] %v5494_v57  ;;  %v1232_v44 = vadd.f32 %v1200_v7, %v5160_v18  ;;  %v2993_v15 = vadd.f32 %v6879_v4, %v5345_v25  ;;  %7013 = vst [vmem:[#allocation75_spill] sm:$0xff] %v5512_v1  ;;  %v7014_v18 = vrot.slane %v5472_v31, 2 }
 0x13f   : > { %v1669_v6 = vadd.f32 %v7012_v3, %v4996_v54  ;;  %v1211_v48 = vadd.f32 %v5297_v32, %v1015_v59  ;;  %v822_v50 = vadd.f32 %v790_v2, %v5054_v37  ;;  %v5520_v3 = vld [vmem:[%s6828_s4] ss:$0 sm:$0xff]  ;;  %v2343_v25 = vadd.f32 %v6882_v28, %v5355_v38 }
 0x140   : > { %v1271_v4 = vadd.f32 %v4985_v55, %v1232_v44  ;;  %v749_v14 = vpop.permute.xlu1 %748  ;;  %v677_v46 = vpop.permute.xlu0 %676  ;;  %v7015_v32 = vrot.slane %v5484_v24, 2  ;;  %v6886_v37 = vrot.slane %v5512_v1, 2  ;;  %v7016_v2 = vrot.slane %v5434_v42, 1 }
 0x141   : > { %v1946_v7 = vadd.f32 %v7014_v18, %v1669_v6  ;;  %v1250_v6 = vadd.f32 %v4985_v55, %v1211_v48  ;;  %v1018_v18 = vadd.f32 %v5337_v58, %v822_v50  ;;  %v810_v38 = vmul.f32 %v4899_v16, %v749_v14  ;;  %v7018_v58 = vld [vmem:[#allocation32_spill] sm:$0xff] }
 0x142   : > { %v3269_v59 = vadd.f32 %v7015_v32, %v2993_v15  ;;  %v5534_v13 = vadd.f32 %v7016_v2, %v4996_v54  ;;  %v792_v44 = vmul.f32 %v4899_v16, %v677_v46  ;;  %v1303_v28 = vmax.f32 %v1271_v4, 0.0 }
 0x143   : > { %v2110_v57 = vadd.f32 %v5062_v62, %v1946_v7  ;;  %v2619_v32 = vadd.f32 %v6886_v37, %v2343_v25  ;;  %v1282_v42 = vmax.f32 %v1250_v6, 0.0  ;;  %v1214_v2 = vadd.f32 %v5315_v8, %v1018_v18 }
 0x144   : > { %7017 = vst [vmem:[#allocation76_spill] sm:$0xff] %v5534_v13  ;;  %v3324_v15 = vadd.f32 %v5520_v3, %v3269_v59  ;;  %v5546_v48 = vadd.f32 %v810_v38, %v5127_v56  ;;  %v824_v50 = vadd.f32 %v792_v44, %v7018_v58  ;;  %v5549_v14 = vmin.f32 %v1303_v28, 6.0  ;;  %v753_v46 = vpop.permute.xlu1 %752  ;;  %v685_v13 = vpop.permute.xlu0 %684 }
 0x145   : > { %v7020_v4 = vrot.slane %v5396_v63, 1  ;;  %v5554_v59 = vadd.f32 %v5086_v23, %v2619_v32  ;;  %v5556_v25 = vmin.f32 %v1282_v42, 6.0  ;;  %v1253_v8 = vadd.f32 %v4985_v55, %v1214_v2  ;;  %v7026_v32 = vld [vmem:[#allocation9_spill] sm:$0xff] }
 0x146   : > { %7019 = vst [vmem:[#allocation32_spill] sm:$0xff] %v5549_v14  ;;  %v3372_v24 = vmax.f32 %v3324_v15, 0.0  ;;  %v1020_v56 = vadd.f32 %v5212_v49, %v824_v50  ;;  %v811_v6 = vmul.f32 %v4899_v16, %v753_v46  ;;  %v794_v28 = vmul.f32 %v4899_v16, %v685_v13 }
 0x147   : > { %v2322_v7 = vadd.f32 %v7020_v4, %v2110_v57  ;;  %7021 = vst [vmem:[#allocation77_spill] sm:$0xff] %v5554_v59  ;;  %v7022_v18 = vrot.slane %v5401_v45, 2  ;;  %v5570_v57 = vmul.f32 %v5036_v39, %v5549_v14  ;;  %v5574_v42 = vmul.f32 %v4977_v26, %v5556_v25  ;;  %v7029_v59 = vld [vmem:[#allocation34_spill] sm:$0xff] }
 0x148   : > { %v5566_v44 = vmin.f32 %v3372_v24, 6.0  ;;  %v1504_v49 = vmul.f32 %v4967_v10, %v5556_v25  ;;  %v1285_v15 = vmax.f32 %v1253_v8, 0.0  ;;  %v1216_v13 = vadd.f32 %v5460_v36, %v1020_v56  ;;  %v693_v58 = vpop.permute.xlu0 %692 }
 0x149   : > { %v5564_v38 = vadd.f32 %v7022_v18, %v2322_v7  ;;  %7025 = vst [vmem:[#allocation80_spill] sm:$0xff] %v5570_v57  ;;  %v5580_v2 = vadd.f32 %v811_v6, %v7026_v32  ;;  %v826_v24 = vadd.f32 %v794_v28, %v5075_v30  ;;  %v2057_v50 = vmul.f32 %v5020_v29, %v5556_v25  ;;  %v877_v36 = vpop.permute.xlu1 %876  ;;  %v7027_v6 = vld [vmem:[#allocation19_spill] sm:$0xff] }
 0x14a   : > { %7024 = vst [vmem:[#allocation79_spill] sm:$0xff] %v5566_v44  ;;  %v2156_v46 = vmul.f32 %v5023_v20, %v5556_v25  ;;  %v1570_v4 = vrot.slane %v1504_v49, 1  ;;  %v5587_v7 = vmin.f32 %v1285_v15, 6.0  ;;  %v1255_v18 = vadd.f32 %v4985_v55, %v1216_v13  ;;  %v7028_v30 = vld [vmem:[#allocation31_spill] sm:$0xff]  ;;  %v7030_v13 = vld [vmem:[#allocation4_spill] sm:$0xff] }
 0x14b   : > { %7023 = vst [vmem:[#allocation78_spill] sm:$0xff] %v5564_v38  ;;  %v796_v8 = vmul.f32 %v4899_v16, %v693_v58  ;;  %v989_v56 = vmul.f32 %v4916_v9, %v877_v36  ;;  %v5593_v32 = vadd.f32 %v7027_v6, %v826_v24  ;;  %v2105_v28 = vadd.f32 %v2057_v50, %v7028_v30  ;;  %v7032_v6 = vld [vmem:[#allocation17_spill] sm:$0xff] }
 0x14c   : > { %v2220_v37 = vrot.slane %v2156_v46, 1  ;;  %v1287_v57 = vmax.f32 %v1255_v18, 0.0  ;;  %v2368_v49 = vmul.f32 %v5010_v27, %v5556_v25  ;;  %v2711_v15 = vmul.f32 %v5036_v39, %v5587_v7  ;;  %v701_v14 = vpop.permute.xlu0 %700 }
 0x14d   : > { %v828_v1 = vadd.f32 %v796_v8, %v7029_v59  ;;  %v1021_v58 = vadd.f32 %v989_v56, %v7030_v13  ;;  %v7031_v36 = vrot.slane %v5206_v53, 1  ;;  %v2810_v50 = vmul.f32 %v5039_v47, %v5587_v7  ;;  %v941_v18 = vpop.permute.xlu1 %940 }
 0x14e   : > { %v2316_v44 = vadd.f32 %v2220_v37, %v7032_v6  ;;  %v5608_v46 = vmin.f32 %v1287_v57, 6.0  ;;  %v798_v59 = vmul.f32 %v4899_v16, %v701_v14  ;;  %v2464_v30 = vrot.slane %v2368_v49, 2 }
 0x14f   : > { %v2222_v24 = vsel %vm1566_vm1, %v2220_v37, %v7031_v36  ;;  %v1217_v11 = vadd.f32 %v5341_v5, %v1021_v58  ;;  %v5613_v56 = vmul.f32 %v4916_v9, %v941_v18  ;;  %v2759_v53 = vadd.f32 %v2711_v15, %v5329_v17  ;;  %v7033_v36 = vld [vmem:[#allocation35_spill] sm:$0xff] }
 0x150   : > { %v2317_v8 = vadd.f32 %v2222_v24, %v2105_v28  ;;  %v2874_v13 = vrot.slane %v2810_v50, 1  ;;  %v5617_v37 = vadd.f32 %v798_v59, %v7033_v36  ;;  %v7034_v6 = vrot.slane %v5226_v12, 2  ;;  %v717_v5 = vpop.permute.xlu0 %716 }
 0x151   : > { %v2592_v38 = vadd.f32 %v2464_v30, %v2316_v44  ;;  %v3022_v14 = vmul.f32 %v5046_v51, %v5587_v7  ;;  %v1256_v28 = vadd.f32 %v4985_v55, %v1217_v11  ;;  %v7035_v58 = vrot.slane %v5440_v19, 1  ;;  %v945_v50 = vpop.permute.xlu1 %944 }
 0x152   : > { %v2466_v57 = vsel %vm1811_vm0, %v2464_v30, %v7034_v6  ;;  %v2971_v15 = vadd.f32 %v2874_v13, %v2759_v53  ;;  %v802_v24 = vmul.f32 %v4899_v16, %v717_v5  ;;  %v7036_v44 = vrot.slane %v5190_v60, 1  ;;  %v7037_v6 = vld [vmem:[#allocation38_spill] sm:$0xff]  ;;  %v7040_v60 = vld [vmem:[#allocation44_spill] sm:$0xff] }
 0x153   : > { %v2593_v49 = vadd.f32 %v2466_v57, %v2317_v8  ;;  %v2875_v17 = vsel %vm1566_vm1, %v7035_v58, %v2874_v13  ;;  %v2757_v12 = vadd.f32 %v5086_v23, %v2592_v38  ;;  %v3118_v59 = vrot.slane %v3022_v14, 2 }
 0x154   : > { %v1572_v18 = vsel %vm1566_vm1, %v1570_v4, %v7036_v44  ;;  %v1288_v30 = vmax.f32 %v1256_v28, 0.0  ;;  %v1006_v11 = vmul.f32 %v4916_v9, %v945_v50  ;;  %v5636_v36 = vadd.f32 %v1570_v4, %v4996_v54  ;;  %v7041_v50 = vld [vmem:[#allocation16_spill] sm:$0xff] }
 0x155   : > { %v2758_v8 = vadd.f32 %v5437_v43, %v2593_v49  ;;  %v834_v53 = vadd.f32 %v802_v24, %v7037_v6  ;;  %v7038_v13 = vmov %v7035_v58  ;;  %v7039_v38 = vrot.slane %v5443_v61, 2  ;;  %v725_v43 = vpop.permute.xlu0 %724  ;;  %v889_v19 = vpop.permute.xlu1 %888 }
 0x156   : > { %v2969_v57 = vadd.f32 %v7038_v13, %v2757_v12  ;;  %v3121_v5 = vsel %vm1811_vm0, %v3118_v59, %v7040_v60  ;;  %v5646_v28 = vmin.f32 %v1288_v30, 6.0  ;;  %v1038_v58 = vadd.f32 %v1006_v11, %v5546_v48  ;;  %v7043_v11 = vld [vmem:[#allocation39_spill] sm:$0xff] }
 0x157   : > { %v3119_v14 = vsel %vm1811_vm0, %v7039_v38, %v3118_v59  ;;  %v2970_v49 = vadd.f32 %v2875_v17, %v2758_v8  ;;  %v3247_v4 = vadd.f32 %v3121_v5, %v2971_v15  ;;  %v1030_v44 = vadd.f32 %v7041_v50, %v834_v53 }
 0x158   : > { %v804_v24 = vmul.f32 %v4899_v16, %v725_v43  ;;  %v7042_v12 = vmov %v7039_v38  ;;  %v5654_v13 = vadd.f32 %v1572_v18, %v5574_v42  ;;  %v1234_v59 = vadd.f32 %v5349_v0, %v1038_v58 }
 0x159   : > { %v3245_v6 = vadd.f32 %v7042_v12, %v2969_v57  ;;  %v992_v30 = vmul.f32 %v4916_v9, %v889_v19  ;;  %v3246_v48 = vadd.f32 %v3119_v14, %v2970_v49  ;;  %v3302_v17 = vadd.f32 %v5520_v3, %v3247_v4  ;;  %v733_v18 = vpop.permute.xlu0 %732  ;;  %v953_v58 = vpop.permute.xlu1 %952 }
 0x15a   : > { %v1226_v15 = vadd.f32 %v5293_v35, %v1030_v44  ;;  %v836_v8 = vadd.f32 %v804_v24, %v7043_v11  ;;  %v1718_v61 = vmul.f32 %v4989_v34, %v5556_v25  ;;  %v1273_v57 = vadd.f32 %v4985_v55, %v1234_v59  ;;  %v7044_v24 = vld [vmem:[#allocation41_spill] sm:$0xff] }
 0x15b   : > { %v3300_v53 = vadd.f32 %v5520_v3, %v3245_v6  ;;  %v1024_v42 = vadd.f32 %v992_v30, %v828_v1  ;;  %v3301_v0 = vadd.f32 %v5520_v3, %v3246_v48  ;;  %v3350_v38 = vmax.f32 %v3302_v17, 0.0 }
 0x15c   : > { %v1265_v14 = vadd.f32 %v4985_v55, %v1226_v15  ;;  %v1032_v5 = vadd.f32 %v5268_v40, %v836_v8  ;;  %v806_v35 = vmul.f32 %v4899_v16, %v733_v18  ;;  %v1305_v49 = vmax.f32 %v1273_v57, 0.0  ;;  %v7046_v15 = vld [vmem:[#allocation18_spill] sm:$0xff] }
 0x15d   : > { %v3348_v43 = vmax.f32 %v3300_v53, 0.0  ;;  %v1220_v4 = vadd.f32 %v5358_v41, %v1024_v42  ;;  %v1008_v25 = vmul.f32 %v4916_v9, %v953_v58  ;;  %v3349_v50 = vmax.f32 %v3301_v0, 0.0  ;;  %v745_v59 = vpop.permute.xlu0 %744 }
 0x15e   : > { %v1297_v44 = vmax.f32 %v1265_v14, 0.0  ;;  %v1228_v1 = vadd.f32 %v5307_v21, %v1032_v5  ;;  %v838_v19 = vadd.f32 %v806_v35, %v7044_v24  ;;  %v5673_v6 = vmin.f32 %v1305_v49, 6.0  ;;  %v1077_v21 = vpop.permute.xlu1 %1076  ;;  %v7047_v5 = vld [vmem:[#allocation8_spill] sm:$0xff] }
 0x15f   : > { %v3396_v12 = vmin.f32 %v3348_v43, 6.0  ;;  %v1259_v40 = vadd.f32 %v4985_v55, %v1220_v4  ;;  %v3397_v30 = vmin.f32 %v3349_v50, 6.0  ;;  %v3398_v48 = vmin.f32 %v3350_v38, 6.0 }
 0x160   : > { %v5676_v17 = vmin.f32 %v1297_v44, 6.0  ;;  %v1267_v41 = vadd.f32 %v4985_v55, %v1228_v1  ;;  %v1034_v11 = vadd.f32 %v7046_v15, %v838_v19  ;;  %v809_v8 = vmul.f32 %v4899_v16, %v745_v59  ;;  %v7049_v59 = vld [vmem:[#allocation47_spill] sm:$0xff] }
 0x161   : > { %v1291_v53 = vmax.f32 %v1259_v40, 0.0  ;;  %v3493_v57 = vrot.slane %v3396_v12, 7  ;;  %v3494_v42 = vrot.slane %v3397_v30, 7  ;;  %v3496_v18 = vrot.slane %v3398_v48, 7  ;;  %v757_v43 = vpop.permute.xlu0 %756 }
 0x162   : > { %7045 = vst [vmem:[#allocation9_spill] sm:$0xff] %v5676_v17  ;;  %v1299_v0 = vmax.f32 %v1267_v41, 0.0  ;;  %v1230_v14 = vadd.f32 %v5422_v52, %v1034_v11  ;;  %v841_v35 = vadd.f32 %v809_v8, %v7047_v5  ;;  %v1186_v38 = vmul.f32 %v4970_v22, %v1077_v21  ;;  %v1137_v12 = vpop.permute.xlu1 %1136  ;;  %v7051_v11 = vld [vmem:[#allocation43_spill] sm:$0xff] }
 0x163   : > { %v5684_v58 = vmin.f32 %v1291_v53, 6.0  ;;  %v3495_v49 = vsel %vm3492_vm2, %v3493_v57, %v3494_v42  ;;  %v3497_v4 = vsel %vm3492_vm2, %v3494_v42, %v3496_v18  ;;  %v1817_v50 = vrot.slane %v1718_v61, 2 }
 0x164   : > { %v5688_v44 = vmin.f32 %v1299_v0, 6.0  ;;  %v1269_v1 = vadd.f32 %v4985_v55, %v1230_v14  ;;  %v1218_v24 = vadd.f32 %v1186_v38, %v5593_v32  ;;  %v812_v52 = vmul.f32 %v4899_v16, %v757_v43  ;;  %v7052_v38 = vld [vmem:[#allocation65_spill] sm:$0xff] }
 0x165   : > { %v3605_v19 = vpack.c.bf16 %v3497_v4, %v3495_v49  ;;  %v1037_v40 = vadd.f32 %v5613_v56, %v841_v35  ;;  %v7050_v30 = vrot.slane %v7049_v59, 2  ;;  %v1943_v41 = vadd.f32 %v1817_v50, %v5636_v36  ;;  %v765_v32 = vpop.permute.xlu0 %764  ;;  %v7053_v49 = vld [vmem:[#allocation25_spill] sm:$0xff] }
 0x166   : > { %7048 = vst [vmem:[#allocation19_spill] sm:$0xff] %v5688_v44  ;;  %v1301_v15 = vmax.f32 %v1269_v1, 0.0  ;;  %v1257_v61 = vadd.f32 %v4985_v55, %v1218_v24  ;;  %v844_v8 = vadd.f32 %v812_v52, %v7051_v11  ;;  %v1201_v53 = vmul.f32 %v4970_v22, %v1137_v12  ;;  %v1081_v35 = vpop.permute.xlu1 %1080  ;;  %v7054_v1 = vld [vmem:[#allocation52_spill] sm:$0xff]  ;;  %v7055_v12 = vld [vmem:[#allocation10_spill] sm:$0xff] }
 0x167   : > { %v1819_v48 = vsel %vm1811_vm0, %v1817_v50, %v7050_v30  ;;  %4322 = vmatprep.mubr.bf16.mxu0 %v3605_v19  ;;  %v2061_v56 = vmul.f32 %v5020_v29, %v5587_v7  ;;  %v2107_v57 = vadd.f32 %v5062_v62, %v1943_v41  ;;  %v2159_v42 = vmul.f32 %v5023_v20, %v5587_v7 }
 0x168   : > { %v1944_v21 = vadd.f32 %v1819_v48, %v5654_v13  ;;  %v5707_v36 = vmin.f32 %v1301_v15, 6.0  ;;  %v1289_v18 = vmax.f32 %v1257_v61, 0.0  ;;  %v1040_v0 = vadd.f32 %v1008_v25, %v844_v8  ;;  %v7057_v25 = vld [vmem:[#allocation66_spill] sm:$0xff] }
 0x169   : > { %v1233_v14 = vadd.f32 %v1201_v53, %v1037_v40  ;;  %v814_v5 = vmul.f32 %v4899_v16, %v765_v32  ;;  %v2109_v13 = vadd.f32 %v2061_v56, %v7053_v49  ;;  %v2224_v4 = vrot.slane %v2159_v42, 1  ;;  %v769_v61 = vpop.permute.xlu0 %768  ;;  %v7060_v53 = vld [vmem:[#allocation22_spill] sm:$0xff]  ;;  %v7061_v42 = vld [vmem:[#allocation67_spill] sm:$0xff] }
 0x16a   : > { %v2108_v43 = vadd.f32 %v7052_v38, %v1944_v21  ;;  %v5712_v50 = vmin.f32 %v1289_v18, 6.0  ;;  %v1236_v24 = vadd.f32 %v7054_v1, %v1040_v0  ;;  %v1187_v19 = vmul.f32 %v4970_v22, %v1081_v35 }
 0x16b   : > { %v1272_v52 = vadd.f32 %v4985_v55, %v1233_v14  ;;  %v5718_v59 = vadd.f32 %v814_v5, %v7055_v12  ;;  %v7058_v40 = vrot.slane %v7057_v25, 1  ;;  %v2321_v15 = vadd.f32 %v2224_v4, %v2109_v13  ;;  %v1145_v5 = vpop.permute.xlu1 %1144  ;;  %v7063_v25 = vld [vmem:[#allocation21_spill] sm:$0xff] }
 0x16c   : > { %v1275_v11 = vadd.f32 %v4985_v55, %v1236_v24  ;;  %v1219_v32 = vadd.f32 %v1187_v19, %v7060_v53  ;;  %v2372_v56 = vmul.f32 %v5010_v27, %v5587_v7  ;;  %v7062_v18 = vrot.slane %v7061_v42, 2 }
 0x16d   : > { %7056 = vst [vmem:[#allocation31_spill] sm:$0xff] %v5718_v59  ;;  %v2225_v30 = vsel %vm1566_vm1, %v7058_v40, %v2224_v4  ;;  %v7059_v48 = vmov %v7058_v40  ;;  %v1304_v8 = vmax.f32 %v1272_v52, 0.0  ;;  %v2714_v14 = vmul.f32 %v5036_v39, %v5608_v46 }
 0x16e   : > { %v2319_v41 = vadd.f32 %v7059_v48, %v2107_v57  ;;  %v2320_v21 = vadd.f32 %v2225_v30, %v2108_v43  ;;  %v2812_v57 = vmul.f32 %v5039_v47, %v5608_v46  ;;  %v1307_v35 = vmax.f32 %v1275_v11, 0.0 }
 0x16f   : > { %v5735_v38 = vmin.f32 %v1304_v8, 6.0  ;;  %v1258_v49 = vadd.f32 %v4985_v55, %v1219_v32  ;;  %v3025_v43 = vmul.f32 %v5046_v51, %v5608_v46  ;;  %v2470_v13 = vrot.slane %v2372_v56, 2  ;;  %v7066_v8 = vld [vmem:[#allocation55_spill] sm:$0xff] }
 0x170   : > { %v2595_v0 = vadd.f32 %v7062_v18, %v2319_v41  ;;  %v2877_v1 = vrot.slane %v2812_v57, 1  ;;  %v815_v24 = vmul.f32 %v4899_v16, %v769_v61  ;;  %v5742_v52 = vmin.f32 %v1307_v35, 6.0  ;;  %v7065_v41 = vld [vmem:[#allocation33_spill] sm:$0xff] }
 0x171   : > { %v1290_v19 = vmax.f32 %v1258_v49, 0.0  ;;  %v3123_v12 = vrot.slane %v3025_v43, 2  ;;  %v1039_v40 = vadd.f32 %v7063_v25, %v5580_v2  ;;  %v7064_v30 = vmov %v7062_v18  ;;  %v777_v18 = vpop.permute.xlu0 %776  ;;  %v7069_v2 = vld [vmem:[#allocation56_spill] sm:$0xff]  ;;  %v761_v43 = vpop.permute.xlu1 %760 }
 0x172   : > { %v2760_v4 = vadd.f32 %v5086_v23, %v2595_v0  ;;  %v2471_v48 = vsel %vm1811_vm0, %v7064_v30, %v2470_v13  ;;  %v2473_v11 = vsel %vm1811_vm0, %v2470_v13, %v7065_v41  ;;  %v7067_v53 = vrot.slane %v7066_v8, 1 }
 0x173   : > { %v5756_v0 = vmin.f32 %v1290_v19, 6.0  ;;  %v2596_v57 = vadd.f32 %v2471_v48, %v2320_v21  ;;  %v2597_v35 = vadd.f32 %v2473_v11, %v2321_v15  ;;  %v7070_v49 = vrot.slane %v7069_v2, 2  ;;  %v7073_v19 = vld [vmem:[#allocation54_spill] sm:$0xff] }
 0x174   : > { %v2878_v32 = vsel %vm1566_vm1, %v7067_v53, %v2877_v1  ;;  %v7068_v61 = vmov %v7067_v53  ;;  %v3126_v13 = vsel %vm1811_vm0, %v3123_v12, %v7040_v60  ;;  %v7072_v53 = vld [vmem:[#allocation13_spill] sm:$0xff]  ;;  %v817_v15 = vmul.f32 %v4899_v16, %v777_v18 }
 0x175   : > { %v2972_v56 = vadd.f32 %v7068_v61, %v2760_v4  ;;  %v3124_v42 = vsel %vm1811_vm0, %v7070_v49, %v3123_v12  ;;  %v7071_v25 = vmov %v7070_v49  ;;  %v5766_v59 = vadd.f32 %v815_v24, %v7072_v53  ;;  %v7074_v49 = vld [vmem:[#allocation15_spill] sm:$0xff]  ;;  %v705_v18 = vpop.permute.xlu1 %704 }
 0x176   : > { %v1203_v4 = vmul.f32 %v4970_v22, %v1145_v5  ;;  %v2761_v8 = vadd.f32 %v7073_v19, %v2596_v57  ;;  %v2762_v21 = vadd.f32 %v2714_v14, %v2597_v35  ;;  %v813_v48 = vmul.f32 %v4899_v16, %v761_v43  ;;  %v7076_v57 = vld [vmem:[#allocation11_spill] sm:$0xff] }
 0x177   : > { %v3248_v30 = vadd.f32 %v7071_v25, %v2972_v56  ;;  %v1458_v12 = vmul.f32 %v4977_v26, %v5587_v7  ;;  %v1507_v56 = vmul.f32 %v4967_v10, %v5587_v7  ;;  %v5778_v5 = vadd.f32 %v817_v15, %v7074_v49 }
 0x178   : > { %v1235_v61 = vadd.f32 %v1203_v4, %v1039_v40  ;;  %v2973_v24 = vadd.f32 %v2878_v32, %v2761_v8  ;;  %v2974_v2 = vadd.f32 %v2877_v1, %v2762_v21  ;;  %v5781_v14 = vadd.f32 %v813_v48, %v7076_v57  ;;  %v7077_v8 = vld [vmem:[#allocation37_spill] sm:$0xff] }
 0x179   : > { %v3303_v11 = vadd.f32 %v5520_v3, %v3248_v30  ;;  %7075 = vst [vmem:[#allocation34_spill] sm:$0xff] %v5778_v5  ;;  %v799_v40 = vmul.f32 %v4899_v16, %v705_v18  ;;  %v1574_v25 = vrot.slane %v1507_v56, 1  ;;  %v1722_v4 = vmul.f32 %v4989_v34, %v5587_v7  ;;  %v7085_v5 = vld [vmem:[#allocation12_spill] sm:$0xff] }
 0x17a   : > { %v1274_v43 = vadd.f32 %v4985_v55, %v1235_v61  ;;  %v3249_v30 = vadd.f32 %v3124_v42, %v2973_v24  ;;  %v3250_v53 = vadd.f32 %v3126_v13, %v2974_v2  ;;  %v2064_v1 = vmul.f32 %v5020_v29, %v5608_v46  ;;  %v709_v13 = vpop.permute.xlu1 %708 }
 0x17b   : > { %v3351_v35 = vmax.f32 %v3303_v11, 0.0  ;;  %v5790_v21 = vadd.f32 %v799_v40, %v7077_v8  ;;  %v7078_v15 = vrot.slane %v5469_v33, 1  ;;  %v7079_v11 = vld [vmem:[#allocation68_spill] sm:$0xff]  ;;  %v1671_v7 = vadd.f32 %v1574_v25, %v1458_v12 }
 0x17c   : > { %v1306_v19 = vmax.f32 %v1274_v43, 0.0  ;;  %v3304_v48 = vadd.f32 %v5520_v3, %v3249_v30  ;;  %v3305_v42 = vadd.f32 %v5520_v3, %v3250_v53  ;;  %v800_v2 = vmul.f32 %v4899_v16, %v709_v13  ;;  %v7080_v43 = vld [vmem:[#allocation36_spill] sm:$0xff] }
 0x17d   : > { %v3399_v32 = vmin.f32 %v3351_v35, 6.0  ;;  %v1575_v55 = vsel %vm1566_vm1, %v7078_v15, %v1574_v25  ;;  %v1823_v49 = vrot.slane %v1722_v4, 2  ;;  %v2161_v33 = vmul.f32 %v5023_v20, %v5608_v46  ;;  %v7083_v25 = vld [vmem:[#allocation29_spill] sm:$0xff] }
 0x17e   : > { %v1670_v61 = vadd.f32 %v1575_v55, %v7079_v11  ;;  %v5798_v24 = vmin.f32 %v1306_v19, 6.0  ;;  %v3352_v57 = vmax.f32 %v3304_v48, 0.0  ;;  %v3353_v18 = vmax.f32 %v3305_v42, 0.0  ;;  %v773_v8 = vpop.permute.xlu1 %772 }
 0x17f   : > { %v3498_v56 = vrot.slane %v3399_v32, 7  ;;  %v2375_v35 = vmul.f32 %v5010_v27, %v5608_v46  ;;  %v5806_v40 = vadd.f32 %v800_v2, %v7080_v43  ;;  %v7082_v30 = vrot.slane %v5472_v31, 2  ;;  %v7084_v43 = vld [vmem:[#allocation57_spill] sm:$0xff] }
 0x180   : > { %v1826_v53 = vsel %vm1811_vm0, %v1823_v49, %v7083_v25  ;;  %v2716_v4 = vmul.f32 %v5036_v39, %v5646_v28  ;;  %v3400_v32 = vmin.f32 %v3352_v57, 6.0  ;;  %v3401_v19 = vmin.f32 %v3353_v18, 6.0 }
 0x181   : > { %7081 = vst [vmem:[#allocation4_spill] sm:$0xff] %v5806_v40  ;;  %v1824_v12 = vsel %vm1811_vm0, %v7082_v30, %v1823_v49  ;;  %v1948_v55 = vadd.f32 %v1826_v53, %v1671_v7  ;;  %v816_v48 = vmul.f32 %v4899_v16, %v773_v8  ;;  %v2227_v42 = vrot.slane %v2161_v33, 1 }
 0x182   : > { %v1947_v15 = vadd.f32 %v1824_v12, %v1670_v61  ;;  %v2475_v13 = vrot.slane %v2375_v35, 2  ;;  %v2717_v31 = vmul.f32 %v5036_v39, %v5712_v50  ;;  %v3499_v11 = vrot.slane %v3400_v32, 7 }
 0x183   : > { %v3501_v2 = vrot.slane %v3401_v19, 7  ;;  %v2112_v49 = vadd.f32 %v2064_v1, %v1948_v55  ;;  %v5820_v40 = vadd.f32 %v816_v48, %v7085_v5  ;;  %v7086_v57 = vrot.slane %v5396_v63, 1  ;;  %v7088_v5 = vld [vmem:[#allocation78_spill] sm:$0xff] }
 0x184   : > { %v2111_v30 = vadd.f32 %v7084_v43, %v1947_v15  ;;  %v7087_v7 = vrot.slane %v5401_v45, 2  ;;  %v2478_v33 = vsel %vm1811_vm0, %v2475_v13, %v7065_v41  ;;  %v3500_v35 = vsel %vm3492_vm2, %v3498_v56, %v3499_v11 }
 0x185   : > { %v2228_v61 = vsel %vm1566_vm1, %v7086_v57, %v2227_v42  ;;  %v3502_v12 = vsel %vm3492_vm2, %v3499_v11, %v3501_v2  ;;  %v2324_v1 = vadd.f32 %v2227_v42, %v2112_v49  ;;  %v2763_v19 = vadd.f32 %v5086_v23, %v7088_v5 }
 0x186   : > { %v2476_v18 = vsel %vm1811_vm0, %v7087_v7, %v2475_v13  ;;  %v2323_v53 = vadd.f32 %v2228_v61, %v2111_v30  ;;  %v3606_v32 = vpack.c.bf16 %v3502_v12, %v3500_v35  ;;  %v2813_v63 = vmul.f32 %v5039_v47, %v5646_v28 }
 0x187   : > { %v2814_v45 = vmul.f32 %v5039_v47, %v5712_v50  ;;  %v2600_v15 = vadd.f32 %v2478_v33, %v2324_v1  ;;  %v3027_v55 = vmul.f32 %v5046_v51, %v5646_v28  ;;  %v3028_v56 = vmul.f32 %v5046_v51, %v5712_v50 }
 0x188   : > { %v2599_v8 = vadd.f32 %v2476_v18, %v2323_v53  ;;  %4323 = vmatmul.mubr.bf16.vlgmr.msra.gmra.mxu0 %v3606_v32  ;;  %v2879_v48 = vrot.slane %v2813_v63, 1  ;;  %v1476_v13 = vmul.f32 %v4977_v26, %v5676_v17  ;;  %v1519_v11 = vmul.f32 %v4967_v10, %v5676_v17  ;;  %v7089_v32 = vld [vmem:[#allocation30_spill] sm:$0xff] }
 0x189   : > { %v2880_v42 = vrot.slane %v2814_v45, 1  ;;  %v2765_v43 = vadd.f32 %v2717_v31, %v2600_v15  ;;  %v3127_v30 = vrot.slane %v3027_v55, 2  ;;  %v3128_v49 = vrot.slane %v3028_v56, 2 }
 0x18a   : > { %v2764_v2 = vadd.f32 %v2716_v4, %v2599_v8  ;;  %v2975_v61 = vadd.f32 %v2879_v48, %v2763_v19  ;;  %v1592_v7 = vrot.slane %v1519_v11, 1  ;;  %v1740_v18 = vmul.f32 %v4989_v34, %v5676_v17  ;;  %v7091_v8 = vld [vmem:[#allocation5_spill] sm:$0xff] }
 0x18b   : > { %v2881_v57 = vsel %vm1566_vm1, %v2879_v48, %v2880_v42  ;;  %v2977_v35 = vadd.f32 %v2880_v42, %v2765_v43  ;;  %v3129_v12 = vsel %vm1811_vm0, %v3127_v30, %v3128_v49  ;;  %v3131_v53 = vsel %vm1811_vm0, %v3128_v49, %v7040_v60  ;;  %v7092_v48 = vld [vmem:[#allocation40_spill] sm:$0xff]  ;;  %v7114_v17 = vld [vmem:[#allocation73_spill] sm:$0xff] }
 0x18c   : > { %v2976_v33 = vadd.f32 %v2881_v57, %v2764_v2  ;;  %v3251_v1 = vadd.f32 %v3127_v30, %v2975_v61  ;;  %v7090_v4 = vrot.slane %v7089_v32, 1  ;;  %v1689_v5 = vadd.f32 %v1592_v7, %v1476_v13 }
 0x18d   : > { %v1853_v63 = vrot.slane %v1740_v18, 2  ;;  %v3253_v19 = vadd.f32 %v3131_v53, %v2977_v35  ;;  %v2082_v55 = vmul.f32 %v5020_v29, %v5688_v44  ;;  %v7093_v42 = vrot.slane %v7092_v48, 2  ;;  %v7094_v53 = vld [vmem:[#allocation26_spill] sm:$0xff] }
 0x18e   : > { %v1593_v31 = vsel %vm1566_vm1, %v7090_v4, %v1592_v7  ;;  %v3252_v45 = vadd.f32 %v3129_v12, %v2976_v33  ;;  %v3306_v56 = vadd.f32 %v5520_v3, %v3251_v1  ;;  %v2173_v13 = vmul.f32 %v5023_v20, %v5688_v44 }
 0x18f   : > { %v1688_v15 = vadd.f32 %v1593_v31, %v7091_v8  ;;  %v1854_v11 = vsel %vm1811_vm0, %v7093_v42, %v1853_v63  ;;  %v1856_v2 = vsel %vm1811_vm0, %v1853_v63, %v7083_v25  ;;  %v3308_v30 = vadd.f32 %v5520_v3, %v3253_v19  ;;  %v7095_v31 = vld [vmem:[#allocation45_spill] sm:$0xff]  ;;  %v897_v42 = vpop.permute.xlu1 %896 }
 0x190   : > { %v3307_v43 = vadd.f32 %v5520_v3, %v3252_v45  ;;  %v1966_v57 = vadd.f32 %v1856_v2, %v1689_v5  ;;  %v3354_v61 = vmax.f32 %v3306_v56, 0.0  ;;  %v2245_v7 = vrot.slane %v2173_v13, 1  ;;  %v7097_v2 = vld [vmem:[#allocation48_spill] sm:$0xff] }
 0x191   : > { %v1965_v49 = vadd.f32 %v1854_v11, %v1688_v15  ;;  %v2393_v18 = vmul.f32 %v5010_v27, %v5688_v44  ;;  %v2735_v33 = vmul.f32 %v5036_v39, %v5707_v36  ;;  %v3356_v12 = vmax.f32 %v3308_v30, 0.0 }
 0x192   : > { %v3355_v35 = vmax.f32 %v3307_v43, 0.0  ;;  %v2130_v32 = vadd.f32 %v2082_v55, %v1966_v57  ;;  %v3402_v4 = vmin.f32 %v3354_v61, 6.0  ;;  %v7096_v63 = vrot.slane %v7095_v31, 1 }
 0x193   : > { %v2129_v1 = vadd.f32 %v7094_v53, %v1965_v49  ;;  %v2505_v19 = vrot.slane %v2393_v18, 2  ;;  %v2826_v5 = vmul.f32 %v5039_v47, %v5707_v36  ;;  %v3404_v15 = vmin.f32 %v3356_v12, 6.0  ;;  %v7099_v53 = vld [vmem:[#allocation71_spill] sm:$0xff] }
 0x194   : > { %v2246_v45 = vsel %vm1566_vm1, %v7096_v63, %v2245_v7  ;;  %v3403_v8 = vmin.f32 %v3355_v35, 6.0  ;;  %v2342_v48 = vadd.f32 %v2245_v7, %v2130_v32  ;;  %v3503_v11 = vrot.slane %v3402_v4, 7  ;;  %v7101_v12 = vld [vmem:[#allocation79_spill] sm:$0xff] }
 0x195   : > { %v2341_v56 = vadd.f32 %v2246_v45, %v2129_v1  ;;  %v7098_v13 = vrot.slane %v7097_v2, 2  ;;  %v2508_v55 = vsel %vm1811_vm0, %v2505_v19, %v7065_v41  ;;  %v2898_v30 = vrot.slane %v2826_v5, 1  ;;  %v7102_v45 = vld [vmem:[#allocation70_spill] sm:$0xff] }
 0x196   : > { %v3504_v49 = vrot.slane %v3403_v8, 7  ;;  %v3506_v57 = vrot.slane %v3404_v15, 7  ;;  %v2618_v18 = vadd.f32 %v2508_v55, %v2342_v48  ;;  %v7100_v31 = vrot.slane %v7099_v53, 1 }
 0x197   : > { %v2506_v43 = vsel %vm1811_vm0, %v7098_v13, %v2505_v19  ;;  %v3046_v7 = vmul.f32 %v5046_v51, %v5707_v36  ;;  %v3533_v1 = vrot.slane %v7101_v12, 7  ;;  %v994_v32 = vmul.f32 %v4916_v9, %v897_v42 }
 0x198   : > { %v2617_v61 = vadd.f32 %v2506_v43, %v2341_v56  ;;  %v2899_v35 = vsel %vm1566_vm1, %v7100_v31, %v2898_v30  ;;  %v3505_v4 = vsel %vm3492_vm2, %v3503_v11, %v3504_v49  ;;  %v3507_v63 = vsel %vm3492_vm2, %v3504_v49, %v3506_v57  ;;  %v7103_v11 = vld [vmem:[#allocation72_spill] sm:$0xff] }
 0x199   : > { %v2783_v5 = vadd.f32 %v2735_v33, %v2618_v18  ;;  %v3607_v8 = vpack.c.bf16 %v3507_v63, %v3505_v4  ;;  %v3158_v15 = vrot.slane %v3046_v7, 2  ;;  %v1026_v56 = vadd.f32 %v994_v32, %v5617_v37  ;;  %v7105_v37 = vld [vmem:[#allocation53_spill] sm:$0xff]  ;;  %v7106_v4 = vld [vmem:[#allocation32_spill] sm:$0xff] }
 0x19a   : > { %v2782_v19 = vadd.f32 %v7102_v45, %v2617_v61  ;;  %v1479_v48 = vmul.f32 %v4977_v26, %v5688_v44  ;;  %v1521_v43 = vmul.f32 %v4967_v10, %v5688_v44  ;;  %v1743_v42 = vmul.f32 %v4989_v34, %v5688_v44 }
 0x19b   : > { %v2995_v13 = vadd.f32 %v2898_v30, %v2783_v5  ;;  %4326 = vmatprep.mubr.bf16.mxu0 %v3607_v8  ;;  %v7104_v55 = vrot.slane %v7103_v11, 2  ;;  %v3161_v49 = vsel %vm1811_vm0, %v3158_v15, %v7040_v60  ;;  %v1222_v57 = vadd.f32 %v7105_v37, %v1026_v56  ;;  %v7107_v5 = vld [vmem:[#allocation46_spill] sm:$0xff] }
 0x19c   : > { %v2994_v2 = vadd.f32 %v2899_v35, %v2782_v19  ;;  %v2085_v61 = vmul.f32 %v5020_v29, %v5707_v36  ;;  %v1595_v53 = vrot.slane %v1521_v43, 1  ;;  %v1858_v31 = vrot.slane %v1743_v42, 2  ;;  %v5911_v35 = vld [vmem:[%s6826_s2] ss:$0 sm:$0xff]  ;;  %v7110_v42 = vld [vmem:[#allocation50_spill] sm:$0xff] }
 0x19d   : > { %v3159_v33 = vsel %vm1811_vm0, %v7104_v55, %v3158_v15  ;;  %v3271_v18 = vadd.f32 %v3161_v49, %v2995_v13  ;;  %v1261_v7 = vadd.f32 %v5911_v35, %v1222_v57  ;;  %v2175_v12 = vmul.f32 %v5023_v20, %v5707_v36  ;;  %v7109_v13 = vld [vmem:[#allocation27_spill] sm:$0xff] }
 0x19e   : > { %v3270_v30 = vadd.f32 %v3159_v33, %v2994_v2  ;;  %v2396_v32 = vmul.f32 %v5010_v27, %v5707_v36  ;;  %v2828_v63 = vmul.f32 %v5039_v47, %v7106_v4  ;;  %v7108_v8 = vrot.slane %v7107_v5, 1 }
 0x19f   : > { %v3326_v19 = vadd.f32 %v5520_v3, %v3271_v18  ;;  %v1692_v56 = vadd.f32 %v1595_v53, %v1479_v48  ;;  %v1293_v2 = vmax.f32 %v1261_v7, 0.0  ;;  %v7111_v11 = vrot.slane %v7110_v42, 2 }
 0x1a0   : > { %v3325_v45 = vadd.f32 %v5520_v3, %v3270_v30  ;;  %v1596_v15 = vsel %vm1566_vm1, %v7108_v8, %v1595_v53  ;;  %v1861_v33 = vsel %vm1811_vm0, %v1858_v31, %v7083_v25  ;;  %v2248_v30 = vrot.slane %v2175_v12, 1 }
 0x1a1   : > { %v1691_v43 = vadd.f32 %v1596_v15, %v7109_v13  ;;  %v1859_v55 = vsel %vm1811_vm0, %v7111_v11, %v1858_v31  ;;  %v3374_v37 = vmax.f32 %v3326_v19, 0.0  ;;  %v1969_v57 = vadd.f32 %v1861_v33, %v1692_v56  ;;  %v7112_v15 = vld [vmem:[#allocation74_spill] sm:$0xff]  ;;  %v957_v11 = vpop.permute.xlu1 %956  ;;  %v7115_v31 = vld [vmem:[#allocation75_spill] sm:$0xff]  ;;  %v7117_v56 = vld [vmem:[#allocation61_spill] sm:$0xff] }
 0x1a2   : > { %v3373_v49 = vmax.f32 %v3325_v45, 0.0  ;;  %v5931_v18 = vmin.f32 %v1293_v2, 6.0  ;;  %v2510_v44 = vrot.slane %v2396_v32, 2  ;;  %v2901_v8 = vrot.slane %v2828_v63, 1 }
 0x1a3   : > { %v1968_v5 = vadd.f32 %v1859_v55, %v1691_v43  ;;  %v3422_v53 = vmin.f32 %v3374_v37, 6.0  ;;  %v2133_v7 = vadd.f32 %v2085_v61, %v1969_v57  ;;  %v7113_v13 = vrot.slane %v7112_v15, 1  ;;  %v7119_v55 = vld [vmem:[#allocation77_spill] sm:$0xff] }
 0x1a4   : > { %v3421_v48 = vmin.f32 %v3373_v49, 6.0  ;;  %v7116_v45 = vrot.slane %v7115_v31, 2  ;;  %v2513_v12 = vsel %vm1811_vm0, %v2510_v44, %v7065_v41  ;;  %v7118_v32 = vrot.slane %v7117_v56, 1 }
 0x1a5   : > { %v2249_v42 = vsel %vm1566_vm1, %v7113_v13, %v2248_v30  ;;  %v2132_v16 = vadd.f32 %v7114_v17, %v1968_v5  ;;  %v3536_v61 = vrot.slane %v3422_v53, 7  ;;  %v2345_v43 = vadd.f32 %v2248_v30, %v2133_v7  ;;  %v7121_v53 = vld [vmem:[#allocation62_spill] sm:$0xff] }
 0x1a6   : > { %v2511_v19 = vsel %vm1811_vm0, %v7116_v45, %v2510_v44  ;;  %v2902_v63 = vsel %vm1566_vm1, %v7118_v32, %v2901_v8  ;;  %v3534_v2 = vrot.slane %v3421_v48, 7  ;;  %v7120_v33 = vmov %v7118_v32 }
 0x1a7   : > { %v2996_v49 = vadd.f32 %v7120_v33, %v7119_v55  ;;  %v2344_v37 = vadd.f32 %v2249_v42, %v2132_v16  ;;  %v3049_v17 = vmul.f32 %v5046_v51, %v7106_v4  ;;  %v1009_v57 = vmul.f32 %v4916_v9, %v957_v11  ;;  %v7123_v42 = vld [vmem:[#allocation80_spill] sm:$0xff] }
 0x1a8   : > { %v1461_v44 = vmul.f32 %v4977_v26, %v5608_v46  ;;  %v3535_v5 = vsel %vm3492_vm2, %v3533_v1, %v3534_v2  ;;  %v3537_v15 = vsel %vm3492_vm2, %v3534_v2, %v3536_v61  ;;  %v2621_v48 = vadd.f32 %v2513_v12, %v2345_v43  ;;  %v7124_v1 = vld [vmem:[#allocation6_spill] sm:$0xff]  ;;  %v7125_v12 = vld [vmem:[#allocation60_spill] sm:$0xff] }
 0x1a9   : > { %v7122_v30 = vrot.slane %v7121_v53, 2  ;;  %v3613_v13 = vpack.c.bf16 %v3537_v15, %v3535_v5  ;;  %v2620_v31 = vadd.f32 %v2511_v19, %v2344_v37  ;;  %v3163_v45 = vrot.slane %v3049_v17, 2 }
 0x1aa   : > { %v5958_v16 = vadd.f32 %v1009_v57, %v5781_v14  ;;  %v2786_v56 = vadd.f32 %v7123_v42, %v2621_v48  ;;  %v1509_v32 = vmul.f32 %v4967_v10, %v5608_v46  ;;  %v1724_v2 = vmul.f32 %v4989_v34, %v7124_v1  ;;  %v7130_v1 = vld [vmem:[#allocation76_spill] sm:$0xff] }
 0x1ab   : > { %v3272_v7 = vadd.f32 %v7122_v30, %v2996_v49  ;;  %4338 = vmatprep.mubr.bf16.mxu1 %v3613_v13  ;;  %v2785_v61 = vadd.f32 %v7125_v12, %v2620_v31  ;;  %v7126_v43 = vmov %v7122_v30  ;;  %v3166_v14 = vsel %vm1811_vm0, %v3163_v45, %v7040_v60 }
 0x1ac   : > { %v3164_v19 = vsel %vm1811_vm0, %v7126_v43, %v3163_v45  ;;  %v1725_v55 = vmul.f32 %v4989_v34, %v5608_v46  ;;  %v2998_v33 = vadd.f32 %v2901_v8, %v2786_v56  ;;  %v1577_v37 = vrot.slane %v1509_v32, 1  ;;  %v7129_v8 = vld [vmem:[#allocation59_spill] sm:$0xff] }
 0x1ad   : > { %v3327_v11 = vadd.f32 %v5520_v3, %v3272_v7  ;;  %v1827_v17 = vrot.slane %v1724_v2, 2  ;;  %v2997_v57 = vadd.f32 %v2902_v63, %v2785_v61  ;;  %v2066_v15 = vmul.f32 %v5020_v29, %v5646_v28  ;;  %v7127_v7 = vld [vmem:[#allocation64_spill] sm:$0xff] }
 0x1ae   : > { %v1828_v5 = vrot.slane %v1725_v55, 2  ;;  %v2067_v48 = vmul.f32 %v5020_v29, %v5712_v50  ;;  %v3274_v53 = vadd.f32 %v3166_v14, %v2998_v33  ;;  %v7128_v13 = vrot.slane %v7127_v7, 1 }
 0x1af   : > { %v3375_v49 = vmax.f32 %v3327_v11, 0.0  ;;  %v1674_v45 = vadd.f32 %v1577_v37, %v1461_v44  ;;  %v3273_v46 = vadd.f32 %v3164_v19, %v2997_v57  ;;  %v1949_v2 = vadd.f32 %v1827_v17, %v7130_v1 }
 0x1b0   : > { %v1578_v31 = vsel %vm1566_vm1, %v7128_v13, %v1577_v37  ;;  %v1829_v56 = vsel %vm1811_vm0, %v1827_v17, %v1828_v5  ;;  %v1831_v63 = vsel %vm1811_vm0, %v1828_v5, %v7083_v25  ;;  %v3329_v11 = vadd.f32 %v5520_v3, %v3274_v53 }
 0x1b1   : > { %v3423_v30 = vmin.f32 %v3375_v49, 6.0  ;;  %v1673_v42 = vadd.f32 %v1578_v31, %v7129_v8  ;;  %v1951_v12 = vadd.f32 %v1831_v63, %v1674_v45  ;;  %v3328_v61 = vadd.f32 %v5520_v3, %v3273_v46 }
 0x1b2   : > { %v2162_v44 = vmul.f32 %v5023_v20, %v5646_v28  ;;  %v2163_v19 = vmul.f32 %v5023_v20, %v5712_v50  ;;  %v3377_v14 = vmax.f32 %v3329_v11, 0.0  ;;  %v2113_v55 = vadd.f32 %v5062_v62, %v1949_v2 }
 0x1b3   : > { %v3538_v32 = vrot.slane %v3423_v30, 7  ;;  %v1950_v43 = vadd.f32 %v1829_v56, %v1673_v42  ;;  %v2115_v33 = vadd.f32 %v2067_v48, %v1951_v12  ;;  %v2377_v49 = vmul.f32 %v5010_v27, %v5646_v28 }
 0x1b4   : > { %v3376_v37 = vmax.f32 %v3328_v61, 0.0  ;;  %v2229_v17 = vrot.slane %v2162_v44, 1  ;;  %v2230_v5 = vrot.slane %v2163_v19, 1  ;;  %v3425_v53 = vmin.f32 %v3377_v14, 6.0 }
 0x1b5   : > { %v2114_v57 = vadd.f32 %v2066_v15, %v1950_v43  ;;  %v2378_v3 = vmul.f32 %v5010_v27, %v5712_v50  ;;  %v2479_v30 = vrot.slane %v2377_v49, 2  ;;  %v2719_v7 = vmul.f32 %v5036_v39, %v5756_v0 }
 0x1b6   : > { %v3424_v13 = vmin.f32 %v3376_v37, 6.0  ;;  %v2231_v31 = vsel %vm1566_vm1, %v2229_v17, %v2230_v5  ;;  %v2325_v45 = vadd.f32 %v2229_v17, %v2113_v55  ;;  %v2327_v48 = vadd.f32 %v2230_v5, %v2115_v33  ;;  %v6015_v33 = vpop.permute.xlu1 %900 }
 0x1b7   : > { %v3541_v46 = vrot.slane %v3425_v53, 7  ;;  %v2326_v8 = vadd.f32 %v2231_v31, %v2114_v57  ;;  %v2480_v42 = vrot.slane %v2378_v3, 2  ;;  %v2720_v15 = vmul.f32 %v5036_v39, %v5684_v58 }
 0x1b8   : > { %v3539_v56 = vrot.slane %v3424_v13, 7  ;;  %v2601_v63 = vadd.f32 %v2479_v30, %v2325_v45  ;;  %v2815_v11 = vmul.f32 %v5039_v47, %v5756_v0  ;;  %v2816_v1 = vmul.f32 %v5039_v47, %v5684_v58 }
 0x1b9   : > { %v2481_v2 = vsel %vm1811_vm0, %v2479_v30, %v2480_v42  ;;  %v2483_v12 = vsel %vm1811_vm0, %v2480_v42, %v7065_v41  ;;  %v3030_v61 = vmul.f32 %v5046_v51, %v5756_v0  ;;  %v3031_v43 = vmul.f32 %v5046_v51, %v5684_v58 }
 0x1ba   : > { %v3540_v44 = vsel %vm3492_vm2, %v3538_v32, %v3539_v56  ;;  %v3542_v19 = vsel %vm3492_vm2, %v3539_v56, %v3541_v46  ;;  %v2602_v14 = vadd.f32 %v2481_v2, %v2326_v8  ;;  %v2603_v55 = vadd.f32 %v2483_v12, %v2327_v48  ;;  %v7131_v32 = vld [vmem:[#allocation69_spill] sm:$0xff] }
 0x1bb   : > { %v3614_v49 = vpack.c.bf16 %v3542_v19, %v3540_v44  ;;  %v2766_v37 = vadd.f32 %v5086_v23, %v2601_v63  ;;  %v2882_v57 = vrot.slane %v2815_v11, 1  ;;  %v2883_v17 = vrot.slane %v2816_v1, 1  ;;  %v6036_v44 = vpop.permute.xlu1 %964  ;;  %v6041_v19 = vld [vmem:[%s6828_s4] ss:$0 sm:$0xff] }
 0x1bc   : > { %v2767_v5 = vadd.f32 %v2719_v7, %v2602_v14  ;;  %v2768_v53 = vadd.f32 %v2720_v15, %v2603_v55  ;;  %v3132_v3 = vrot.slane %v3030_v61, 2  ;;  %v3133_v30 = vrot.slane %v3031_v43, 2  ;;  %v7132_v61 = vld [vmem:[#allocation58_spill] sm:$0xff] }
 0x1bd   : > { %4339 = vmatmul.mubr.bf16.vlgmr.msra.gmra.mxu1 %v3614_v49  ;;  %v2884_v13 = vsel %vm1566_vm1, %v2882_v57, %v2883_v17  ;;  %v2978_v31 = vadd.f32 %v2882_v57, %v2766_v37  ;;  %v1481_v45 = vmul.f32 %v4977_v26, %v7131_v32  ;;  %v1482_v48 = vmul.f32 %v4977_v26, %v5707_v36 }
 0x1be   : > { %v2979_v46 = vadd.f32 %v2884_v13, %v2767_v5  ;;  %v2980_v8 = vadd.f32 %v2883_v17, %v2768_v53  ;;  %v3134_v42 = vsel %vm1811_vm0, %v3132_v3, %v3133_v30  ;;  %v3136_v7 = vsel %vm1811_vm0, %v3133_v30, %v7040_v60 }
 0x1bf   : > { %v3254_v15 = vadd.f32 %v3132_v3, %v2978_v31  ;;  %v1522_v56 = vmul.f32 %v4967_v10, %v7131_v32  ;;  %v1523_v63 = vmul.f32 %v4967_v10, %v5707_v36  ;;  %v1745_v11 = vmul.f32 %v4989_v34, %v7131_v32 }
 0x1c0   : > { %v3255_v1 = vadd.f32 %v3134_v42, %v2979_v46  ;;  %v3256_v2 = vadd.f32 %v3136_v7, %v2980_v8  ;;  %v1746_v12 = vmul.f32 %v4989_v34, %v5707_v36  ;;  %v2087_v43 = vmul.f32 %v5020_v29, %v7132_v61 }
 0x1c1   : > { %v3309_v14 = vadd.f32 %v6041_v19, %v3254_v15  ;;  %v1597_v55 = vrot.slane %v1522_v56, 1  ;;  %v1598_v49 = vrot.slane %v1523_v63, 1  ;;  %v1862_v37 = vrot.slane %v1745_v11, 2 }
 0x1c2   : > { %v3310_v57 = vadd.f32 %v6041_v19, %v3255_v1  ;;  %v3311_v17 = vadd.f32 %v6041_v19, %v3256_v2  ;;  %v1863_v36 = vrot.slane %v1746_v12, 2  ;;  %v2088_v5 = vmul.f32 %v5020_v29, %v7106_v4  ;;  %v6055_v12 = vpop.permute.xlu1 %1088 }
 0x1c3   : > { %v3357_v53 = vmax.f32 %v3309_v14, 0.0  ;;  %v1599_v3 = vsel %vm1566_vm1, %v1597_v55, %v1598_v49  ;;  %v1693_v30 = vadd.f32 %v1597_v55, %v4996_v54  ;;  %v1695_v13 = vadd.f32 %v1598_v49, %v1482_v48 }
 0x1c4   : > { %v3358_v31 = vmax.f32 %v3310_v57, 0.0  ;;  %v3359_v32 = vmax.f32 %v3311_v17, 0.0  ;;  %v1694_v46 = vadd.f32 %v1599_v3, %v1481_v45  ;;  %v1864_v8 = vsel %vm1811_vm0, %v1862_v37, %v1863_v36 }
 0x1c5   : > { %v3405_v42 = vmin.f32 %v3357_v53, 6.0  ;;  %v1866_v7 = vsel %vm1811_vm0, %v1863_v36, %v7083_v25  ;;  %v1970_v15 = vadd.f32 %v1862_v37, %v1693_v30  ;;  %v2176_v56 = vmul.f32 %v5023_v20, %v7132_v61 }
 0x1c6   : > { %v3406_v63 = vmin.f32 %v3358_v31, 6.0  ;;  %v3407_v11 = vmin.f32 %v3359_v32, 6.0  ;;  %v1971_v1 = vadd.f32 %v1864_v8, %v1694_v46  ;;  %v1972_v2 = vadd.f32 %v1866_v7, %v1695_v13 }
 0x1c7   : > { %v3508_v48 = vrot.slane %v3405_v42, 7  ;;  %v2134_v14 = vadd.f32 %v5062_v62, %v1970_v15  ;;  %v2177_v45 = vmul.f32 %v5023_v20, %v7106_v4  ;;  %v2250_v55 = vrot.slane %v2176_v56, 1 }
 0x1c8   : > { %v3509_v49 = vrot.slane %v3406_v63, 7  ;;  %v3511_v57 = vrot.slane %v3407_v11, 7  ;;  %v2135_v17 = vadd.f32 %v2087_v43, %v1971_v1  ;;  %v2136_v37 = vadd.f32 %v2088_v5, %v1972_v2  ;;  %v6075_v11 = vpop.permute.xlu1 %1152 }
 0x1c9   : > { %v2251_v36 = vrot.slane %v2177_v45, 1  ;;  %v2346_v53 = vadd.f32 %v2250_v55, %v2134_v14  ;;  %v2398_v3 = vmul.f32 %v5010_v27, %v7132_v61  ;;  %v2399_v30 = vmul.f32 %v5010_v27, %v7106_v4 }
 0x1ca   : > { %v3510_v13 = vsel %vm3492_vm2, %v3508_v48, %v3509_v49  ;;  %v3512_v31 = vsel %vm3492_vm2, %v3509_v49, %v3511_v57  ;;  %v2740_v32 = vmul.f32 %v5036_v39, %v5735_v38  ;;  %v2741_v46 = vmul.f32 %v5036_v39, %v5673_v6 }
 0x1cb   : > { %v3608_v43 = vpack.c.bf16 %v3512_v31, %v3510_v13  ;;  %v2252_v5 = vsel %vm1566_vm1, %v2250_v55, %v2251_v36  ;;  %v2348_v8 = vadd.f32 %v2251_v36, %v2136_v37  ;;  %v2514_v42 = vrot.slane %v2398_v3, 2 }
 0x1cc   : > { %v2347_v7 = vadd.f32 %v2252_v5, %v2135_v17  ;;  %v2515_v15 = vrot.slane %v2399_v30, 2  ;;  %v2829_v56 = vmul.f32 %v5039_v47, %v5735_v38  ;;  %v2830_v63 = vmul.f32 %v5039_v47, %v5673_v6 }
 0x1cd   : > { %4327 = vmatmul.mubr.bf16.gmra.mxu0 %v3608_v43  ;;  %v2622_v1 = vadd.f32 %v2514_v42, %v2346_v53  ;;  %v3051_v2 = vmul.f32 %v5046_v51, %v5735_v38  ;;  %v3052_v48 = vmul.f32 %v5046_v51, %v5673_v6  ;;  %v995_v14 = vmul.f32 %v4916_v9, %v6015_v33 }
 0x1ce   : > { %v2516_v45 = vsel %vm1811_vm0, %v2514_v42, %v2515_v15  ;;  %v2518_v55 = vsel %vm1811_vm0, %v2515_v15, %v7065_v41  ;;  %v2903_v49 = vrot.slane %v2829_v56, 1  ;;  %v2904_v57 = vrot.slane %v2830_v63, 1  ;;  %v7133_v15 = vld [vmem:[#allocation7_spill] sm:$0xff] }
 0x1cf   : > { %v2623_v17 = vadd.f32 %v2516_v45, %v2347_v7  ;;  %v2624_v37 = vadd.f32 %v2518_v55, %v2348_v8  ;;  %v2787_v36 = vadd.f32 %v5086_v23, %v2622_v1  ;;  %v3167_v53 = vrot.slane %v3051_v2, 2 }
 0x1d0   : > { %v2905_v3 = vsel %vm1566_vm1, %v2903_v49, %v2904_v57  ;;  %v3168_v30 = vrot.slane %v3052_v48, 2  ;;  %v1027_v13 = vadd.f32 %v995_v14, %v5790_v21  ;;  %v1484_v33 = vmul.f32 %v4977_v26, %v7132_v61  ;;  %v6099_v21 = vpop.permute.xlu1 %1156 }
 0x1d1   : > { %v2788_v31 = vadd.f32 %v2740_v32, %v2623_v17  ;;  %v2789_v43 = vadd.f32 %v2741_v46, %v2624_v37  ;;  %v2999_v5 = vadd.f32 %v2903_v49, %v2787_v36  ;;  %v1485_v42 = vmul.f32 %v4977_v26, %v7106_v4 }
 0x1d2   : > { %v3169_v7 = vsel %vm1811_vm0, %v3167_v53, %v3168_v30  ;;  %v3171_v8 = vsel %vm1811_vm0, %v3168_v30, %v7040_v60  ;;  %v1223_v56 = vadd.f32 %v7133_v15, %v1027_v13  ;;  %v1524_v63 = vmul.f32 %v4967_v10, %v7132_v61 }
 0x1d3   : > { %v3000_v1 = vadd.f32 %v2905_v3, %v2788_v31  ;;  %v3001_v2 = vadd.f32 %v2904_v57, %v2789_v43  ;;  %v3275_v32 = vadd.f32 %v3167_v53, %v2999_v5  ;;  %v1525_v46 = vmul.f32 %v4967_v10, %v7106_v4 }
 0x1d4   : > { %v1262_v48 = vadd.f32 %v5911_v35, %v1223_v56  ;;  %v1600_v14 = vrot.slane %v1524_v63, 1  ;;  %v1748_v45 = vmul.f32 %v4989_v34, %v7132_v61  ;;  %v1749_v55 = vmul.f32 %v4989_v34, %v7106_v4  ;;  %v6116_v15 = vpop.permute.xlu1 %1100 }
 0x1d5   : > { %v3276_v49 = vadd.f32 %v3169_v7, %v3000_v1  ;;  %v3277_v17 = vadd.f32 %v3171_v8, %v3001_v2  ;;  %v3330_v37 = vadd.f32 %v6041_v19, %v3275_v32  ;;  %v1601_v36 = vrot.slane %v1525_v46, 1 }
 0x1d6   : > { %v1294_v3 = vmax.f32 %v1262_v48, 0.0  ;;  %v1696_v57 = vadd.f32 %v1600_v14, %v4996_v54  ;;  %v1867_v53 = vrot.slane %v1748_v45, 2  ;;  %v1868_v30 = vrot.slane %v1749_v55, 2 }
 0x1d7   : > { %v3331_v13 = vadd.f32 %v6041_v19, %v3276_v49  ;;  %v3332_v31 = vadd.f32 %v6041_v19, %v3277_v17  ;;  %v3378_v43 = vmax.f32 %v3330_v37, 0.0  ;;  %v1602_v61 = vsel %vm1566_vm1, %v1600_v14, %v1601_v36 }
 0x1d8   : > { %v6113_v5 = vmin.f32 %v1294_v3, 6.0  ;;  %v1697_v4 = vadd.f32 %v1602_v61, %v1484_v33  ;;  %v1698_v7 = vadd.f32 %v1601_v36, %v1485_v42  ;;  %v1869_v8 = vsel %vm1811_vm0, %v1867_v53, %v1868_v30 }
 0x1d9   : > { %v3379_v56 = vmax.f32 %v3331_v13, 0.0  ;;  %v3380_v63 = vmax.f32 %v3332_v31, 0.0  ;;  %v3426_v1 = vmin.f32 %v3378_v43, 6.0  ;;  %v1871_v2 = vsel %vm1811_vm0, %v1868_v30, %v7083_v25 }
 0x1da   : > { %v1973_v32 = vadd.f32 %v1867_v53, %v1696_v57  ;;  %v1974_v46 = vadd.f32 %v1869_v8, %v1697_v4  ;;  %v1975_v48 = vadd.f32 %v1871_v2, %v1698_v7  ;;  %v2090_v14 = vmul.f32 %v5020_v29, %v5735_v38  ;;  %v6135_v4 = vpop.permute.xlu1 %1164 }
 0x1db   : > { %v3427_v45 = vmin.f32 %v3379_v56, 6.0  ;;  %v3428_v55 = vmin.f32 %v3380_v63, 6.0  ;;  %v3543_v33 = vrot.slane %v3426_v1, 7  ;;  %v2091_v42 = vmul.f32 %v5020_v29, %v5673_v6 }
 0x1dc   : > { %v2137_v49 = vadd.f32 %v5062_v62, %v1973_v32  ;;  %v2138_v17 = vadd.f32 %v2090_v14, %v1974_v46  ;;  %v2178_v37 = vmul.f32 %v5023_v20, %v5735_v38  ;;  %v2179_v36 = vmul.f32 %v5023_v20, %v5673_v6 }
 0x1dd   : > { %v3544_v3 = vrot.slane %v3427_v45, 7  ;;  %v3546_v57 = vrot.slane %v3428_v55, 7  ;;  %v2139_v53 = vadd.f32 %v2091_v42, %v1975_v48  ;;  %v2401_v30 = vmul.f32 %v5010_v27, %v5735_v38 }
 0x1de   : > { %v2253_v13 = vrot.slane %v2178_v37, 1  ;;  %v2254_v31 = vrot.slane %v2179_v36, 1  ;;  %v2402_v43 = vmul.f32 %v5010_v27, %v5673_v6  ;;  %v2743_v61 = vmul.f32 %v5036_v39, %v5798_v24 }
 0x1df   : > { %v3545_v7 = vsel %vm3492_vm2, %v3543_v33, %v3544_v3  ;;  %v3547_v8 = vsel %vm3492_vm2, %v3544_v3, %v3546_v57  ;;  %v2519_v56 = vrot.slane %v2401_v30, 2  ;;  %v2744_v63 = vmul.f32 %v5036_v39, %v5742_v52 }
 0x1e0   : > { %v3615_v1 = vpack.c.bf16 %v3547_v8, %v3545_v7  ;;  %v2255_v2 = vsel %vm1566_vm1, %v2253_v13, %v2254_v31  ;;  %v2349_v32 = vadd.f32 %v2253_v13, %v2137_v49  ;;  %v2351_v46 = vadd.f32 %v2254_v31, %v2139_v53 }
 0x1e1   : > { %v2350_v48 = vadd.f32 %v2255_v2, %v2138_v17  ;;  %v2520_v14 = vrot.slane %v2402_v43, 2  ;;  %v2831_v45 = vmul.f32 %v5039_v47, %v5798_v24  ;;  %v2832_v55 = vmul.f32 %v5039_v47, %v5742_v52  ;;  %v781_v43 = vpop.permute.xlu1 %780 }
 0x1e2   : > { %4342 = vmatprep.mubr.bf16.mxu1 %v3615_v1  ;;  %v2625_v33 = vadd.f32 %v2519_v56, %v2349_v32  ;;  %v3054_v42 = vmul.f32 %v5046_v51, %v5798_v24  ;;  %v3055_v37 = vmul.f32 %v5046_v51, %v5742_v52  ;;  %v1011_v49 = vmul.f32 %v4916_v9, %v6036_v44 }
 0x1e3   : > { %v2521_v17 = vsel %vm1811_vm0, %v2519_v56, %v2520_v14  ;;  %v2523_v36 = vsel %vm1811_vm0, %v2520_v14, %v7065_v41  ;;  %v2906_v3 = vrot.slane %v2831_v45, 1  ;;  %v2907_v57 = vrot.slane %v2832_v55, 1  ;;  %v7134_v45 = vld [vmem:[#allocation63_spill] sm:$0xff] }
 0x1e4   : > { %v2626_v53 = vadd.f32 %v2521_v17, %v2350_v48  ;;  %v2627_v30 = vadd.f32 %v2523_v36, %v2351_v46  ;;  %v2790_v13 = vadd.f32 %v5086_v23, %v2625_v33  ;;  %v3172_v31 = vrot.slane %v3054_v42, 2  ;;  %v7135_v33 = vld [vmem:[#allocation23_spill] sm:$0xff] }
 0x1e5   : > { %v2908_v7 = vsel %vm1566_vm1, %v2906_v3, %v2907_v57  ;;  %v3173_v8 = vrot.slane %v3055_v37, 2  ;;  %v1043_v1 = vadd.f32 %v1011_v49, %v5766_v59  ;;  %v1189_v44 = vmul.f32 %v4970_v22, %v6055_v12  ;;  %v7136_v17 = vld [vmem:[#allocation31_spill] sm:$0xff] }
 0x1e6   : > { %v2791_v56 = vadd.f32 %v2743_v61, %v2626_v53  ;;  %v2792_v2 = vadd.f32 %v2744_v63, %v2627_v30  ;;  %v3002_v32 = vadd.f32 %v2906_v3, %v2790_v13  ;;  %v1205_v14 = vmul.f32 %v4970_v22, %v6075_v11  ;;  %v7137_v11 = vld [vmem:[#allocation49_spill] sm:$0xff] }
 0x1e7   : > { %v3174_v46 = vsel %vm1811_vm0, %v3172_v31, %v3173_v8  ;;  %v3176_v48 = vsel %vm1811_vm0, %v3173_v8, %v7040_v60  ;;  %v1239_v55 = vadd.f32 %v7134_v45, %v1043_v1  ;;  %v1221_v42 = vadd.f32 %v1189_v44, %v7135_v33  ;;  %v7138_v1 = vld [vmem:[#allocation4_spill] sm:$0xff]  ;;  %v7139_v44 = vld [vmem:[#allocation51_spill] sm:$0xff] }
 0x1e8   : > { %v3003_v37 = vadd.f32 %v2908_v7, %v2791_v56  ;;  %v3004_v59 = vadd.f32 %v2907_v57, %v2792_v2  ;;  %v3278_v49 = vadd.f32 %v3172_v31, %v3002_v32  ;;  %v1237_v12 = vadd.f32 %v1205_v14, %v5958_v16  ;;  %v973_v57 = vpop.permute.xlu1 %972 }
 0x1e9   : > { %v1278_v61 = vadd.f32 %v5911_v35, %v1239_v55  ;;  %v1260_v63 = vadd.f32 %v5911_v35, %v1221_v42  ;;  %v1042_v36 = vadd.f32 %v7137_v11, %v7136_v17  ;;  %v1206_v3 = vmul.f32 %v4970_v22, %v6099_v21 }
 0x1ea   : > { %v3279_v53 = vadd.f32 %v3174_v46, %v3003_v37  ;;  %v3280_v30 = vadd.f32 %v3176_v48, %v3004_v59  ;;  %v3333_v13 = vadd.f32 %v6041_v19, %v3278_v49  ;;  %v1276_v7 = vadd.f32 %v5911_v35, %v1237_v12  ;;  %v977_v49 = vpop.permute.xlu0 %976 }
 0x1eb   : > { %v1310_v31 = vmax.f32 %v1278_v61, 0.0  ;;  %v1292_v8 = vmax.f32 %v1260_v63, 0.0  ;;  %v1238_v16 = vadd.f32 %v1206_v3, %v1042_v36  ;;  %v1028_v56 = vadd.f32 %v7139_v44, %v7138_v1  ;;  %v7140_v63 = vld [vmem:[#allocation24_spill] sm:$0xff] }
 0x1ec   : > { %v3334_v2 = vadd.f32 %v6041_v19, %v3279_v53  ;;  %v3335_v32 = vadd.f32 %v6041_v19, %v3280_v30  ;;  %v3381_v14 = vmax.f32 %v3333_v13, 0.0  ;;  %v1308_v45 = vmax.f32 %v1276_v7, 0.0  ;;  %v7141_v30 = vld [vmem:[#allocation20_spill] sm:$0xff] }
 0x1ed   : > { %v6180_v21 = vmin.f32 %v1310_v31, 6.0  ;;  %v6182_v46 = vmin.f32 %v1292_v8, 6.0  ;;  %v1277_v48 = vadd.f32 %v5911_v35, %v1238_v16  ;;  %v1192_v55 = vmul.f32 %v4970_v22, %v6116_v15  ;;  %v1169_v15 = vpop.permute.xlu1 %1168 }
 0x1ee   : > { %v3382_v33 = vmax.f32 %v3334_v2, 0.0  ;;  %v3383_v42 = vmax.f32 %v3335_v32, 0.0  ;;  %v3429_v37 = vmin.f32 %v3381_v14, 6.0  ;;  %v6187_v59 = vmin.f32 %v1308_v45, 6.0 }
 0x1ef   : > { %v1309_v12 = vmax.f32 %v1277_v48, 0.0  ;;  %v1224_v61 = vadd.f32 %v1192_v55, %v1028_v56  ;;  %v1044_v17 = vadd.f32 %v7140_v63, %v5820_v40  ;;  %v1208_v11 = vmul.f32 %v4970_v22, %v6135_v4  ;;  %v7142_v56 = vld [vmem:[#allocation14_spill] sm:$0xff] }
 0x1f0   : > { %v3430_v36 = vmin.f32 %v3382_v33, 6.0  ;;  %v3431_v3 = vmin.f32 %v3383_v42, 6.0  ;;  %v3548_v53 = vrot.slane %v3429_v37, 7  ;;  %v818_v13 = vmul.f32 %v7141_v30, %v781_v43  ;;  %v7143_v33 = vld [vmem:[#allocation34_spill] sm:$0xff] }
 0x1f1   : > { %v6194_v7 = vmin.f32 %v1309_v12, 6.0  ;;  %v1263_v31 = vadd.f32 %v5911_v35, %v1224_v61  ;;  %v1240_v8 = vadd.f32 %v1208_v11, %v1044_v17  ;;  %v1014_v16 = vmul.f32 %v4916_v9, %v977_v49 }
 0x1f2   : > { %v3549_v1 = vrot.slane %v3430_v36, 7  ;;  %v3551_v44 = vrot.slane %v3431_v3, 7  ;;  %v850_v40 = vadd.f32 %v818_v13, %v7142_v56  ;;  %v1013_v2 = vmul.f32 %v4916_v9, %v973_v57 }
 0x1f3   : > { %v1295_v4 = vmax.f32 %v1263_v31, 0.0  ;;  %v1279_v32 = vadd.f32 %v5911_v35, %v1240_v8  ;;  %v1209_v14 = vmul.f32 %v4970_v22, %v1169_v15  ;;  %v1463_v43 = vmul.f32 %v4977_v26, %v5646_v28 }
 0x1f4   : > { %v3550_v45 = vsel %vm3492_vm2, %v3548_v53, %v3549_v1  ;;  %v3552_v48 = vsel %vm3492_vm2, %v3549_v1, %v3551_v44  ;;  %v6206_v55 = vadd.f32 %v1014_v16, %v850_v40  ;;  %v1045_v42 = vadd.f32 %v1013_v2, %v7143_v33 }
 0x1f5   : > { %v3616_v37 = vpack.c.bf16 %v3552_v48, %v3550_v45  ;;  %v6209_v49 = vmin.f32 %v1295_v4, 6.0  ;;  %v1311_v9 = vmax.f32 %v1279_v32, 0.0  ;;  %v1464_v57 = vmul.f32 %v4977_v26, %v5712_v50 }
 0x1f6   : > { %v1241_v12 = vadd.f32 %v1209_v14, %v1045_v42  ;;  %v1510_v61 = vmul.f32 %v4967_v10, %v5646_v28  ;;  %v1511_v63 = vmul.f32 %v4967_v10, %v5712_v50  ;;  %v1727_v17 = vmul.f32 %v4989_v34, %v5646_v28 }
 0x1f7   : > { %4343 = vmatmul.mubr.bf16.gmra.mxu1 %v3616_v37  ;;  %v6219_v11 = vmin.f32 %v1311_v9, 6.0  ;;  %v1728_v36 = vmul.f32 %v4989_v34, %v5712_v50  ;;  %v2069_v3 = vmul.f32 %v5020_v29, %v5756_v0  ;;  %v2070_v53 = vmul.f32 %v5020_v29, %v5684_v58 }
 0x1f8   : > { %v1280_v30 = vadd.f32 %v5911_v35, %v1241_v12  ;;  %v1579_v13 = vrot.slane %v1510_v61, 1  ;;  %v1580_v15 = vrot.slane %v1511_v63, 1  ;;  %v1832_v31 = vrot.slane %v1727_v17, 2 }
 0x1f9   : > { %v1833_v8 = vrot.slane %v1728_v36, 2  ;;  %v2164_v28 = vmul.f32 %v5023_v20, %v5756_v0  ;;  %v2165_v16 = vmul.f32 %v5023_v20, %v5684_v58  ;;  %v2380_v50 = vmul.f32 %v5010_v27, %v5756_v0 }
 0x1fa   : > { %v1312_v1 = vmax.f32 %v1280_v30, 0.0  ;;  %v1581_v44 = vsel %vm1566_vm1, %v1579_v13, %v1580_v15  ;;  %v1675_v56 = vadd.f32 %v1579_v13, %v4996_v54  ;;  %v1677_v40 = vadd.f32 %v1580_v15, %v1464_v57 }
 0x1fb   : > { %v1676_v2 = vadd.f32 %v1581_v44, %v1463_v43  ;;  %v1834_v4 = vsel %vm1811_vm0, %v1832_v31, %v1833_v8  ;;  %v1836_v32 = vsel %vm1811_vm0, %v1833_v8, %v7083_v25  ;;  %v2232_v14 = vrot.slane %v2164_v28, 1 }
 0x1fc   : > { %v6239_v45 = vmin.f32 %v1312_v1, 6.0  ;;  %v1952_v48 = vadd.f32 %v1832_v31, %v1675_v56  ;;  %v1954_v33 = vadd.f32 %v1836_v32, %v1677_v40  ;;  %v2233_v42 = vrot.slane %v2165_v16, 1 }
 0x1fd   : > { %v1953_v37 = vadd.f32 %v1834_v4, %v1676_v2  ;;  %v2381_v9 = vmul.f32 %v5010_v27, %v5684_v58  ;;  %v2484_v12 = vrot.slane %v2380_v50, 2  ;;  %v2722_v57 = vmul.f32 %v5036_v39, %v6182_v46  ;;  %v1173_v50 = vpop.permute.xlu1 %1172 }
 0x1fe   : > { %v6247_v43 = vmul.f32 %v5020_v29, %v6239_v45  ;;  %v2116_v61 = vadd.f32 %v5062_v62, %v1952_v48  ;;  %v2118_v63 = vadd.f32 %v2070_v53, %v1954_v33  ;;  %v2234_v17 = vsel %vm1566_vm1, %v2232_v14, %v2233_v42 }
 0x1ff   : > { %v2117_v36 = vadd.f32 %v2069_v3, %v1953_v37  ;;  %v2485_v30 = vrot.slane %v2381_v9, 2  ;;  %v2723_v13 = vmul.f32 %v5036_v39, %v5931_v18  ;;  %v2817_v15 = vmul.f32 %v5039_v47, %v6182_v46 }
 0x200   : > { %v2328_v31 = vadd.f32 %v2232_v14, %v2116_v61  ;;  %v2330_v8 = vadd.f32 %v2233_v42, %v2118_v63  ;;  %v2818_v28 = vmul.f32 %v5039_v47, %v5931_v18  ;;  %v3033_v16 = vmul.f32 %v5046_v51, %v6182_v46 }
 0x201   : > { %v2329_v53 = vadd.f32 %v2234_v17, %v2117_v36  ;;  %v2486_v1 = vsel %vm1811_vm0, %v2484_v12, %v2485_v30  ;;  %v2488_v3 = vsel %vm1811_vm0, %v2485_v30, %v7065_v41  ;;  %v2885_v44 = vrot.slane %v2817_v15, 1 }
 0x202   : > { %v2604_v56 = vadd.f32 %v2484_v12, %v2328_v31  ;;  %v2606_v40 = vadd.f32 %v2488_v3, %v2330_v8  ;;  %v2886_v2 = vrot.slane %v2818_v28, 1  ;;  %v3034_v4 = vmul.f32 %v5046_v51, %v5931_v18 }
 0x203   : > { %v2605_v32 = vadd.f32 %v2486_v1, %v2329_v53  ;;  %v3137_v14 = vrot.slane %v3033_v16, 2  ;;  %v1210_v48 = vmul.f32 %v4970_v22, %v1173_v50  ;;  %v1487_v33 = vmul.f32 %v4977_v26, %v5735_v38 }
 0x204   : > { %v2769_v42 = vadd.f32 %v5086_v23, %v2604_v56  ;;  %v2771_v37 = vadd.f32 %v2723_v13, %v2606_v40  ;;  %v2887_v9 = vsel %vm1566_vm1, %v2885_v44, %v2886_v2  ;;  %v3138_v61 = vrot.slane %v3034_v4, 2 }
 0x205   : > { %v2770_v63 = vadd.f32 %v2722_v57, %v2605_v32  ;;  %v1242_v12 = vadd.f32 %v1210_v48, %v6206_v55  ;;  %v1488_v17 = vmul.f32 %v4977_v26, %v5673_v6  ;;  %v1526_v36 = vmul.f32 %v4967_v10, %v5735_v38 }
 0x206   : > { %v2981_v30 = vadd.f32 %v2885_v44, %v2769_v42  ;;  %v2983_v22 = vadd.f32 %v2886_v2, %v2771_v37  ;;  %v3139_v15 = vsel %vm1811_vm0, %v3137_v14, %v3138_v61  ;;  %v3141_v31 = vsel %vm1811_vm0, %v3138_v61, %v7040_v60 }
 0x207   : > { %v2982_v13 = vadd.f32 %v2887_v9, %v2770_v63  ;;  %v1281_v8 = vadd.f32 %v5911_v35, %v1242_v12  ;;  %v1527_v57 = vmul.f32 %v4967_v10, %v5673_v6  ;;  %v1603_v55 = vrot.slane %v1526_v36, 1 }
 0x208   : > { %v3257_v28 = vadd.f32 %v3137_v14, %v2981_v30  ;;  %v3259_v16 = vadd.f32 %v3141_v31, %v2983_v22  ;;  %v1751_v50 = vmul.f32 %v4989_v34, %v5735_v38  ;;  %v1752_v53 = vmul.f32 %v4989_v34, %v5673_v6 }
 0x209   : > { %v3258_v1 = vadd.f32 %v3139_v15, %v2982_v13  ;;  %v1313_v3 = vmax.f32 %v1281_v8, 0.0  ;;  %v1604_v44 = vrot.slane %v1527_v57, 1  ;;  %v1699_v56 = vadd.f32 %v1603_v55, %v4996_v54 }
 0x20a   : > { %v3312_v40 = vadd.f32 %v6041_v19, %v3257_v28  ;;  %v3314_v35 = vadd.f32 %v6041_v19, %v3259_v16  ;;  %v1872_v2 = vrot.slane %v1751_v50, 2  ;;  %v1873_v4 = vrot.slane %v1752_v53, 2 }
 0x20b   : > { %v3313_v32 = vadd.f32 %v6041_v19, %v3258_v1  ;;  %v6288_v14 = vmin.f32 %v1313_v3, 6.0  ;;  %v1605_v38 = vsel %vm1566_vm1, %v1603_v55, %v1604_v44  ;;  %v1701_v48 = vadd.f32 %v1604_v44, %v1488_v17 }
 0x20c   : > { %v3360_v42 = vmax.f32 %v3312_v40, 0.0  ;;  %v3362_v6 = vmax.f32 %v3314_v35, 0.0  ;;  %v1700_v37 = vadd.f32 %v1605_v38, %v1487_v33  ;;  %v1874_v9 = vsel %vm1811_vm0, %v1872_v2, %v1873_v4 }
 0x20d   : > { %v3361_v61 = vmax.f32 %v3313_v32, 0.0  ;;  %v6294_v63 = vmul.f32 %v5020_v29, %v6288_v14  ;;  %v6298_v12 = vmul.f32 %v5010_v27, %v6288_v14  ;;  %v1876_v36 = vsel %vm1811_vm0, %v1873_v4, %v7083_v25 }
 0x20e   : > { %v3408_v30 = vmin.f32 %v3360_v42, 6.0  ;;  %v3410_v22 = vmin.f32 %v3362_v6, 6.0  ;;  %v1976_v17 = vadd.f32 %v1872_v2, %v1699_v56  ;;  %v1977_v15 = vadd.f32 %v1874_v9, %v1700_v37 }
 0x20f   : > { %v3409_v31 = vmin.f32 %v3361_v61, 6.0  ;;  %v2540_v33 = vrot.slane %v6298_v12, 2  ;;  %v1978_v13 = vadd.f32 %v1876_v36, %v1701_v48  ;;  %v2093_v8 = vmul.f32 %v5020_v29, %v5798_v24 }
 0x210   : > { %v3513_v57 = vrot.slane %v3408_v30, 7  ;;  %v3516_v55 = vrot.slane %v3410_v22, 7  ;;  %v2094_v28 = vmul.f32 %v5020_v29, %v5742_v52  ;;  %v2140_v16 = vadd.f32 %v5062_v62, %v1976_v17 }
 0x211   : > { %v3514_v50 = vrot.slane %v3409_v31, 7  ;;  %v2141_v53 = vadd.f32 %v2093_v8, %v1977_v15  ;;  %v2180_v1 = vmul.f32 %v5023_v20, %v5798_v24  ;;  %v2181_v3 = vmul.f32 %v5023_v20, %v5742_v52 }
 0x212   : > { %v2142_v44 = vadd.f32 %v2094_v28, %v1978_v13  ;;  %v2404_v56 = vmul.f32 %v5010_v27, %v5798_v24  ;;  %v2405_v40 = vmul.f32 %v5010_v27, %v5742_v52  ;;  %v2746_v35 = vmul.f32 %v5036_v39, %v6187_v59 }
 0x213   : > { %v3515_v2 = vsel %vm3492_vm2, %v3513_v57, %v3514_v50  ;;  %v3517_v4 = vsel %vm3492_vm2, %v3514_v50, %v3516_v55  ;;  %v2256_v32 = vrot.slane %v2180_v1, 1  ;;  %v2257_v38 = vrot.slane %v2181_v3, 1 }
 0x214   : > { %v3609_v48 = vpack.c.bf16 %v3517_v4, %v3515_v2  ;;  %v2524_v42 = vrot.slane %v2404_v56, 2  ;;  %v2525_v6 = vrot.slane %v2405_v40, 2  ;;  %v2747_v37 = vmul.f32 %v5036_v39, %v6194_v7 }
 0x215   : > { %v2258_v9 = vsel %vm1566_vm1, %v2256_v32, %v2257_v38  ;;  %v2352_v61 = vadd.f32 %v2256_v32, %v2140_v16  ;;  %v2354_v36 = vadd.f32 %v2257_v38, %v2142_v44  ;;  %v2833_v30 = vmul.f32 %v5039_v47, %v6187_v59 }
 0x216   : > { %4330 = vmatprep.mubr.bf16.mxu0 %v3609_v48  ;;  %v2353_v22 = vadd.f32 %v2258_v9, %v2141_v53  ;;  %v2526_v17 = vsel %vm1811_vm0, %v2524_v42, %v2525_v6  ;;  %v2528_v15 = vsel %vm1811_vm0, %v2525_v6, %v7065_v41  ;;  %v2834_v31 = vmul.f32 %v5039_v47, %v6194_v7 }
 0x217   : > { %v2628_v13 = vadd.f32 %v2524_v42, %v2352_v61  ;;  %v2630_v8 = vadd.f32 %v2528_v15, %v2354_v36  ;;  %v2909_v57 = vrot.slane %v2833_v30, 1  ;;  %v3057_v55 = vmul.f32 %v5046_v51, %v6187_v59 }
 0x218   : > { %v2629_v28 = vadd.f32 %v2526_v17, %v2353_v22  ;;  %v2910_v16 = vrot.slane %v2834_v31, 1  ;;  %v3058_v50 = vmul.f32 %v5046_v51, %v6194_v7  ;;  %v1466_v53 = vmul.f32 %v4977_v26, %v5756_v0 }
 0x219   : > { %v2793_v1 = vadd.f32 %v5086_v23, %v2628_v13  ;;  %v2795_v3 = vadd.f32 %v2747_v37, %v2630_v8  ;;  %v3177_v44 = vrot.slane %v3057_v55, 2  ;;  %v1467_v56 = vmul.f32 %v4977_v26, %v5684_v58 }
 0x21a   : > { %v2794_v40 = vadd.f32 %v2746_v35, %v2629_v28  ;;  %v2911_v2 = vsel %vm1566_vm1, %v2909_v57, %v2910_v16  ;;  %v3178_v4 = vrot.slane %v3058_v50, 2  ;;  %v1512_v32 = vmul.f32 %v4967_v10, %v5756_v0 }
 0x21b   : > { %v3005_v38 = vadd.f32 %v2909_v57, %v2793_v1  ;;  %v3007_v48 = vadd.f32 %v2910_v16, %v2795_v3  ;;  %v1513_v42 = vmul.f32 %v4967_v10, %v5684_v58  ;;  %v1730_v6 = vmul.f32 %v4989_v34, %v5756_v0 }
 0x21c   : > { %v3006_v37 = vadd.f32 %v2911_v2, %v2794_v40  ;;  %v3179_v9 = vsel %vm1811_vm0, %v3177_v44, %v3178_v4  ;;  %v3181_v35 = vsel %vm1811_vm0, %v3178_v4, %v7040_v60  ;;  %v1582_v61 = vrot.slane %v1512_v32, 1 }
 0x21d   : > { %v3281_v36 = vadd.f32 %v3177_v44, %v3005_v38  ;;  %v3283_v30 = vadd.f32 %v3181_v35, %v3007_v48  ;;  %v1583_v22 = vrot.slane %v1513_v42, 1  ;;  %v1731_v17 = vmul.f32 %v4989_v34, %v5684_v58 }
 0x21e   : > { %v3282_v15 = vadd.f32 %v3179_v9, %v3006_v37  ;;  %v1678_v31 = vadd.f32 %v1582_v61, %v4996_v54  ;;  %v1837_v13 = vrot.slane %v1730_v6, 2  ;;  %v2072_v0 = vmul.f32 %v5020_v29, %v6182_v46 }
 0x21f   : > { %v3336_v8 = vadd.f32 %v6041_v19, %v3281_v36  ;;  %v3338_v57 = vadd.f32 %v6041_v19, %v3283_v30  ;;  %v1584_v55 = vsel %vm1566_vm1, %v1582_v61, %v1583_v22  ;;  %v1680_v28 = vadd.f32 %v1583_v22, %v1467_v56 }
 0x220   : > { %v3337_v16 = vadd.f32 %v6041_v19, %v3282_v15  ;;  %v1679_v50 = vadd.f32 %v1584_v55, %v1466_v53  ;;  %v1838_v1 = vrot.slane %v1731_v17, 2  ;;  %v1955_v3 = vadd.f32 %v1837_v13, %v1678_v31 }
 0x221   : > { %v3384_v58 = vmax.f32 %v3336_v8, 0.0  ;;  %v3386_v44 = vmax.f32 %v3338_v57, 0.0  ;;  %v2073_v40 = vmul.f32 %v5020_v29, %v5931_v18  ;;  %v2166_v2 = vmul.f32 %v5023_v20, %v6182_v46 }
 0x222   : > { %v3385_v4 = vmax.f32 %v3337_v16, 0.0  ;;  %v1839_v32 = vsel %vm1811_vm0, %v1837_v13, %v1838_v1  ;;  %v1841_v38 = vsel %vm1811_vm0, %v1838_v1, %v7083_v25  ;;  %v2119_v56 = vadd.f32 %v5062_v62, %v1955_v3 }
 0x223   : > { %v3432_v48 = vmin.f32 %v3384_v58, 6.0  ;;  %v3434_v53 = vmin.f32 %v3386_v44, 6.0  ;;  %v1956_v42 = vadd.f32 %v1839_v32, %v1679_v50  ;;  %v1957_v6 = vadd.f32 %v1841_v38, %v1680_v28 }
 0x224   : > { %v3433_v37 = vmin.f32 %v3385_v4, 6.0  ;;  %v2167_v9 = vmul.f32 %v5023_v20, %v5931_v18  ;;  %v2235_v35 = vrot.slane %v2166_v2, 1  ;;  %v2383_v61 = vmul.f32 %v5010_v27, %v6182_v46 }
 0x225   : > { %v3553_v36 = vrot.slane %v3432_v48, 7  ;;  %v3556_v30 = vrot.slane %v3434_v53, 7  ;;  %v2120_v22 = vadd.f32 %v2072_v0, %v1956_v42  ;;  %v2121_v17 = vadd.f32 %v2073_v40, %v1957_v6 }
 0x226   : > { %v3554_v15 = vrot.slane %v3433_v37, 7  ;;  %v2236_v31 = vrot.slane %v2167_v9, 1  ;;  %v2331_v13 = vadd.f32 %v2235_v35, %v2119_v56  ;;  %v2384_v8 = vmul.f32 %v5010_v27, %v5931_v18 }
 0x227   : > { %v2489_v57 = vrot.slane %v2383_v61, 2  ;;  %v2725_v55 = vmul.f32 %v5036_v39, %v6113_v5  ;;  %v2726_v28 = vmul.f32 %v5036_v39, %v6209_v49  ;;  %v2819_v16 = vmul.f32 %v5039_v47, %v6113_v5 }
 0x228   : > { %v3555_v50 = vsel %vm3492_vm2, %v3553_v36, %v3554_v15  ;;  %v3557_v0 = vsel %vm3492_vm2, %v3554_v15, %v3556_v30  ;;  %v2237_v1 = vsel %vm1566_vm1, %v2235_v35, %v2236_v31  ;;  %v2333_v3 = vadd.f32 %v2236_v31, %v2121_v17 }
 0x229   : > { %v3617_v58 = vpack.c.bf16 %v3557_v0, %v3555_v50  ;;  %v2332_v44 = vadd.f32 %v2237_v1, %v2120_v22  ;;  %v2490_v40 = vrot.slane %v2384_v8, 2  ;;  %v2607_v2 = vadd.f32 %v2489_v57, %v2331_v13 }
 0x22a   : > { %v2820_v4 = vmul.f32 %v5039_v47, %v6209_v49  ;;  %v2888_v32 = vrot.slane %v2819_v16, 1  ;;  %v3036_v38 = vmul.f32 %v5046_v51, %v6113_v5  ;;  %v3037_v56 = vmul.f32 %v5046_v51, %v6209_v49 }
 0x22b   : > { %4346 = vmatprep.mubr.bf16.mxu1 %v3617_v58  ;;  %v2491_v48 = vsel %vm1811_vm0, %v2489_v57, %v2490_v40  ;;  %v2493_v53 = vsel %vm1811_vm0, %v2490_v40, %v7065_v41  ;;  %v2772_v42 = vadd.f32 %v5086_v23, %v2607_v2  ;;  %v1490_v6 = vmul.f32 %v4977_v26, %v5798_v24 }
 0x22c   : > { %v2608_v37 = vadd.f32 %v2491_v48, %v2332_v44  ;;  %v2609_v9 = vadd.f32 %v2493_v53, %v2333_v3  ;;  %v2889_v35 = vrot.slane %v2820_v4, 1  ;;  %v3142_v61 = vrot.slane %v3036_v38, 2 }
 0x22d   : > { %v2984_v36 = vadd.f32 %v2888_v32, %v2772_v42  ;;  %v3143_v30 = vrot.slane %v3037_v56, 2  ;;  %v1491_v22 = vmul.f32 %v4977_v26, %v5742_v52  ;;  %v1528_v17 = vmul.f32 %v4967_v10, %v5798_v24 }
 0x22e   : > { %v2773_v15 = vadd.f32 %v2725_v55, %v2608_v37  ;;  %v2774_v31 = vadd.f32 %v2726_v28, %v2609_v9  ;;  %v2890_v13 = vsel %vm1566_vm1, %v2888_v32, %v2889_v35  ;;  %v1529_v8 = vmul.f32 %v4967_v10, %v5742_v52 }
 0x22f   : > { %v3144_v57 = vsel %vm1811_vm0, %v3142_v61, %v3143_v30  ;;  %v3146_v16 = vsel %vm1811_vm0, %v3143_v30, %v7040_v60  ;;  %v3260_v50 = vadd.f32 %v3142_v61, %v2984_v36  ;;  %v1606_v0 = vrot.slane %v1528_v17, 1 }
 0x230   : > { %v2985_v1 = vadd.f32 %v2890_v13, %v2773_v15  ;;  %v2986_v3 = vadd.f32 %v2889_v35, %v2774_v31  ;;  %v1607_v58 = vrot.slane %v1529_v8, 1  ;;  %v1754_v44 = vmul.f32 %v4989_v34, %v5798_v24 }
 0x231   : > { %v3315_v55 = vadd.f32 %v6041_v19, %v3260_v50  ;;  %v1702_v28 = vadd.f32 %v1606_v0, %v4996_v54  ;;  %v1755_v40 = vmul.f32 %v4989_v34, %v5742_v52  ;;  %v2096_v2 = vmul.f32 %v5020_v29, %v6187_v59 }
 0x232   : > { %v3261_v4 = vadd.f32 %v3144_v57, %v2985_v1  ;;  %v3262_v32 = vadd.f32 %v3146_v16, %v2986_v3  ;;  %v1608_v38 = vsel %vm1566_vm1, %v1606_v0, %v1607_v58  ;;  %v1704_v56 = vadd.f32 %v1607_v58, %v1491_v22 }
 0x233   : > { %v3363_v48 = vmax.f32 %v3315_v55, 0.0  ;;  %v1703_v53 = vadd.f32 %v1608_v38, %v1490_v6  ;;  %v1877_v42 = vrot.slane %v1754_v44, 2  ;;  %v1878_v37 = vrot.slane %v1755_v40, 2 }
 0x234   : > { %v3316_v24 = vadd.f32 %v6041_v19, %v3261_v4  ;;  %v3317_v9 = vadd.f32 %v6041_v19, %v3262_v32  ;;  %v2097_v35 = vmul.f32 %v5020_v29, %v6194_v7  ;;  %v2182_v52 = vmul.f32 %v5023_v20, %v6187_v59 }
 0x235   : > { %v3411_v61 = vmin.f32 %v3363_v48, 6.0  ;;  %v1879_v36 = vsel %vm1811_vm0, %v1877_v42, %v1878_v37  ;;  %v1881_v30 = vsel %vm1811_vm0, %v1878_v37, %v7083_v25  ;;  %v1979_v22 = vadd.f32 %v1877_v42, %v1702_v28 }
 0x236   : > { %v3364_v6 = vmax.f32 %v3316_v24, 0.0  ;;  %v3365_v17 = vmax.f32 %v3317_v9, 0.0  ;;  %v1980_v15 = vadd.f32 %v1879_v36, %v1703_v53  ;;  %v1981_v31 = vadd.f32 %v1881_v30, %v1704_v56 }
 0x237   : > { %v3518_v13 = vrot.slane %v3411_v61, 7  ;;  %v2143_v19 = vadd.f32 %v5062_v62, %v1979_v22  ;;  %v2183_v8 = vmul.f32 %v5023_v20, %v6194_v7  ;;  %v2259_v57 = vrot.slane %v2182_v52, 1 }
 0x238   : > { %v3412_v16 = vmin.f32 %v3364_v6, 6.0  ;;  %v3413_v50 = vmin.f32 %v3365_v17, 6.0  ;;  %v2144_v0 = vadd.f32 %v2096_v2, %v1980_v15  ;;  %v2145_v1 = vadd.f32 %v2097_v35, %v1981_v31 }
 0x239   : > { %v2260_v3 = vrot.slane %v2183_v8, 1  ;;  %v2355_v58 = vadd.f32 %v2259_v57, %v2143_v19  ;;  %v2407_v44 = vmul.f32 %v5010_v27, %v6187_v59  ;;  %v2408_v55 = vmul.f32 %v5010_v27, %v6194_v7 }
 0x23a   : > { %v3519_v28 = vrot.slane %v3412_v16, 7  ;;  %v3521_v40 = vrot.slane %v3413_v50, 7  ;;  %v2749_v4 = vmul.f32 %v5036_v39, %v6180_v21  ;;  %v2750_v32 = vmul.f32 %v5036_v39, %v6219_v11 }
 0x23b   : > { %v2261_v38 = vsel %vm1566_vm1, %v2259_v57, %v2260_v3  ;;  %v2357_v2 = vadd.f32 %v2260_v3, %v2145_v1  ;;  %v2529_v56 = vrot.slane %v2407_v44, 2  ;;  %v2530_v48 = vrot.slane %v2408_v55, 2 }
 0x23c   : > { %v3520_v53 = vsel %vm3492_vm2, %v3518_v13, %v3519_v28  ;;  %v3522_v42 = vsel %vm3492_vm2, %v3519_v28, %v3521_v40  ;;  %v2356_v37 = vadd.f32 %v2261_v38, %v2144_v0  ;;  %v2835_v24 = vmul.f32 %v5039_v47, %v6180_v21 }
 0x23d   : > { %v3610_v9 = vpack.c.bf16 %v3522_v42, %v3520_v53  ;;  %v2531_v35 = vsel %vm1811_vm0, %v2529_v56, %v2530_v48  ;;  %v2533_v52 = vsel %vm1811_vm0, %v2530_v48, %v7065_v41  ;;  %v2631_v61 = vadd.f32 %v2529_v56, %v2355_v58 }
 0x23e   : > { %v2632_v36 = vadd.f32 %v2531_v35, %v2356_v37  ;;  %v2633_v30 = vadd.f32 %v2533_v52, %v2357_v2  ;;  %v2836_v22 = vmul.f32 %v5039_v47, %v6219_v11  ;;  %v2912_v6 = vrot.slane %v2835_v24, 1  ;;  %v6466_v37 = vld [vmem:[%s6828_s4] ss:$0 sm:$0xff] }
 0x23f   : > { %4331 = vmatmul.mubr.bf16.gmra.mxu0 %v3610_v9  ;;  %v2796_v17 = vadd.f32 %v5086_v23, %v2631_v61  ;;  %v3060_v15 = vmul.f32 %v5046_v51, %v6180_v21  ;;  %v3061_v31 = vmul.f32 %v5046_v51, %v6219_v11  ;;  %v1469_v13 = vmul.f32 %v4977_v26, %v6182_v46 }
 0x240   : > { %v2797_v19 = vadd.f32 %v2749_v4, %v2632_v36  ;;  %v2798_v8 = vadd.f32 %v2750_v32, %v2633_v30  ;;  %v2913_v57 = vrot.slane %v2836_v22, 1  ;;  %v1470_v16 = vmul.f32 %v4977_v26, %v5931_v18 }
 0x241   : > { %v3008_v50 = vadd.f32 %v2912_v6, %v2796_v17  ;;  %v3182_v0 = vrot.slane %v3060_v15, 2  ;;  %v3183_v1 = vrot.slane %v3061_v31, 2  ;;  %v1514_v3 = vmul.f32 %v4967_v10, %v6182_v46 }
 0x242   : > { %v2914_v58 = vsel %vm1566_vm1, %v2912_v6, %v2913_v57  ;;  %v3010_v44 = vadd.f32 %v2913_v57, %v2798_v8  ;;  %v1515_v55 = vmul.f32 %v4967_v10, %v5931_v18  ;;  %v1733_v28 = vmul.f32 %v4989_v34, %v6182_v46 }
 0x243   : > { %v3009_v40 = vadd.f32 %v2914_v58, %v2797_v19  ;;  %v3184_v4 = vsel %vm1811_vm0, %v3182_v0, %v3183_v1  ;;  %v3186_v32 = vsel %vm1811_vm0, %v3183_v1, %v7040_v60  ;;  %v3284_v38 = vadd.f32 %v3182_v0, %v3008_v50 }
 0x244   : > { %v3286_v2 = vadd.f32 %v3186_v32, %v3010_v44  ;;  %v1585_v56 = vrot.slane %v1514_v3, 1  ;;  %v1586_v48 = vrot.slane %v1515_v55, 1  ;;  %v1734_v53 = vmul.f32 %v4989_v34, %v5931_v18 }
 0x245   : > { %v3285_v42 = vadd.f32 %v3184_v4, %v3009_v40  ;;  %v3339_v46 = vadd.f32 %v6466_v37, %v3284_v38  ;;  %v1842_v24 = vrot.slane %v1733_v28, 2  ;;  %v2075_v9 = vmul.f32 %v5020_v29, %v6113_v5 }
 0x246   : > { %v3341_v35 = vadd.f32 %v6466_v37, %v3286_v2  ;;  %v1587_v52 = vsel %vm1566_vm1, %v1585_v56, %v1586_v48  ;;  %v1681_v61 = vadd.f32 %v1585_v56, %v4996_v54  ;;  %v1683_v36 = vadd.f32 %v1586_v48, %v1470_v16 }
 0x247   : > { %v3340_v18 = vadd.f32 %v6466_v37, %v3285_v42  ;;  %v3387_v30 = vmax.f32 %v3339_v46, 0.0  ;;  %v1682_v22 = vadd.f32 %v1587_v52, %v1469_v13  ;;  %v1843_v6 = vrot.slane %v1734_v53, 2  ;;  %v7144_v46 = vld [vmem:[#allocation28_spill] sm:$0xff] }
 0x248   : > { %v3389_v17 = vmax.f32 %v3341_v35, 0.0  ;;  %v1958_v15 = vadd.f32 %v1842_v24, %v1681_v61  ;;  %v2076_v31 = vmul.f32 %v5020_v29, %v6209_v49  ;;  %v2168_v19 = vmul.f32 %v5023_v20, %v6113_v5  ;;  %v7145_v35 = vld [vmem:[#allocation9_spill] sm:$0xff] }
 0x249   : > { %v3388_v8 = vmax.f32 %v3340_v18, 0.0  ;;  %v3435_v57 = vmin.f32 %v3387_v30, 6.0  ;;  %v1844_v50 = vsel %vm1811_vm0, %v1842_v24, %v1843_v6  ;;  %v1846_v16 = vsel %vm1811_vm0, %v1843_v6, %v7083_v25 }
 0x24a   : > { %v3437_v0 = vmin.f32 %v3389_v17, 6.0  ;;  %v1959_v1 = vadd.f32 %v1844_v50, %v1682_v22  ;;  %v1960_v3 = vadd.f32 %v1846_v16, %v1683_v36  ;;  %v2122_v13 = vadd.f32 %v5062_v62, %v1958_v15 }
 0x24b   : > { %v3436_v58 = vmin.f32 %v3388_v8, 6.0  ;;  %v3558_v44 = vrot.slane %v3435_v57, 7  ;;  %v2169_v55 = vmul.f32 %v5023_v20, %v6209_v49  ;;  %v2238_v28 = vrot.slane %v2168_v19, 1 }
 0x24c   : > { %v3561_v40 = vrot.slane %v3437_v0, 7  ;;  %v2123_v4 = vadd.f32 %v2075_v9, %v1959_v1  ;;  %v2124_v32 = vadd.f32 %v2076_v31, %v1960_v3  ;;  %v2386_v38 = vmul.f32 %v5010_v27, %v6113_v5 }
 0x24d   : > { %v3559_v2 = vrot.slane %v3436_v58, 7  ;;  %v2239_v56 = vrot.slane %v2169_v55, 1  ;;  %v2334_v48 = vadd.f32 %v2238_v28, %v2122_v13  ;;  %v2387_v53 = vmul.f32 %v5010_v27, %v6209_v49 }
 0x24e   : > { %v2494_v42 = vrot.slane %v2386_v38, 2  ;;  %v2728_v24 = vmul.f32 %v5036_v39, %v7144_v46  ;;  %v2729_v52 = vmul.f32 %v5036_v39, %v7145_v35  ;;  %v2821_v9 = vmul.f32 %v5039_v47, %v7144_v46 }
 0x24f   : > { %v3560_v61 = vsel %vm3492_vm2, %v3558_v44, %v3559_v2  ;;  %v3562_v36 = vsel %vm3492_vm2, %v3559_v2, %v3561_v40  ;;  %v2240_v18 = vsel %vm1566_vm1, %v2238_v28, %v2239_v56  ;;  %v2336_v30 = vadd.f32 %v2239_v56, %v2124_v32 }
 0x250   : > { %v3618_v22 = vpack.c.bf16 %v3562_v36, %v3560_v61  ;;  %v2335_v6 = vadd.f32 %v2240_v18, %v2123_v4  ;;  %v2495_v17 = vrot.slane %v2387_v53, 2  ;;  %v2610_v15 = vadd.f32 %v2494_v42, %v2334_v48 }
 0x251   : > { %v2822_v31 = vmul.f32 %v5039_v47, %v7145_v35  ;;  %v2891_v19 = vrot.slane %v2821_v9, 1  ;;  %v3039_v8 = vmul.f32 %v5046_v51, %v7144_v46  ;;  %v3040_v57 = vmul.f32 %v5046_v51, %v7145_v35 }
 0x252   : > { %4347 = vmatmul.mubr.bf16.gmra.mxu1 %v3618_v22  ;;  %v2496_v50 = vsel %vm1811_vm0, %v2494_v42, %v2495_v17  ;;  %v2498_v16 = vsel %vm1811_vm0, %v2495_v17, %v7065_v41  ;;  %v2775_v0 = vadd.f32 %v5086_v23, %v2610_v15  ;;  %v1472_v1 = vmul.f32 %v4977_v26, %v6113_v5 }
 0x253   : > { %v2611_v3 = vadd.f32 %v2496_v50, %v2335_v6  ;;  %v2612_v13 = vadd.f32 %v2498_v16, %v2336_v30  ;;  %v2892_v58 = vrot.slane %v2822_v31, 1  ;;  %v3147_v44 = vrot.slane %v3039_v8, 2 }
 0x254   : > { %v2987_v55 = vadd.f32 %v2891_v19, %v2775_v0  ;;  %v3148_v28 = vrot.slane %v3040_v57, 2  ;;  %v1473_v40 = vmul.f32 %v4977_v26, %v6209_v49  ;;  %v1516_v4 = vmul.f32 %v4967_v10, %v6113_v5 }
 0x255   : > { %v2776_v32 = vadd.f32 %v2728_v24, %v2611_v3  ;;  %v2777_v38 = vadd.f32 %v2729_v52, %v2612_v13  ;;  %v2893_v2 = vsel %vm1566_vm1, %v2891_v19, %v2892_v58  ;;  %v1517_v56 = vmul.f32 %v4967_v10, %v6209_v49 }
 0x256   : > { %v3149_v48 = vsel %vm1811_vm0, %v3147_v44, %v3148_v28  ;;  %v3151_v53 = vsel %vm1811_vm0, %v3148_v28, %v7040_v60  ;;  %v3263_v42 = vadd.f32 %v3147_v44, %v2987_v55  ;;  %v1588_v9 = vrot.slane %v1516_v4, 1 }
 0x257   : > { %v2988_v61 = vadd.f32 %v2893_v2, %v2776_v32  ;;  %v2989_v36 = vadd.f32 %v2892_v58, %v2777_v38  ;;  %v1589_v18 = vrot.slane %v1517_v56, 1  ;;  %v1736_v30 = vmul.f32 %v4989_v34, %v6113_v5 }
 0x258   : > { %v3318_v24 = vadd.f32 %v6466_v37, %v3263_v42  ;;  %v1684_v52 = vadd.f32 %v1588_v9, %v4996_v54  ;;  %v1737_v22 = vmul.f32 %v4989_v34, %v6209_v49  ;;  %v2078_v6 = vmul.f32 %v5020_v29, %v7144_v46 }
 0x259   : > { %v3264_v17 = vadd.f32 %v3149_v48, %v2988_v61  ;;  %v3265_v15 = vadd.f32 %v3151_v53, %v2989_v36  ;;  %v1590_v31 = vsel %vm1566_vm1, %v1588_v9, %v1589_v18  ;;  %v1686_v19 = vadd.f32 %v1589_v18, %v1473_v40 }
 0x25a   : > { %v3366_v8 = vmax.f32 %v3318_v24, 0.0  ;;  %v1685_v57 = vadd.f32 %v1590_v31, %v1472_v1  ;;  %v1847_v50 = vrot.slane %v1736_v30, 2  ;;  %v1848_v16 = vrot.slane %v1737_v22, 2  ;;  %v7146_v22 = vld [vmem:[#allocation42_spill] sm:$0xff] }
 0x25b   : > { %v3319_v5 = vadd.f32 %v6466_v37, %v3264_v17  ;;  %v3320_v0 = vadd.f32 %v6466_v37, %v3265_v15  ;;  %v2079_v3 = vmul.f32 %v5020_v29, %v7145_v35  ;;  %v2170_v49 = vmul.f32 %v5023_v20, %v7144_v46  ;;  %v7147_v15 = vld [vmem:[#allocation19_spill] sm:$0xff] }
 0x25c   : > { %v3414_v13 = vmin.f32 %v3366_v8, 6.0  ;;  %v1849_v58 = vsel %vm1811_vm0, %v1847_v50, %v1848_v16  ;;  %v1851_v44 = vsel %vm1811_vm0, %v1848_v16, %v7083_v25  ;;  %v1961_v55 = vadd.f32 %v1847_v50, %v1684_v52 }
 0x25d   : > { %v3367_v1 = vmax.f32 %v3319_v5, 0.0  ;;  %v3368_v28 = vmax.f32 %v3320_v0, 0.0  ;;  %v1962_v40 = vadd.f32 %v1849_v58, %v1685_v57  ;;  %v1963_v4 = vadd.f32 %v1851_v44, %v1686_v19 }
 0x25e   : > { %v3523_v32 = vrot.slane %v3414_v13, 7  ;;  %v2125_v38 = vadd.f32 %v5062_v62, %v1961_v55  ;;  %v2171_v2 = vmul.f32 %v5023_v20, %v7145_v35  ;;  %v2241_v56 = vrot.slane %v2170_v49, 1 }
 0x25f   : > { %v3415_v48 = vmin.f32 %v3367_v1, 6.0  ;;  %v3416_v53 = vmin.f32 %v3368_v28, 6.0  ;;  %v2126_v42 = vadd.f32 %v2078_v6, %v1962_v40  ;;  %v2127_v9 = vadd.f32 %v2079_v3, %v1963_v4 }
 0x260   : > { %v2242_v61 = vrot.slane %v2171_v2, 1  ;;  %v2337_v36 = vadd.f32 %v2241_v56, %v2125_v38  ;;  %v2389_v18 = vmul.f32 %v5010_v27, %v7144_v46  ;;  %v2390_v30 = vmul.f32 %v5010_v27, %v7145_v35 }
 0x261   : > { %v3524_v24 = vrot.slane %v3415_v48, 7  ;;  %v3526_v52 = vrot.slane %v3416_v53, 7  ;;  %v2731_v17 = vmul.f32 %v5036_v39, %v7146_v22  ;;  %v2732_v31 = vmul.f32 %v5036_v39, %v7147_v15 }
 0x262   : > { %v2243_v19 = vsel %vm1566_vm1, %v2241_v56, %v2242_v61  ;;  %v2339_v6 = vadd.f32 %v2242_v61, %v2127_v9  ;;  %v2499_v8 = vrot.slane %v2389_v18, 2  ;;  %v2500_v57 = vrot.slane %v2390_v30, 2 }
 0x263   : > { %v3525_v50 = vsel %vm3492_vm2, %v3523_v32, %v3524_v24  ;;  %v3527_v46 = vsel %vm3492_vm2, %v3524_v24, %v3526_v52  ;;  %v2338_v16 = vadd.f32 %v2243_v19, %v2126_v42  ;;  %v2823_v35 = vmul.f32 %v5039_v47, %v7146_v22 }
 0x264   : > { %v3611_v5 = vpack.c.bf16 %v3527_v46, %v3525_v50  ;;  %v2501_v0 = vsel %vm1811_vm0, %v2499_v8, %v2500_v57  ;;  %v2503_v3 = vsel %vm1811_vm0, %v2500_v57, %v7065_v41  ;;  %v2613_v49 = vadd.f32 %v2499_v8, %v2337_v36 }
 0x265   : > { %v2614_v13 = vadd.f32 %v2501_v0, %v2338_v16  ;;  %v2615_v58 = vadd.f32 %v2503_v3, %v2339_v6  ;;  %v2824_v44 = vmul.f32 %v5039_v47, %v7147_v15  ;;  %v2894_v55 = vrot.slane %v2823_v35, 1 }
 0x266   : > { %4334 = vmatprep.mubr.bf16.mxu0 %v3611_v5  ;;  %v2778_v1 = vadd.f32 %v5086_v23, %v2613_v49  ;;  %v3042_v28 = vmul.f32 %v5046_v51, %v7146_v22  ;;  %v3043_v40 = vmul.f32 %v5046_v51, %v7147_v15  ;;  %v1493_v4 = vmul.f32 %v4977_v26, %v6187_v59 }
 0x267   : > { %v2779_v32 = vadd.f32 %v2731_v17, %v2614_v13  ;;  %v2780_v38 = vadd.f32 %v2732_v31, %v2615_v58  ;;  %v2895_v2 = vrot.slane %v2824_v44, 1  ;;  %v1494_v56 = vmul.f32 %v4977_v26, %v6194_v7 }
 0x268   : > { %v2990_v48 = vadd.f32 %v2894_v55, %v2778_v1  ;;  %v3152_v53 = vrot.slane %v3042_v28, 2  ;;  %v3153_v42 = vrot.slane %v3043_v40, 2  ;;  %v1530_v9 = vmul.f32 %v4967_v10, %v6187_v59 }
 0x269   : > { %v2896_v61 = vsel %vm1566_vm1, %v2894_v55, %v2895_v2  ;;  %v2992_v36 = vadd.f32 %v2895_v2, %v2780_v38  ;;  %v1531_v18 = vmul.f32 %v4967_v10, %v6194_v7  ;;  %v1757_v30 = vmul.f32 %v4989_v34, %v6187_v59 }
 0x26a   : > { %v2991_v24 = vadd.f32 %v2896_v61, %v2779_v32  ;;  %v3154_v52 = vsel %vm1811_vm0, %v3152_v53, %v3153_v42  ;;  %v3156_v22 = vsel %vm1811_vm0, %v3153_v42, %v7040_v60  ;;  %v3266_v17 = vadd.f32 %v3152_v53, %v2990_v48 }
 0x26b   : > { %v3268_v15 = vadd.f32 %v3156_v22, %v2992_v36  ;;  %v1609_v31 = vrot.slane %v1530_v9, 1  ;;  %v1610_v19 = vrot.slane %v1531_v18, 1  ;;  %v1758_v6 = vmul.f32 %v4989_v34, %v6194_v7 }
 0x26c   : > { %v3267_v8 = vadd.f32 %v3154_v52, %v2991_v24  ;;  %v3321_v57 = vadd.f32 %v6466_v37, %v3266_v17  ;;  %v1882_v50 = vrot.slane %v1757_v30, 2  ;;  %v2099_v59 = vmul.f32 %v5020_v29, %v6180_v21 }
 0x26d   : > { %v3323_v46 = vadd.f32 %v6466_v37, %v3268_v15  ;;  %v1611_v16 = vsel %vm1566_vm1, %v1609_v31, %v1610_v19  ;;  %v1705_v35 = vadd.f32 %v1609_v31, %v4996_v54  ;;  %v1707_v5 = vadd.f32 %v1610_v19, %v1494_v56 }
 0x26e   : > { %v3322_v0 = vadd.f32 %v6466_v37, %v3267_v8  ;;  %v3369_v3 = vmax.f32 %v3321_v57, 0.0  ;;  %v1706_v49 = vadd.f32 %v1611_v16, %v1493_v4  ;;  %v1883_v13 = vrot.slane %v1758_v6, 2 }
 0x26f   : > { %v3371_v7 = vmax.f32 %v3323_v46, 0.0  ;;  %v1982_v58 = vadd.f32 %v1882_v50, %v1705_v35  ;;  %v2100_v44 = vmul.f32 %v5020_v29, %v6219_v11  ;;  %v2184_v55 = vmul.f32 %v5023_v20, %v6180_v21 }
 0x270   : > { %v3370_v1 = vmax.f32 %v3322_v0, 0.0  ;;  %v3417_v28 = vmin.f32 %v3369_v3, 6.0  ;;  %v1884_v40 = vsel %vm1811_vm0, %v1882_v50, %v1883_v13  ;;  %v1886_v32 = vsel %vm1811_vm0, %v1883_v13, %v7083_v25 }
 0x271   : > { %v3419_v38 = vmin.f32 %v3371_v7, 6.0  ;;  %v1983_v2 = vadd.f32 %v1884_v40, %v1706_v49  ;;  %v1984_v56 = vadd.f32 %v1886_v32, %v1707_v5  ;;  %v2146_v4 = vadd.f32 %v5062_v62, %v1982_v58 }
 0x272   : > { %v3418_v48 = vmin.f32 %v3370_v1, 6.0  ;;  %v3528_v53 = vrot.slane %v3417_v28, 7  ;;  %v2185_v29 = vmul.f32 %v5023_v20, %v6219_v11  ;;  %v2262_v42 = vrot.slane %v2184_v55, 1 }
 0x273   : > { %v3531_v9 = vrot.slane %v3419_v38, 7  ;;  %v2147_v61 = vadd.f32 %v2099_v59, %v1983_v2  ;;  %v2148_v36 = vadd.f32 %v2100_v44, %v1984_v56  ;;  %v2410_v18 = vmul.f32 %v5010_v27, %v6180_v21 }
 0x274   : > { %v3529_v30 = vrot.slane %v3418_v48, 7  ;;  %v2263_v24 = vrot.slane %v2185_v29, 1  ;;  %v2358_v52 = vadd.f32 %v2262_v42, %v2146_v4  ;;  %v2411_v22 = vmul.f32 %v5010_v27, %v6219_v11 }
 0x275   : > { %v2534_v17 = vrot.slane %v2410_v18, 2  ;;  %v2752_v15 = vmul.f32 %v5036_v39, %v6239_v45  ;;  %v2753_v31 = vmul.f32 %v5036_v39, %v6288_v14  ;;  %v2837_v19 = vmul.f32 %v5039_v47, %v6239_v45 }
 0x276   : > { %v3530_v6 = vsel %vm3492_vm2, %v3528_v53, %v3529_v30  ;;  %v3532_v8 = vsel %vm3492_vm2, %v3529_v30, %v3531_v9  ;;  %v2264_v57 = vsel %vm1566_vm1, %v2262_v42, %v2263_v24  ;;  %v2360_v50 = vadd.f32 %v2263_v24, %v2148_v36  ;;  %v4324_v30 = vpop.f32.mrf.mxu0 }
 0x277   : > { %v3612_v59 = vpack.c.bf16 %v3532_v8, %v3530_v6  ;;  %v2359_v46 = vadd.f32 %v2264_v57, %v2147_v61  ;;  %v2535_v16 = vrot.slane %v2411_v22, 2  ;;  %v2634_v35 = vadd.f32 %v2534_v17, %v2358_v52 }
 0x278   : > { %v2838_v5 = vmul.f32 %v5039_v47, %v6288_v14  ;;  %v2915_v0 = vrot.slane %v2837_v19, 1  ;;  %v3063_v39 = vmul.f32 %v5046_v51, %v6239_v45  ;;  %v3064_v3 = vmul.f32 %v5046_v51, %v6288_v14 }
 0x279   : > { %4335 = vmatmul.mubr.bf16.gmra.mxu0 %v3612_v59  ;;  %v2536_v49 = vsel %vm1811_vm0, %v2534_v17, %v2535_v16  ;;  %v2538_v13 = vsel %vm1811_vm0, %v2535_v16, %v7065_v41  ;;  %v2799_v7 = vadd.f32 %v5086_v23, %v2634_v35  ;;  %v1496_v58 = vmul.f32 %v4977_v26, %v6180_v21 }
 0x27a   : > { %v2635_v44 = vadd.f32 %v2536_v49, %v2359_v46  ;;  %v2636_v55 = vadd.f32 %v2538_v13, %v2360_v50  ;;  %v2916_v1 = vrot.slane %v2838_v5, 1  ;;  %v3187_v28 = vrot.slane %v3063_v39, 2 }
 0x27b   : > { %v3011_v40 = vadd.f32 %v2915_v0, %v2799_v7  ;;  %v3188_v32 = vrot.slane %v3064_v3, 2  ;;  %v1497_v51 = vmul.f32 %v4977_v26, %v6219_v11  ;;  %v1532_v38 = vmul.f32 %v4967_v10, %v6180_v21 }
 0x27c   : > { %v2800_v2 = vadd.f32 %v2752_v15, %v2635_v44  ;;  %v2801_v56 = vadd.f32 %v2753_v31, %v2636_v55  ;;  %v2917_v4 = vsel %vm1566_vm1, %v2915_v0, %v2916_v1  ;;  %v1533_v48 = vmul.f32 %v4967_v10, %v6219_v11 }
 0x27d   : > { %v3189_v53 = vsel %vm1811_vm0, %v3187_v28, %v3188_v32  ;;  %v3191_v29 = vsel %vm1811_vm0, %v3188_v32, %v7040_v60  ;;  %v3287_v42 = vadd.f32 %v3187_v28, %v3011_v40  ;;  %v1612_v9 = vrot.slane %v1532_v38, 1  ;;  %v4340_v46 = vpop.f32.mrf.mxu1 }
 0x27e   : > { %v3012_v61 = vadd.f32 %v2917_v4, %v2800_v2  ;;  %v3013_v36 = vadd.f32 %v2916_v1, %v2801_v56  ;;  %v1613_v26 = vrot.slane %v1533_v48, 1  ;;  %v1760_v18 = vmul.f32 %v4989_v34, %v6180_v21 }
 0x27f   : > { %v3342_v24 = vadd.f32 %v6466_v37, %v3287_v42  ;;  %v1708_v52 = vadd.f32 %v1612_v9, %v4996_v54  ;;  %v1761_v10 = vmul.f32 %v4989_v34, %v6219_v11  ;;  %v2186_v22 = vmul.f32 %v5023_v20, %v6239_v45  ;;  %v3719_v11 = vpop.f32.mrf.mxu0  ;;  %v3783_v32 = vpop.f32.mrf.mxu1 }
 0x280   : > { %v3288_v17 = vadd.f32 %v3189_v53, %v3012_v61  ;;  %v3289_v15 = vadd.f32 %v3191_v29, %v3013_v36  ;;  %v1614_v31 = vsel %vm1566_vm1, %v1612_v9, %v1613_v26  ;;  %v1710_v19 = vadd.f32 %v1613_v26, %v1497_v51  ;;  %v4431_v26 = vld [vmem:[%s4557_s8 + $0x10] sm:$0xff] }
 0x281   : > { %v3390_v6 = vmax.f32 %v3342_v24, 0.0  ;;  %v1709_v8 = vadd.f32 %v1614_v31, %v1496_v58  ;;  %v1887_v57 = vrot.slane %v1760_v18, 2  ;;  %v1888_v21 = vrot.slane %v1761_v10, 2  ;;  %v4325_v40 = vpop.f32.mrf.mxu0 }
 0x282   : > { %v3343_v50 = vadd.f32 %v6466_v37, %v3288_v17  ;;  %v3344_v59 = vadd.f32 %v6466_v37, %v3289_v15  ;;  %v2187_v54 = vmul.f32 %v5023_v20, %v6288_v14  ;;  %v2265_v34 = vrot.slane %v2186_v22, 1 }
 0x283   : > { %v3438_v16 = vmin.f32 %v3390_v6, 6.0  ;;  %v1889_v35 = vsel %vm1811_vm0, %v1887_v57, %v1888_v21  ;;  %v1891_v5 = vsel %vm1811_vm0, %v1888_v21, %v7083_v25  ;;  %v1985_v0 = vadd.f32 %v1887_v57, %v1708_v52  ;;  %v6656_v25 = vld [vmem:[%s6830_s6] ss:$0 sm:$0xff]  ;;  %v3722_v12 = vpop.f32.mrf.mxu0 }
 0x284   : > { %v3391_v39 = vmax.f32 %v3343_v50, 0.0  ;;  %v3392_v3 = vmax.f32 %v3344_v59, 0.0  ;;  %v1986_v49 = vadd.f32 %v1889_v35, %v1709_v8  ;;  %v1987_v13 = vadd.f32 %v1891_v5, %v1710_v19  ;;  %v4432_v6 = vld [vmem:[%s4557_s8] sm:$0xff]  ;;  %v4433_v59 = vld [vmem:[%s4557_s8 + $0x18] sm:$0xff] }
 0x285   : > { %v3563_v7 = vrot.slane %v3438_v16, 7  ;;  %v2149_v58 = vadd.f32 %v5062_v62, %v1985_v0  ;;  %v2266_v44 = vrot.slane %v2187_v54, 1  ;;  %v2413_v20 = vmul.f32 %v5010_v27, %v6239_v45 }
 0x286   : > { %v3439_v14 = vmin.f32 %v3391_v39, 6.0  ;;  %v3440_v55 = vmin.f32 %v3392_v3, 6.0  ;;  %v2150_v1 = vadd.f32 %v6247_v43, %v1986_v49  ;;  %v2151_v28 = vadd.f32 %v6294_v63, %v1987_v13  ;;  %v4436_v39 = vld [vmem:[%s4557_s8 + $0x30] sm:$0xff] }
 0x287   : > { %v2267_v51 = vsel %vm1566_vm1, %v2265_v34, %v2266_v44  ;;  %v2361_v62 = vadd.f32 %v2265_v34, %v2149_v58  ;;  %v2539_v38 = vrot.slane %v2413_v20, 2  ;;  %v2543_v27 = vsel %vm1811_vm0, %v2540_v33, %v7065_v41  ;;  %v4434_v34 = vld [vmem:[%s4557_s8 + $0x8] sm:$0xff] }
 0x288   : > { %v3564_v45 = vrot.slane %v3439_v14, 7  ;;  %v3566_v43 = vrot.slane %v3440_v55, 7  ;;  %v2362_v63 = vadd.f32 %v2267_v51, %v2150_v1  ;;  %v2363_v2 = vadd.f32 %v2266_v44, %v2151_v28  ;;  %v4437_v55 = vld [vmem:[%s4557_s8 + $0x80] sm:$0xff] }
 0x289   : > { %v2541_v56 = vsel %vm1811_vm0, %v2539_v38, %v2540_v33  ;;  %v2637_v4 = vadd.f32 %v2539_v38, %v2361_v62  ;;  %v2839_v48 = vmul.f32 0.0, %v5039_v47  ;;  %v4025_v53 = vadd.f32 %v4324_v30, %v6656_v25  ;;  %v4341_v33 = vpop.f32.mrf.mxu1  ;;  %v4439_v62 = vld [vmem:[%s4557_s8 + $0x98] sm:$0xff] }
 0x28a   : > { %v3565_v29 = vsel %vm3492_vm2, %v3563_v7, %v3564_v45  ;;  %v3567_v42 = vsel %vm3492_vm2, %v3564_v45, %v3566_v43  ;;  %v2638_v9 = vadd.f32 %v2541_v56, %v2362_v63  ;;  %v2639_v41 = vadd.f32 %v2543_v27, %v2363_v2  ;;  %v4440_v27 = vld [vmem:[%s4557_s8 + $0x88] sm:$0xff]  ;;  %v4441_v2 = vld [vmem:[%s4557_s8 + $0x38] sm:$0xff] }
 0x28b   : > { %v3619_v61 = vpack.c.bf16 %v3567_v42, %v3565_v29  ;;  %v2802_v47 = vadd.f32 %v5086_v23, %v2637_v4  ;;  %v2918_v36 = vrot.slane %v2839_v48, 1  ;;  %v4057_v18 = vadd.f32 %v4431_v26, %v4025_v53  ;;  %v3786_v21 = vpop.f32.mrf.mxu1  ;;  %v4442_v42 = vld [vmem:[%s4557_s8 + $0x28] sm:$0xff] }
 0x28c   : > { %v2803_v30 = vadd.f32 %v5086_v23, %v2638_v9  ;;  %v2804_v24 = vadd.f32 %v5086_v23, %v2639_v41  ;;  %v4023_v52 = vadd.f32 %v6656_v25, %v3719_v11  ;;  %v4026_v22 = vadd.f32 %v4325_v40, %v6656_v25 }
 0x28d   : > { %4350 = vmatprep.mubr.bf16.mxu1 %v3619_v61  ;;  %v3014_v10 = vadd.f32 %v2918_v36, %v2802_v47  ;;  %4090 = vst.msk [vmem:[%s6675_s13 + $0x10] sm:$0xff] %vm4087_vm3, %v4057_v18  ;;  %v4024_v17 = vadd.f32 %v6656_v25, %v3722_v12  ;;  %v4041_v15 = vadd.f32 %v4340_v46, %v6656_v25  ;;  %v4328_v31 = vpop.f32.mrf.mxu0  ;;  %v4435_v46 = vld [vmem:[%s4557_s8 + $0x90] sm:$0xff] }
 0x28e   : > { %v3015_v19 = vadd.f32 %v2918_v36, %v2803_v30  ;;  %v3016_v23 = vadd.f32 %v2918_v36, %v2804_v24  ;;  %v4055_v8 = vadd.f32 %v4432_v6, %v4023_v52  ;;  %v4029_v57 = vadd.f32 %v4328_v31, %v6656_v25  ;;  %v4443_v24 = vld [vmem:[%s4557_s8 + $0xb0] sm:$0xff] }
 0x28f   : > { %v3290_v50 = vadd.f32 %v7040_v60, %v3014_v10  ;;  %v4058_v54 = vadd.f32 %v4433_v59, %v4026_v22  ;;  %v4056_v11 = vadd.f32 %v4434_v34, %v4024_v17  ;;  %v4073_v16 = vadd.f32 %v4435_v46, %v4041_v15  ;;  %v3735_v35 = vpop.f32.mrf.mxu0  ;;  %v4444_v17 = vld [vmem:[%s4557_s8 + $0xa0] sm:$0xff]  ;;  %v4447_v34 = vld [vmem:[%s4557_s8 + $0x50] sm:$0xff] }
 0x290   : > { %v3291_v5 = vadd.f32 %v7040_v60, %v3015_v19  ;;  %v3292_v0 = vadd.f32 %v7040_v60, %v3016_v23  ;;  %4088 = vst.msk [vmem:[%s6675_s13] sm:$0xff] %vm4087_vm3, %v4055_v8  ;;  %v4061_v3 = vadd.f32 %v4436_v39, %v4029_v57  ;;  %v4039_v49 = vadd.f32 %v6656_v25, %v3783_v32  ;;  %v4438_v32 = vld [vmem:[%s4557_s8 + $0x20] sm:$0xff]  ;;  %v4445_v23 = vld [vmem:[%s4557_s8 + $0xb8] sm:$0xff]  ;;  %v4446_v57 = vld [vmem:[%s4557_s8 + $0xa8] sm:$0xff] }
 0x291   : > { %v3345_v13 = vadd.f32 %v6466_v37, %v3290_v50  ;;  %4091 = vst.msk [vmem:[%s6675_s13 + $0x18] sm:$0xff] %vm4087_vm3, %v4058_v54  ;;  %4089 = vst.msk [vmem:[%s6675_s13 + $0x8] sm:$0xff] %vm4087_vm3, %v4056_v11  ;;  %v4027_v60 = vadd.f32 %v6656_v25, %v3735_v35  ;;  %v4042_v7 = vadd.f32 %v4341_v33, %v6656_v25  ;;  %v4329_v58 = vpop.f32.mrf.mxu0  ;;  %v4448_v35 = vld [vmem:[%s4557_s8 + $0x40] sm:$0xff] }
 0x292   : > { %4106 = vst.msk [vmem:[%s6675_s13 + $0x90] sm:$0xff] %vm4087_vm3, %v4073_v16  ;;  %v4040_v44 = vadd.f32 %v6656_v25, %v3786_v21  ;;  %v3346_v20 = vadd.f32 %v6466_v37, %v3291_v5  ;;  %v3347_v14 = vadd.f32 %v6466_v37, %v3292_v0  ;;  %4094 = vst.msk [vmem:[%s6675_s13 + $0x30] sm:$0xff] %vm4087_vm3, %v4061_v3  ;;  %v4449_v3 = vld [vmem:[%s4557_s8 + $0x58] sm:$0xff] }
 0x293   : > { %v4071_v1 = vadd.f32 %v4437_v55, %v4039_v49  ;;  %v4030_v28 = vadd.f32 %v4329_v58, %v6656_v25  ;;  %v3393_v40 = vmax.f32 %v3345_v13, 0.0  ;;  %v4059_v51 = vadd.f32 %v4438_v32, %v4027_v60  ;;  %v3738_v37 = vpop.f32.mrf.mxu0  ;;  %v4450_v60 = vld [vmem:[%s4557_s8 + $0x48] sm:$0xff] }
 0x294   : > { %v4074_v38 = vadd.f32 %v4439_v62, %v4042_v7  ;;  %v4072_v45 = vadd.f32 %v4440_v27, %v4040_v44  ;;  %v3394_v43 = vmax.f32 %v3346_v20, 0.0  ;;  %v3395_v63 = vmax.f32 %v3347_v14, 0.0  ;;  %v4451_v14 = vld [vmem:[%s4557_s8 + $0xd0] sm:$0xff] }
 0x295   : > { %4104 = vst.msk [vmem:[%s6675_s13 + $0x80] sm:$0xff] %vm4087_vm3, %v4071_v1  ;;  %v4062_v56 = vadd.f32 %v4441_v2, %v4030_v28  ;;  %v4028_v4 = vadd.f32 %v6656_v25, %v3738_v37  ;;  %v3441_v48 = vmin.f32 %v3393_v40, 6.0  ;;  %4092 = vst.msk [vmem:[%s6675_s13 + $0x20] sm:$0xff] %vm4087_vm3, %v4059_v51  ;;  %v4452_v40 = vld [vmem:[%s4557_s8 + $0xc0] sm:$0xff]  ;;  %v4454_v37 = vld [vmem:[%s4557_s8 + $0xc8] sm:$0xff] }
 0x296   : > { %4107 = vst.msk [vmem:[%s6675_s13 + $0x98] sm:$0xff] %vm4087_vm3, %v4074_v38  ;;  %4105 = vst.msk [vmem:[%s6675_s13 + $0x88] sm:$0xff] %vm4087_vm3, %v4072_v45  ;;  %v3442_v53 = vmin.f32 %v3394_v43, 6.0  ;;  %v3443_v29 = vmin.f32 %v3395_v63, 6.0  ;;  %v4453_v38 = vld [vmem:[%s4557_s8 + $0xd8] sm:$0xff] }
 0x297   : > { %4095 = vst.msk [vmem:[%s6675_s13 + $0x38] sm:$0xff] %vm4087_vm3, %v4062_v56  ;;  %v4060_v9 = vadd.f32 %v4442_v42, %v4028_v4  ;;  %v3568_v41 = vrot.slane %v3441_v48, 7  ;;  %v4455_v4 = vld [vmem:[%s4557_s8 + $0x70] sm:$0xff]  ;;  %v4456_v42 = vld [vmem:[%s4557_s8 + $0x60] sm:$0xff] }
 0x298   : > { %v3569_v12 = vrot.slane %v3442_v53, 7  ;;  %v3571_v33 = vrot.slane %v3443_v29, 7 }
 0x299   : > { %4093 = vst.msk [vmem:[%s6675_s13 + $0x28] sm:$0xff] %vm4087_vm3, %v4060_v9 }
 0x29a   : > { %v3570_v61 = vsel %vm3492_vm2, %v3568_v41, %v3569_v12  ;;  %v3572_v47 = vsel %vm3492_vm2, %v3569_v12, %v3571_v33  ;;  %v4457_v33 = vld [vmem:[%s4557_s8 + $0x78] sm:$0xff] }
 0x29b   : > { %v3620_v36 = vpack.c.bf16 %v3572_v47, %v3570_v61 }
 0x29d   : > { %4351 = vmatmul.mubr.bf16.gmra.mxu1 %v3620_v36  ;;  %v4458_v36 = vld [vmem:[%s4557_s8 + $0x68] sm:$0xff] }
 0x2b7   : > { %v4344_v26 = vpop.f32.mrf.mxu1 }
 0x2b8   : > { %v4045_v18 = vadd.f32 %v4344_v26, %v6656_v25 }
 0x2b9   : > { %v3799_v30 = vpop.f32.mrf.mxu1 }
 0x2ba   : > { %v4077_v52 = vadd.f32 %v4443_v24, %v4045_v18  ;;  %v4043_v10 = vadd.f32 %v6656_v25, %v3799_v30 }
 0x2bb   : > { %v4345_v22 = vpop.f32.mrf.mxu1 }
 0x2bc   : > { %4110 = vst.msk [vmem:[%s6675_s13 + $0xb0] sm:$0xff] %vm4087_vm3, %v4077_v52  ;;  %v4075_v15 = vadd.f32 %v4444_v17, %v4043_v10  ;;  %v4046_v31 = vadd.f32 %v4345_v22, %v6656_v25  ;;  %v4459_v52 = vld [vmem:[%s4557_s8 + $0xf0] sm:$0xff] }
 0x2bd   : > { %v3802_v19 = vpop.f32.mrf.mxu1 }
 0x2be   : > { %4108 = vst.msk [vmem:[%s6675_s13 + $0xa0] sm:$0xff] %vm4087_vm3, %v4075_v15  ;;  %v4078_v6 = vadd.f32 %v4445_v23, %v4046_v31  ;;  %v4044_v8 = vadd.f32 %v6656_v25, %v3802_v19  ;;  %v4460_v15 = vld [vmem:[%s4557_s8 + $0xe0] sm:$0xff] }
 0x2c0   : > { %4111 = vst.msk [vmem:[%s6675_s13 + $0xb8] sm:$0xff] %vm4087_vm3, %v4078_v6  ;;  %v4076_v21 = vadd.f32 %v4446_v57, %v4044_v8  ;;  %v4461_v6 = vld [vmem:[%s4557_s8 + $0xf8] sm:$0xff] }
 0x2c2   : > { %4109 = vst.msk [vmem:[%s6675_s13 + $0xa8] sm:$0xff] %vm4087_vm3, %v4076_v21  ;;  %v4462_v21 = vld [vmem:[%s4557_s8 + $0xe8] sm:$0xff] }
 0x2ff   : > { %v4332_v50 = vpop.f32.mrf.mxu0 }
 0x300   : > { %v4033_v59 = vadd.f32 %v4332_v50, %v6656_v25 }
 0x301   : > { %v3751_v54 = vpop.f32.mrf.mxu0 }
 0x302   : > { %v4065_v11 = vadd.f32 %v4447_v34, %v4033_v59  ;;  %v4031_v46 = vadd.f32 %v6656_v25, %v3751_v54 }
 0x303   : > { %v4333_v16 = vpop.f32.mrf.mxu0 }
 0x304   : > { %4098 = vst.msk [vmem:[%s6675_s13 + $0x50] sm:$0xff] %vm4087_vm3, %v4065_v11  ;;  %v4063_v5 = vadd.f32 %v4448_v35, %v4031_v46  ;;  %v4034_v0 = vadd.f32 %v4333_v16, %v6656_v25 }
 0x305   : > { %v3754_v39 = vpop.f32.mrf.mxu0 }
 0x306   : > { %4096 = vst.msk [vmem:[%s6675_s13 + $0x40] sm:$0xff] %vm4087_vm3, %v4063_v5  ;;  %v4066_v49 = vadd.f32 %v4449_v3, %v4034_v0  ;;  %v4032_v13 = vadd.f32 %v6656_v25, %v3754_v39 }
 0x308   : > { %4099 = vst.msk [vmem:[%s6675_s13 + $0x58] sm:$0xff] %vm4087_vm3, %v4066_v49  ;;  %v4064_v7 = vadd.f32 %v4450_v60, %v4032_v13 }
 0x30a   : > { %4097 = vst.msk [vmem:[%s6675_s13 + $0x48] sm:$0xff] %vm4087_vm3, %v4064_v7 }
 0x312   : > { %v4348_v58 = vpop.f32.mrf.mxu1 }
 0x313   : > { %v4049_v44 = vadd.f32 %v4348_v58, %v6656_v25 }
 0x314   : > { %v3815_v20 = vpop.f32.mrf.mxu1 }
 0x315   : > { %v4081_v55 = vadd.f32 %v4451_v14, %v4049_v44  ;;  %v4047_v1 = vadd.f32 %v6656_v25, %v3815_v20 }
 0x316   : > { %v4349_v28 = vpop.f32.mrf.mxu1 }
 0x317   : > { %4114 = vst.msk [vmem:[%s6675_s13 + $0xd0] sm:$0xff] %vm4087_vm3, %v4081_v55  ;;  %v4079_v32 = vadd.f32 %v4452_v40, %v4047_v1  ;;  %v4050_v51 = vadd.f32 %v4349_v28, %v6656_v25 }
 0x318   : > { %v3818_v62 = vpop.f32.mrf.mxu1 }
 0x319   : > { %4112 = vst.msk [vmem:[%s6675_s13 + $0xc0] sm:$0xff] %vm4087_vm3, %v4079_v32  ;;  %v4082_v27 = vadd.f32 %v4453_v38, %v4050_v51  ;;  %v4048_v45 = vadd.f32 %v6656_v25, %v3818_v62 }
 0x31b   : > { %4115 = vst.msk [vmem:[%s6675_s13 + $0xd8] sm:$0xff] %vm4087_vm3, %v4082_v27  ;;  %v4080_v43 = vadd.f32 %v4454_v37, %v4048_v45 }
 0x31d   : > { %4113 = vst.msk [vmem:[%s6675_s13 + $0xc8] sm:$0xff] %vm4087_vm3, %v4080_v43 }
 0x339   : > { %v4336_v63 = vpop.f32.mrf.mxu0 }
 0x33a   : > { %v4037_v2 = vadd.f32 %v4336_v63, %v6656_v25 }
 0x33b   : > { %v3767_v56 = vpop.f32.mrf.mxu0 }
 0x33c   : > { %v4069_v48 = vadd.f32 %v4455_v4, %v4037_v2  ;;  %v4035_v53 = vadd.f32 %v6656_v25, %v3767_v56 }
 0x33d   : > { %v4337_v29 = vpop.f32.mrf.mxu0 }
 0x33e   : > { %4102 = vst.msk [vmem:[%s6675_s13 + $0x70] sm:$0xff] %vm4087_vm3, %v4069_v48  ;;  %v4067_v9 = vadd.f32 %v4456_v42, %v4035_v53  ;;  %v4038_v41 = vadd.f32 %v4337_v29, %v6656_v25 }
 0x33f   : > { %v3770_v12 = vpop.f32.mrf.mxu0 }
 0x340   : > { %4100 = vst.msk [vmem:[%s6675_s13 + $0x60] sm:$0xff] %vm4087_vm3, %v4067_v9  ;;  %v4070_v61 = vadd.f32 %v4457_v33, %v4038_v41  ;;  %v4036_v47 = vadd.f32 %v6656_v25, %v3770_v12 }
 0x342   : > { %4103 = vst.msk [vmem:[%s6675_s13 + $0x78] sm:$0xff] %vm4087_vm3, %v4070_v61  ;;  %v4068_v26 = vadd.f32 %v4458_v36, %v4036_v47 }
 0x344   : > { %4101 = vst.msk [vmem:[%s6675_s13 + $0x68] sm:$0xff] %vm4087_vm3, %v4068_v26 }
 0x35d   : > { %v4352_v18 = vpop.f32.mrf.mxu1 }
 0x35e   : > { %v4053_v30 = vadd.f32 %v4352_v18, %v6656_v25 }
 0x35f   : > { %v3831_v24 = vpop.f32.mrf.mxu1 }
 0x360   : > { %v4085_v10 = vadd.f32 %v4459_v52, %v4053_v30  ;;  %v4051_v22 = vadd.f32 %v6656_v25, %v3831_v24 }
 0x361   : > { %v4353_v17 = vpop.f32.mrf.mxu1 }
 0x362   : > { %4118 = vst.msk [vmem:[%s6675_s13 + $0xf0] sm:$0xff] %vm4087_vm3, %v4085_v10  ;;  %v4083_v31 = vadd.f32 %v4460_v15, %v4051_v22  ;;  %v4054_v19 = vadd.f32 %v4353_v17, %v6656_v25 }
 0x363   : > { %v3834_v23 = vpop.f32.mrf.mxu1 }
 0x364   : > { %4116 = vst.msk [vmem:[%s6675_s13 + $0xe0] sm:$0xff] %vm4087_vm3, %v4083_v31  ;;  %v4086_v8 = vadd.f32 %v4461_v6, %v4054_v19  ;;  %v4052_v57 = vadd.f32 %v6656_v25, %v3834_v23 }
 0x366   : > { %4119 = vst.msk [vmem:[%s6675_s13 + $0xf8] sm:$0xff] %vm4087_vm3, %v4086_v8  ;;  %v4084_v50 = vadd.f32 %v4462_v21, %v4052_v57 }
 0x368   : > { %4117 = vst.msk [vmem:[%s6675_s13 + $0xe8] sm:$0xff] %vm4087_vm3, %v4084_v50 }
 0x369 PF: > { %s17_s26 = sadd.s32 1, %s4485_s26   ;;  %s7148_s24 = smov %s4481_s25 }
 0x36a   : > { %p14_p5 = scmp.ge.s32.totalorder %s17_s26, 4   ;;  %s7149_s25 = smov %s7151_s27 }
 0x36c   :  { %16 = sbr.rel (!%p14_p5) target bundleno = 2 (0x2), region = 112 }

</bundles_post_ra>
